<compile_context>
chip_gen: v7x
topology: tpu7x:2x2x1
jax: 0.10.0
libtpu: 0.0.40
codegen_flags: <defaults>
</compile_context>

<pallas_src>
import jax
import jax.numpy as jnp
from jax.experimental import pallas as pl
from jax.experimental.pallas import tpu as pltpu

H = 64
W = 64
HW = H * W               # 4096 — lane-dense spatial axis
HW_SPLIT = 2             # 2-way lane split -> (180, 2048) blocks (v7x megacore)
HW_BLK = HW // HW_SPLIT
POS_C = 80               # positional-encoding channels
RAY_IN = 9               # nn.Linear(9, 100)
RAY_OUT = 100
OUT_C = RAY_OUT + POS_C  # 180


# ----------------------------------------------------------------------------
# Init-time constants (mirrors RayEncoder.__init__) — built once, reused.
# ----------------------------------------------------------------------------
def _get_encoding(size, d_model):
    # Mirrors RayEncoder._get_encoding: returns (size, 1, d_model)
    pos = jnp.arange(size, dtype=jnp.float32)[:, None]
    div_term = jnp.exp(
        jnp.arange(0, d_model, 2, dtype=jnp.float32)
        * (-jnp.log(jnp.float32(10000.0)) / d_model)
    )
    enc = jnp.zeros((size, d_model), dtype=jnp.float32)
    enc = enc.at[:, 0::2].set(jnp.sin(pos * div_term))
    enc = enc.at[:, 1::2].set(jnp.cos(pos * div_term))
    return enc[:, None, :]  # == unsqueeze(0).transpose(0, 1)


def make_pos_encoding():
    height_encoding = jnp.tile(_get_encoding(H, POS_C // 2), (1, W, 1))      # (64,64,40)
    width_encoding = jnp.tile(
        jnp.transpose(_get_encoding(W, POS_C // 2), (1, 0, 2)), (H, 1, 1)
    )                                                                         # (64,64,40)
    pe = jnp.concatenate([height_encoding, width_encoding], axis=2)           # (64,64,80)
    return jnp.transpose(pe, (2, 0, 1))                                       # (80,64,64)


def make_template(pos_encoding, dtype=jnp.float32):
    """Resident output template: zeros in channels [0:100), pos-encoding in [100:180).

    Built ONCE at init (hoisted out of the per-call wrapper).
    """
    pe_flat = pos_encoding.reshape(POS_C, HW).astype(dtype)                   # (80, 4096)
    return jnp.concatenate([jnp.zeros((RAY_OUT, HW), dtype), pe_flat], axis=0)  # (180, 4096)


# ----------------------------------------------------------------------------
# Pallas kernel: one aligned full-block store per (HW-half, batch) grid point:
#   out(180,2048) = template_half(180,2048) + lane-broadcast(h_col(180,1))
# ----------------------------------------------------------------------------
def ray_encoder_kernel(h_ref, tmpl_ref, out_ref):
    # h_ref:    (OUT_C, 1)      linear(rays) in [0:100), zeros in [100:180)
    # tmpl_ref: (OUT_C, HW_BLK) zeros in [0:100), pos-encoding in [100:180)
    # out_ref:  (OUT_C, HW_BLK) one batch element, one lane half
    h = h_ref[...].astype(jnp.float32)
    tmpl = tmpl_ref[...].astype(jnp.float32)
    out_ref[...] = (tmpl + jnp.broadcast_to(h, tmpl.shape)).astype(out_ref.dtype)


def ray_encoder(pos, rays, weight, bias, template, *, out_dtype=jnp.float32):
    """pos: unused (matches reference forward). rays: (B, 9) float32."""
    del pos
    B = rays.shape[0]
    f32 = jnp.float32

    # 9->100 linear in the XLA wrapper (trivial FLOPs; keeps the HBM-write-bound
    # kernel free of MXU push/pop and lane->sublane transposes).
    h = rays.astype(f32) @ weight.T.astype(f32) + bias.astype(f32)        # (B, 100)
    h_col = jnp.concatenate([h, jnp.zeros((B, POS_C), f32)], axis=1)      # (B, 180)
    h_col = h_col[:, :, None]                                             # (B, 180, 1)

    out_bytes = jnp.dtype(out_dtype).itemsize
    out_flat = pl.pallas_call(
        ray_encoder_kernel,
        out_shape=jax.ShapeDtypeStruct((B, OUT_C, HW), out_dtype),
        grid_spec=pltpu.PrefetchScalarGridSpec(
            num_scalar_prefetch=0,
            # HW-half is the OUTER axis so the template half changes only twice
            # total (not every batch step); batch is the inner axis.
            grid=(HW_SPLIT, B),
            in_specs=[
                # per-batch channel-major column (squeezed batch dim)
                pl.BlockSpec((None, OUT_C, 1), lambda j, i: (i, 0, 0)),
                # template half: depends only on the outer axis
                pl.BlockSpec((OUT_C, HW_BLK), lambda j, i: (0, j)),
            ],
            out_specs=pl.BlockSpec((None, OUT_C, HW_BLK), lambda j, i: (i, 0, j)),
        ),
        compiler_params=pltpu.CompilerParams(
            dimension_semantics=("parallel", "parallel"),  # both v7x TCs busy at B=1
            vmem_limit_bytes=16 * 1024 * 1024,             # actual footprint ~6 MiB
        ),
        cost_estimate=pl.CostEstimate(
            flops=B * OUT_C * HW,
            transcendentals=0,
            bytes_accessed=(B * OUT_C * HW) * out_bytes
            + (OUT_C * HW) * template.dtype.itemsize
            + (B * OUT_C) * 4,
        ),
    )(h_col, template)

    # Free in HBM: H*W is contiguous in the (B, 180, 4096) layout.
    return out_flat.reshape(B, OUT_C, H, W)


if __name__ == "__main__":
    key = jax.random.PRNGKey(0)
    k_rays, k_pos, k_w, k_b = jax.random.split(key, 4)

    B = 2
    rays = jax.random.normal(k_rays, (B, RAY_IN), dtype=jnp.float32)
    pos = jax.random.normal(k_pos, (B, 3), dtype=jnp.float32)  # unused by forward

    # Deterministic nn.Linear(9, 100) parameters (synthetic, not a checkpoint)
    bound = 1.0 / (RAY_IN ** 0.5)
    weight = jax.random.uniform(k_w, (RAY_OUT, RAY_IN), jnp.float32, -bound, bound)
    bias = jax.random.uniform(k_b, (RAY_OUT,), jnp.float32, -bound, bound)

    # Init-time constants (hoisted): pos-encoding and the output template.
    pos_encoding = make_pos_encoding()                       # (80, 64, 64)
    template = make_template(pos_encoding, jnp.float32)      # (180, 4096)

    out = ray_encoder(pos, rays, weight, bias, template)
    out = jax.block_until_ready(out)

    # Pure-JAX reference of the PyTorch forward
    h_ref = rays @ weight.T + bias                                        # (B, 100)
    h_ref = jnp.broadcast_to(h_ref[:, :, None, None], (B, RAY_OUT, H, W))
    h2_ref = jnp.broadcast_to(pos_encoding[None], (B, POS_C, H, W))
    ref = jnp.concatenate([h_ref, h2_ref], axis=1)                        # (B, 180, 64, 64)

    assert out.shape == (B, OUT_C, H, W), out.shape
    assert jnp.allclose(out, ref, atol=1e-5, rtol=1e-5)
    print("KERNEL_OK")
</pallas_src>

<mosaic_0001>
module attributes {stable_mosaic.version = 11 : i64} {
  func.func @ray_encoder_kernel(%arg0: i32, %arg1: i32, %arg2: memref<1x180x1xf32, #tpu.memory_space<vmem>>, %arg3: memref<180x2048xf32, #tpu.memory_space<vmem>>, %arg4: memref<1x180x2048xf32, #tpu.memory_space<vmem>>) attributes {dimension_semantics = [#tpu.dimension_semantics<parallel>, #tpu.dimension_semantics<parallel>], iteration_bounds = array<i64: 2, 2>, scalar_prefetch = 0 : i64, scratch_operands = 0 : i64, tpu.core_type = #tpu.core_type<tc>, window_params = [{transform_indices = @transform_0, window_bounds = array<i64: 1, 180, 1>}, {transform_indices = @transform_1, window_bounds = array<i64: 180, 2048>}, {transform_indices = @transform_2, window_bounds = array<i64: 1, 180, 2048>}]} {
    %c0 = arith.constant 0 : index
    %c0_0 = arith.constant 0 : index
    %c0_1 = arith.constant 0 : index
    %0 = vector.load %arg2[%c0, %c0_0, %c0_1] : memref<1x180x1xf32, #tpu.memory_space<vmem>>, vector<1x180x1xf32>
    %1 = vector.shape_cast %0 : vector<1x180x1xf32> to vector<180x1xf32>
    %c0_2 = arith.constant 0 : index
    %c0_3 = arith.constant 0 : index
    %2 = vector.load %arg3[%c0_2, %c0_3] : memref<180x2048xf32, #tpu.memory_space<vmem>>, vector<180x2048xf32>
    %3 = vector.shape_cast %1 : vector<180x1xf32> to vector<180x1xf32>
    %4 = vector.broadcast %3 : vector<180x1xf32> to vector<180x2048xf32>
    %5 = arith.addf %2, %4 : vector<180x2048xf32>
    %c0_4 = arith.constant 0 : index
    %c0_5 = arith.constant 0 : index
    %c0_6 = arith.constant 0 : index
    %6 = vector.load %arg4[%c0_4, %c0_5, %c0_6] : memref<1x180x2048xf32, #tpu.memory_space<vmem>>, vector<1x180x2048xf32>
    %7 = vector.shape_cast %6 : vector<1x180x2048xf32> to vector<180x2048xf32>
    %8 = vector.shape_cast %5 : vector<180x2048xf32> to vector<1x180x2048xf32>
    tpu.vector_store %arg4[%c0_4, %c0_5, %c0_6], %8 {strides = array<i32>} : memref<1x180x2048xf32, #tpu.memory_space<vmem>>, vector<1x180x2048xf32>,
    return
  }
  func.func @transform_0(%arg0: i32, %arg1: i32) -> (i32, i32, i32) {
    %c0_i32 = arith.constant 0 : i32
    %c0_i32_0 = arith.constant 0 : i32
    %c0_i32_1 = arith.constant 0 : i32
    return %arg1, %c0_i32, %c0_i32_0 : i32, i32, i32
  }
  func.func @transform_1(%arg0: i32, %arg1: i32) -> (i32, i32) {
    %c0_i32 = arith.constant 0 : i32
    %c0_i32_0 = arith.constant 0 : i32
    return %c0_i32, %arg0 : i32, i32
  }
  func.func @transform_2(%arg0: i32, %arg1: i32) -> (i32, i32, i32) {
    %c0_i32 = arith.constant 0 : i32
    %c0_i32_0 = arith.constant 0 : i32
    return %arg1, %c0_i32, %arg0 : i32, i32, i32
  }
}

</mosaic_0001>

<bundles_post_ra>
// kernel: tpu_custom_call.1
= control target key start
LH: loop header
LB: loop body
LE: loop exit
PB: predicated region body
PF: predicated region fallthrough
CT: control target
= control target key end

     0   :  { %7 = vsyncpa [#allocation3], 0  ;;  %s4596_s0 = inlined_call_operand.vmem [shape: f32[2,180,1], index: 0, kind: input, shape index: {}]   ;;  %s4597_s1 = inlined_call_operand.hbm [shape: f32[180,4096], index: 1, kind: input, shape index: {}]   ;;  %s4598_s2 = inlined_call_operand.vmem [shape: f32[2,180,4096], index: 2, kind: output, shape index: {}]  }
   0x1   :  { %9 = vsyncpa [#allocation3 + $0x1], 0  ;;  %s2532_s9 = smov 0   ;;  %s2534_s10 = smov 0  }
   0x2   :  { %s2536_s11 = smov 0   ;;  %s2538_s12 = smov 0  }
   0x3   :  { %s2540_s13 = smov 0   ;;  %s2542_s14 = smov 0  }
   0x4   :  { %s2544_s15 = smov 0   ;;  %s2546_s16 = smov 0  }
   0x5   :  { %s2548_s17 = smov 0   ;;  %s2550_s18 = smov 0  }
   0x6 LB: > { %s2287_s19 = sadd.s32 4294967295, %s2510_s18   ;;  %s24_s20 = sadd.s32 1, %s2502_s16  ;;  %s2510_s18 = sphi %s2550_s18, %s15_s18   ;;  %s2506_s17 = sphi %s2548_s17, %s4612_s17   ;;  %s2502_s16 = sphi %s2546_s16, %s4611_s16   ;;  %s2498_s15 = sphi %s2544_s15, %s4610_s15   ;;  %s2494_s14 = sphi %s2542_s14, %s4609_s14   ;;  %s2490_s13 = sphi %s2540_s13, %s4608_s13   ;;  %s2486_s12 = sphi %s2538_s12, %s4607_s12   ;;  %s2482_s11 = sphi %s2536_s11, %s4606_s11   ;;  %s2478_s10 = sphi %s2534_s10, %s4605_s10   ;;  %s2474_s9 = sphi %s2532_s9, %s4604_s9  }
   0x7   : > { %p25_p0 = scmp.ge.s32.totalorder %s24_s20, 2  ;;  %s27_s21 = sadd.s32 1, %s2506_s17 }
   0x8   : > { %s60_s22 = sadd.s32 1, %s2490_s13  ;;  %p67_p1 = scmp.ne.s32.totalorder %s2490_s13, %s2486_s12 }
   0x9   : > { %s4614_s20 = smov (%p25_p0, %s24_s20), 0  ;;  %s4616_s21 = smov (!%p25_p0, %s27_s21), %s2506_s17 }
   0xa   : > { %p68_p2 = scmp.eq.s32.totalorder %s2510_s18, 0  ;;  %p73_p3 = scmp.ne.s32.totalorder %s2486_s12, %s2482_s11 }
   0xb   : > { %p29_p4 = scmp.ge.s32.totalorder %s4616_s21, 2  ;;  %p74_p5 = scmp.eq.s32.totalorder %s2287_s19, 0 }
   0xc   : > { %p2591_p6 = por %p68_p2, %p67_p1  ;;  %s83_s24 = ssub.s32 %s2502_s16, %s4614_s20 }
   0xd   : > { %s4618_s21 = smov (%p29_p4, %s4616_s21), 0  ;;  %p2599_p7 = por %p74_p5, %p73_p3 }
   0xe   : > { %s88_s26 = sadd.s32 1, %s2478_s10  ;;  %s57_s27 = ssub.s32 %s2506_s17, %s4618_s21 }
   0xf   : > { %p98_p8 = scmp.ne.s32.totalorder %s2478_s10, %s2474_s9  ;;  %p58_p9 = scmp.eq.s32.totalorder %s57_s27, 0 }
  0x10   : > { %s85_s28 = sor.u32 %s83_s24, %s57_s27  ;;  %p99_p11 = scmp.eq.s32.totalorder %s2287_s19, 3 }
  0x11   : > { %p86_p10 = scmp.eq.s32.totalorder %s85_s28, 0  ;;  %p2311_p13 = scmp.lt.s32.totalorder %s2510_s18, 4 }
  0x12   : > { %s2609_s29 = scalar_select %p58_p9, %s2490_s13, %s60_s22  }
  0x13   : > { %s2612_s30 = scalar_select %p86_p10, %s2478_s10, %s88_s26  }
  0x14   : > { %p2614_p12 = por %p99_p11, %p98_p8  ;;  %s133_s4 = sand.u32 1, %s2490_s13  }
  0x15   : > { %s2300_s5 = smul.u32 2944, %s133_s4  ;;  %s2299_s6 = sshll.u32 %s2506_s17, 11 }
  0x16   : > { %s4601_s3 = scalar_select %p2614_p12, 1, 0 }
  0x17   : > { %p2623_p0 = pnand %p2311_p13, %p2591_p6  ;;  %s2630_s19 = scalar_lea.hbm %s4597_s1, %s2299_s6 }
  0x18   : > { %s137_s22 = scalar_lea.vmem [#allocation2], %s2300_s5  ;;  %s2634_s23 = scalar_lea.sflag [#allocation3], %s133_s4 }
  0x19   : > { %s144_s24 = sshll.u32 %s137_s22, 4  ;;  %s2398_s26 = scalar_lea.hbm %s2630_s19, 47104  ;;  %s2632_s24 = int_to_ptr.vmem [resolvable:$true] %s144_s24 }
  0x1a   : > { %p2399_p1 = scmp.ne.s32.totalorder %s2630_s19, %s2398_s26  ;;  %p2400_p2 = pneg %p2623_p0 }
  0x1b   : > { %s2403_s6 = scalar_lea.hbm %s4597_s1, 94208  ;;  %p2404_p5 = scmp.lt.u32.totalorder %s2630_s19, %s4597_s1 }
  0x1c   : > { %p2401_p3 = pnand %p2400_p2, %p2399_p1  ;;  %p2405_p6 = scmp.lt.u32.totalorder %s2403_s6, %s2398_s26 }
  0x1d   : > { %p2407_p9 = scmp.lt.u32.totalorder %s2398_s26, %s2630_s19 }
  0x1e   : > { %p2402_p4 = pneg %p2401_p3  ;;  %p2406_p8 = por %p2405_p6, %p2404_p5 }
  0x20   : > { %p2408_p10 = por %p2407_p9, %p2406_p8 }
  0x22   : > { %p2409_p11 = pnand %p2408_p10, %p2402_p4 }
  0x24   : > { %2412 = shalt.err (!%p2409_p11)
}
  0x25   : > { %s2413_s4 = scalar_lea.vmem %s2632_s24, 47104  ;;  %s2512_s5 = smov [#allocation2]  }
  0x26   : > { %p2414_p13 = scmp.ne.s32.totalorder %s2632_s24, %s2413_s4  ;;  %s2418_s22 = sshll.u32 %s2512_s5, 4  ;;  %s2419_s22 = int_to_ptr.vmem [resolvable:$false] %s2418_s22 }
  0x27   : > { %s2420_s27 = scalar_lea.vmem %s2419_s22, 94208  ;;  %p2421_p12 = scmp.lt.s32.totalorder %s2632_s24, %s2419_s22 }
  0x28   : > { %p2416_p1 = pnand %p2414_p13, %p2400_p2  ;;  %p2422_p5 = scmp.lt.s32.totalorder %s2420_s27, %s2413_s4 }
  0x2a   : > { %p2417_p3 = pneg %p2416_p1  ;;  %p2423_p6 = por %p2422_p5, %p2421_p12 }
  0x2c   : > { %p2424_p8 = pnand %p2423_p6, %p2417_p3 }
  0x2e   : > { %2427 = shalt.err (!%p2424_p8)
}
  0x2f   : > { %s2513_s26 = smov 4096   ;;  %s2514_s28 = smov 2048  }
  0x30   : > { %s2515_s6 = smov 128   ;;  %p2293_p2 = scmp.ge.s32.totalorder %s2510_s18, 1 }
  0x31   : > { %2310 = dma.hbm_to_vmem [thread:$0]  (!%p2623_p0), %s2630_s19, 47104, %s2632_s24, %s2634_s23, %s2513_s26, %s2514_s28, %s2515_s6  }
  0x32   : > { %p152_p4 = scmp.lt.s32.totalorder %s2510_s18, 5 }
  0x34   : > { %p153_p9 = pnand %p2293_p2, %p152_p4 }
  0x35   : > { %s158_s8 = sand.u32 (!%p153_p9), 1, %s2486_s12  }
  0x36   : > { %156 = sbr.rel (%p153_p9) target bundleno = 569 (0x239), region = 28  ;;  %s159_s4 = scalar_lea.sflag (!%p153_p9), [#allocation3], %s158_s8 }
  0x37   : > { %s2301_s11 = smul.u32 (!%p153_p9), 2944, %s158_s8 }
  0x39   : > { %s2665_s5 = scalar_lea.vmem (!%p153_p9), [#allocation2], %s2301_s11 }
  0x3d   : > { %2469 = dma.done.wait (%p2599_p7), %s159_s4, 47104  }
  0x3e   : > { %2471 = vsyncadd (%p2599_p7), %s159_s4, 4294920192  ;;  %p187_p12 = scmp.lt.s32.totalorder %s2494_s14, 1  ;;  %v2516_v0 = vmov 0   ;;  %s184_s25 = sand.u32 1, %s2474_s9   ;;  %v249_v24 = vld [vmem:[%s2665_s5 + $0x100] sm:$0xff]  ;;  %v250_v25 = vld [vmem:[%s2665_s5 + $0x108] sm:$0xff] }
  0x3f   : > { %2397 = vset.pattern.permute.xlu1 %v2516_v0  ;;  %2396 = vset.pattern.permute.xlu0 %v2516_v0  ;;  %v251_v26 = vld [vmem:[%s2665_s5 + $0x110] sm:$0xff]  ;;  %v252_v27 = vld [vmem:[%s2665_s5 + $0x118] sm:$0xff]  ;;  %v253_v28 = vld [vmem:[%s2665_s5 + $0x120] sm:$0xff]  ;;  %s2710_s27 = smul.u32 2944, %s184_s25  ;;  %p4603_p7 = scmp.ne.s32.totalorder %s4601_s3, 0 }
  0x40   : > { %s188_s7 = scalar_select %p187_p12, %s2494_s14, 1  ;;  %v254_v29 = vld [vmem:[%s2665_s5 + $0x128] sm:$0xff]  ;;  %v255_v30 = vld [vmem:[%s2665_s5 + $0x130] sm:$0xff]  ;;  %v256_v31 = vld [vmem:[%s2665_s5 + $0x138] sm:$0xff] }
  0x41   : > { %v257_v32 = vld [vmem:[%s2665_s5 + $0x140] sm:$0xff]  ;;  %v258_v33 = vld [vmem:[%s2665_s5 + $0x148] sm:$0xff]  ;;  %v259_v34 = vld [vmem:[%s2665_s5 + $0x150] sm:$0xff]  ;;  %s2735_s9 = scalar_lea.vmem [#allocation4], %s2710_s27  ;;  %s2295_s26 = sshll.u32 (%p4603_p7), %s2498_s15, 4 }
  0x42   : > { %s2303_s19 = smul.u32 184, %s188_s7  ;;  %v260_v35 = vld [vmem:[%s2665_s5 + $0x158] sm:$0xff]  ;;  %v261_v36 = vld [vmem:[%s2665_s5 + $0x160] sm:$0xff]  ;;  %v262_v37 = vld [vmem:[%s2665_s5 + $0x168] sm:$0xff] }
  0x43   : > { %v263_v38 = vld [vmem:[%s2665_s5 + $0x170] sm:$0xff]  ;;  %v264_v39 = vld [vmem:[%s2665_s5 + $0x178] sm:$0xff]  ;;  %v217_v41 = vld [vmem:[%s2665_s5] sm:$0xff]  ;;  %s2304_s28 = smul.u32 (%p4603_p7), 736, %s2494_s14 }
  0x44   : > { %s2676_s22 = scalar_lea.vmem %s4596_s0, %s2303_s19  ;;  %v218_v42 = vld [vmem:[%s2665_s5 + $0x8] sm:$0xff]  ;;  %v219_v43 = vld [vmem:[%s2665_s5 + $0x10] sm:$0xff]  ;;  %v220_v44 = vld [vmem:[%s2665_s5 + $0x18] sm:$0xff] }
  0x45   : > { %v196_v1 = vld [vmem:[%s2676_s22 + $0x10] sm:$0xff]  ;;  %v194_v2 = vld [vmem:[%s2676_s22] sm:$0xff]  ;;  %v197_v3 = vld [vmem:[%s2676_s22 + $0x18] sm:$0xff]  ;;  %s1445_s3 = sadd.s32 (%p4603_p7), %s2304_s28, %s2295_s26 }
  0x46   : > { %597 = vperm.xlu1 %2397, %v196_v1   ;;  %587 = vperm.xlu0 %2396, %v194_v2   ;;  %v195_v4 = vld [vmem:[%s2676_s22 + $0x8] sm:$0xff]  ;;  %v198_v6 = vld [vmem:[%s2676_s22 + $0x20] sm:$0xff]  ;;  %v201_v7 = vld [vmem:[%s2676_s22 + $0x38] sm:$0xff]  ;;  %s2296_s6 = sshll.u32 (%p4603_p7), %s1445_s3, 3 }
  0x47   : > { %v199_v5 = vld [vmem:[%s2676_s22 + $0x28] sm:$0xff]  ;;  %v200_v8 = vld [vmem:[%s2676_s22 + $0x30] sm:$0xff]  ;;  %v202_v10 = vld [vmem:[%s2676_s22 + $0x40] sm:$0xff]  ;;  %s3840_s14 = scalar_lea.vmem (%p4603_p7), %s4598_s2, %s2296_s6 }
  0x48   : > { %v203_v9 = vld [vmem:[%s2676_s22 + $0x48] sm:$0xff]  ;;  %v205_v11 = vld [vmem:[%s2676_s22 + $0x58] sm:$0xff]  ;;  %v204_v12 = vld [vmem:[%s2676_s22 + $0x50] sm:$0xff] }
  0x49   : > { %v207_v13 = vld [vmem:[%s2676_s22 + $0x68] sm:$0xff]  ;;  %v206_v14 = vld [vmem:[%s2676_s22 + $0x60] sm:$0xff]  ;;  %v209_v15 = vld [vmem:[%s2676_s22 + $0x78] sm:$0xff] }
  0x4a   : > { %602 = vperm.xlu1 %2397, %v197_v3   ;;  %592 = vperm.xlu0 %2396, %v195_v4   ;;  %v208_v16 = vld [vmem:[%s2676_s22 + $0x70] sm:$0xff]  ;;  %v211_v17 = vld [vmem:[%s2676_s22 + $0x88] sm:$0xff]  ;;  %v210_v18 = vld [vmem:[%s2676_s22 + $0x80] sm:$0xff] }
  0x4b   : > { %v213_v19 = vld [vmem:[%s2676_s22 + $0x98] sm:$0xff]  ;;  %v212_v20 = vld [vmem:[%s2676_s22 + $0x90] sm:$0xff]  ;;  %v215_v21 = vld [vmem:[%s2676_s22 + $0xa8] sm:$0xff] }
  0x4c   : > { %v214_v22 = vld [vmem:[%s2676_s22 + $0xa0] sm:$0xff]  ;;  %v216_v23 = vld [vmem:[%s2676_s22 + $0xb0] sm:$0xf]  ;;  %v222_v50 = vld [vmem:[%s2665_s5 + $0x28] sm:$0xff] }
  0x4d   : > { %v221_v49 = vld [vmem:[%s2665_s5 + $0x20] sm:$0xff]  ;;  %v223_v51 = vld [vmem:[%s2665_s5 + $0x30] sm:$0xff]  ;;  %v224_v52 = vld [vmem:[%s2665_s5 + $0x38] sm:$0xff] }
  0x4e   : > { %612 = vperm.xlu1 %2397, %v199_v5   ;;  %607 = vperm.xlu0 %2396, %v198_v6   ;;  %v225_v57 = vld [vmem:[%s2665_s5 + $0x40] sm:$0xff]  ;;  %v226_v58 = vld [vmem:[%s2665_s5 + $0x48] sm:$0xff]  ;;  %v227_v59 = vld [vmem:[%s2665_s5 + $0x50] sm:$0xff] }
  0x4f   : > { %v228_v60 = vld [vmem:[%s2665_s5 + $0x58] sm:$0xff]  ;;  %v229_v2 = vld [vmem:[%s2665_s5 + $0x60] sm:$0xff]  ;;  %v230_v3 = vld [vmem:[%s2665_s5 + $0x68] sm:$0xff] }
  0x50   : > { %v231_v4 = vld [vmem:[%s2665_s5 + $0x70] sm:$0xff]  ;;  %v232_v5 = vld [vmem:[%s2665_s5 + $0x78] sm:$0xff] }
  0x52   : > { %622 = vperm.xlu1 %2397, %v201_v7   ;;  %617 = vperm.xlu0 %2396, %v200_v8  }
  0x56   : > { %632 = vperm.xlu1 %2397, %v203_v9   ;;  %627 = vperm.xlu0 %2396, %v202_v10   ;;  %v265_v10 = vld [vmem:[%s2665_s5 + $0x180] sm:$0xff] }
  0x5a   : > { %642 = vperm.xlu1 %2397, %v205_v11   ;;  %637 = vperm.xlu0 %2396, %v204_v12   ;;  %v266_v11 = vld [vmem:[%s2665_s5 + $0x188] sm:$0xff]  ;;  %v267_v12 = vld [vmem:[%s2665_s5 + $0x190] sm:$0xff] }
  0x5e   : > { %652 = vperm.xlu1 %2397, %v207_v13   ;;  %647 = vperm.xlu0 %2396, %v206_v14   ;;  %v268_v13 = vld [vmem:[%s2665_s5 + $0x198] sm:$0xff] }
  0x62   : > { %662 = vperm.xlu1 %2397, %v209_v15   ;;  %657 = vperm.xlu0 %2396, %v208_v16  }
  0x66   : > { %672 = vperm.xlu1 %2397, %v211_v17   ;;  %667 = vperm.xlu0 %2396, %v210_v18   ;;  %v269_v18 = vld [vmem:[%s2665_s5 + $0x1a0] sm:$0xff] }
  0x6a   : > { %682 = vperm.xlu1 %2397, %v213_v19   ;;  %677 = vperm.xlu0 %2396, %v212_v20   ;;  %v270_v19 = vld [vmem:[%s2665_s5 + $0x1a8] sm:$0xff]  ;;  %v271_v20 = vld [vmem:[%s2665_s5 + $0x1b0] sm:$0xff] }
  0x6e   : > { %692 = vperm.xlu1 %2397, %v215_v21   ;;  %687 = vperm.xlu0 %2396, %v214_v22   ;;  %v272_v21 = vld [vmem:[%s2665_s5 + $0x1b8] sm:$0xff] }
  0x72   : > { %697 = vperm.xlu0 %2396, %v216_v23  }
  0xc5   : > { %v598_v40 = vpop.permute.xlu1 %597  ;;  %v2732_v61 = vpop.permute.xlu0 %587 }
  0xc6   : > { %v732_v45 = vadd.f32 %v598_v40, %v249_v24  ;;  %v733_v46 = vadd.f32 %v598_v40, %v250_v25  ;;  %v734_v47 = vadd.f32 %v598_v40, %v251_v26  ;;  %v735_v48 = vadd.f32 %v598_v40, %v252_v27  ;;  %v273_v26 = vld [vmem:[%s2665_s5 + $0x1c0] sm:$0xff]  ;;  %v274_v27 = vld [vmem:[%s2665_s5 + $0x1c8] sm:$0xff] }
  0xc7   : > { %v736_v53 = vadd.f32 %v598_v40, %v253_v28  ;;  %v737_v54 = vadd.f32 %v598_v40, %v254_v29  ;;  %v738_v55 = vadd.f32 %v598_v40, %v255_v30  ;;  %v739_v56 = vadd.f32 %v598_v40, %v256_v31  ;;  %v275_v28 = vld [vmem:[%s2665_s5 + $0x1d0] sm:$0xff]  ;;  %v276_v29 = vld [vmem:[%s2665_s5 + $0x1d8] sm:$0xff] }
  0xc8   : > { %v740_v62 = vadd.f32 %v598_v40, %v257_v32  ;;  %v741_v63 = vadd.f32 %v598_v40, %v258_v33  ;;  %v742_v0 = vadd.f32 %v598_v40, %v259_v34  ;;  %v743_v1 = vadd.f32 %v598_v40, %v260_v35  ;;  %1100 = vst [vmem:[%s2735_s9 + $0x100] sm:$0xff] %v732_v45  ;;  %v277_v35 = vld [vmem:[%s2665_s5 + $0x1e0] sm:$0xff]  ;;  %v235_v45 = vld [vmem:[%s2665_s5 + $0x90] sm:$0xff] }
  0xc9   : > { %1101 = vst [vmem:[%s2735_s9 + $0x108] sm:$0xff] %v733_v46  ;;  %1102 = vst [vmem:[%s2735_s9 + $0x110] sm:$0xff] %v734_v47  ;;  %v744_v6 = vadd.f32 %v598_v40, %v261_v36  ;;  %v745_v7 = vadd.f32 %v598_v40, %v262_v37  ;;  %v746_v8 = vadd.f32 %v598_v40, %v263_v38  ;;  %v2777_v30 = vpop.permute.xlu1 %602  ;;  %v278_v36 = vld [vmem:[%s2665_s5 + $0x1e8] sm:$0xff]  ;;  %v279_v37 = vld [vmem:[%s2665_s5 + $0x1f0] sm:$0xff] }
  0xca   : > { %1103 = vst [vmem:[%s2735_s9 + $0x118] sm:$0xff] %v735_v48  ;;  %v747_v9 = vadd.f32 %v598_v40, %v264_v39  ;;  %1104 = vst [vmem:[%s2735_s9 + $0x120] sm:$0xff] %v736_v53  ;;  %v700_v14 = vadd.f32 %v2732_v61, %v217_v41  ;;  %v701_v15 = vadd.f32 %v2732_v61, %v218_v42  ;;  %v280_v38 = vld [vmem:[%s2665_s5 + $0x1f8] sm:$0xff]  ;;  %v239_v53 = vld [vmem:[%s2665_s5 + $0xb0] sm:$0xff] }
  0xcb   : > { %1105 = vst [vmem:[%s2735_s9 + $0x128] sm:$0xff] %v737_v54  ;;  %1106 = vst [vmem:[%s2735_s9 + $0x130] sm:$0xff] %v738_v55  ;;  %v702_v16 = vadd.f32 %v2732_v61, %v219_v43  ;;  %v703_v17 = vadd.f32 %v2732_v61, %v220_v44  ;;  %v704_v22 = vadd.f32 %v2732_v61, %v221_v49  ;;  %v233_v43 = vld [vmem:[%s2665_s5 + $0x80] sm:$0xff]  ;;  %v234_v44 = vld [vmem:[%s2665_s5 + $0x88] sm:$0xff] }
  0xcc   : > { %1107 = vst [vmem:[%s2735_s9 + $0x138] sm:$0xff] %v739_v56  ;;  %1108 = vst [vmem:[%s2735_s9 + $0x140] sm:$0xff] %v740_v62  ;;  %v705_v23 = vadd.f32 %v2732_v61, %v222_v50  ;;  %v706_v24 = vadd.f32 %v2732_v61, %v223_v51  ;;  %v707_v25 = vadd.f32 %v2732_v61, %v224_v52  ;;  %v236_v46 = vld [vmem:[%s2665_s5 + $0x98] sm:$0xff]  ;;  %v237_v51 = vld [vmem:[%s2665_s5 + $0xa0] sm:$0xff] }
  0xcd   : > { %1109 = vst [vmem:[%s2735_s9 + $0x148] sm:$0xff] %v741_v63  ;;  %1110 = vst [vmem:[%s2735_s9 + $0x150] sm:$0xff] %v742_v0  ;;  %v708_v31 = vadd.f32 %v2732_v61, %v225_v57  ;;  %v709_v32 = vadd.f32 %v2732_v61, %v226_v58  ;;  %v710_v33 = vadd.f32 %v2732_v61, %v227_v59  ;;  %v238_v52 = vld [vmem:[%s2665_s5 + $0xa8] sm:$0xff]  ;;  %v240_v54 = vld [vmem:[%s2665_s5 + $0xb8] sm:$0xff]  ;;  %v2827_v63 = vpop.permute.xlu0 %592 }
  0xce   : > { %1111 = vst [vmem:[%s2735_s9 + $0x158] sm:$0xff] %v743_v1  ;;  %1112 = vst [vmem:[%s2735_s9 + $0x160] sm:$0xff] %v744_v6  ;;  %v711_v34 = vadd.f32 %v2732_v61, %v228_v60  ;;  %v712_v39 = vadd.f32 %v2732_v61, %v229_v2  ;;  %v713_v40 = vadd.f32 %v2732_v61, %v230_v3  ;;  %v241_v59 = vld [vmem:[%s2665_s5 + $0xc0] sm:$0xff]  ;;  %v242_v60 = vld [vmem:[%s2665_s5 + $0xc8] sm:$0xff] }
  0xcf   : > { %1113 = vst [vmem:[%s2735_s9 + $0x168] sm:$0xff] %v745_v7  ;;  %1114 = vst [vmem:[%s2735_s9 + $0x170] sm:$0xff] %v746_v8  ;;  %v714_v41 = vadd.f32 %v2732_v61, %v231_v4  ;;  %v715_v42 = vadd.f32 %v2732_v61, %v232_v5  ;;  %v748_v47 = vadd.f32 %v2777_v30, %v265_v10  ;;  %v243_v61 = vld [vmem:[%s2665_s5 + $0xd0] sm:$0xff]  ;;  %v244_v62 = vld [vmem:[%s2665_s5 + $0xd8] sm:$0xff] }
  0xd0   : > { %1115 = vst [vmem:[%s2735_s9 + $0x178] sm:$0xff] %v747_v9  ;;  %1068 = vst [vmem:[%s2735_s9] sm:$0xff] %v700_v14  ;;  %v749_v48 = vadd.f32 %v2777_v30, %v266_v11  ;;  %v750_v49 = vadd.f32 %v2777_v30, %v267_v12  ;;  %v751_v50 = vadd.f32 %v2777_v30, %v268_v13  ;;  %v245_v4 = vld [vmem:[%s2665_s5 + $0xe0] sm:$0xff]  ;;  %v246_v5 = vld [vmem:[%s2665_s5 + $0xe8] sm:$0xff] }
  0xd1   : > { %1069 = vst [vmem:[%s2735_s9 + $0x8] sm:$0xff] %v701_v15  ;;  %1070 = vst [vmem:[%s2735_s9 + $0x10] sm:$0xff] %v702_v16  ;;  %v752_v55 = vadd.f32 %v2777_v30, %v269_v18  ;;  %v753_v56 = vadd.f32 %v2777_v30, %v270_v19  ;;  %v754_v57 = vadd.f32 %v2777_v30, %v271_v20  ;;  %v247_v6 = vld [vmem:[%s2665_s5 + $0xf0] sm:$0xff]  ;;  %v248_v7 = vld [vmem:[%s2665_s5 + $0xf8] sm:$0xff] }
  0xd2   : > { %1071 = vst [vmem:[%s2735_s9 + $0x18] sm:$0xff] %v703_v17  ;;  %1072 = vst [vmem:[%s2735_s9 + $0x20] sm:$0xff] %v704_v22  ;;  %v755_v58 = vadd.f32 %v2777_v30, %v272_v21  ;;  %v756_v0 = vadd.f32 %v2777_v30, %v273_v26  ;;  %v757_v1 = vadd.f32 %v2777_v30, %v274_v27  ;;  %v297_v12 = vld [vmem:[%s2665_s5 + $0x280] sm:$0xff]  ;;  %v298_v13 = vld [vmem:[%s2665_s5 + $0x288] sm:$0xff] }
  0xd3   : > { %1073 = vst [vmem:[%s2735_s9 + $0x28] sm:$0xff] %v705_v23  ;;  %1074 = vst [vmem:[%s2735_s9 + $0x30] sm:$0xff] %v706_v24  ;;  %v758_v2 = vadd.f32 %v2777_v30, %v275_v28  ;;  %v759_v3 = vadd.f32 %v2777_v30, %v276_v29  ;;  %v760_v8 = vadd.f32 %v2777_v30, %v277_v35  ;;  %v299_v14 = vld [vmem:[%s2665_s5 + $0x290] sm:$0xff]  ;;  %v300_v15 = vld [vmem:[%s2665_s5 + $0x298] sm:$0xff] }
  0xd4   : > { %1075 = vst [vmem:[%s2735_s9 + $0x38] sm:$0xff] %v707_v25  ;;  %1076 = vst [vmem:[%s2735_s9 + $0x40] sm:$0xff] %v708_v31  ;;  %v761_v9 = vadd.f32 %v2777_v30, %v278_v36  ;;  %v762_v10 = vadd.f32 %v2777_v30, %v279_v37  ;;  %v763_v11 = vadd.f32 %v2777_v30, %v280_v38  ;;  %v301_v20 = vld [vmem:[%s2665_s5 + $0x2a0] sm:$0xff]  ;;  %v302_v21 = vld [vmem:[%s2665_s5 + $0x2a8] sm:$0xff] }
  0xd5   : > { %1077 = vst [vmem:[%s2735_s9 + $0x48] sm:$0xff] %v709_v32  ;;  %1078 = vst [vmem:[%s2735_s9 + $0x50] sm:$0xff] %v710_v33  ;;  %v716_v16 = vadd.f32 %v2827_v63, %v233_v43  ;;  %v717_v17 = vadd.f32 %v2827_v63, %v234_v44  ;;  %v718_v18 = vadd.f32 %v2827_v63, %v235_v45  ;;  %v303_v22 = vld [vmem:[%s2665_s5 + $0x2b0] sm:$0xff]  ;;  %v304_v23 = vld [vmem:[%s2665_s5 + $0x2b8] sm:$0xff]  ;;  %v2877_v32 = vpop.permute.xlu1 %612 }
  0xd6   : > { %1079 = vst [vmem:[%s2735_s9 + $0x58] sm:$0xff] %v711_v34  ;;  %1080 = vst [vmem:[%s2735_s9 + $0x60] sm:$0xff] %v712_v39  ;;  %v719_v19 = vadd.f32 %v2827_v63, %v236_v46  ;;  %v720_v24 = vadd.f32 %v2827_v63, %v237_v51  ;;  %v721_v25 = vadd.f32 %v2827_v63, %v238_v52  ;;  %v305_v28 = vld [vmem:[%s2665_s5 + $0x2c0] sm:$0xff]  ;;  %v306_v29 = vld [vmem:[%s2665_s5 + $0x2c8] sm:$0xff] }
  0xd7   : > { %1081 = vst [vmem:[%s2735_s9 + $0x68] sm:$0xff] %v713_v40  ;;  %1082 = vst [vmem:[%s2735_s9 + $0x70] sm:$0xff] %v714_v41  ;;  %v722_v26 = vadd.f32 %v2827_v63, %v239_v53  ;;  %v723_v27 = vadd.f32 %v2827_v63, %v240_v54  ;;  %v307_v30 = vld [vmem:[%s2665_s5 + $0x2d0] sm:$0xff]  ;;  %v308_v31 = vld [vmem:[%s2665_s5 + $0x2d8] sm:$0xff]  ;;  %v724_v33 = vadd.f32 %v2827_v63, %v241_v59 }
  0xd8   : > { %1083 = vst [vmem:[%s2735_s9 + $0x78] sm:$0xff] %v715_v42  ;;  %1116 = vst [vmem:[%s2735_s9 + $0x180] sm:$0xff] %v748_v47  ;;  %v725_v34 = vadd.f32 %v2827_v63, %v242_v60  ;;  %v726_v35 = vadd.f32 %v2827_v63, %v243_v61  ;;  %v727_v36 = vadd.f32 %v2827_v63, %v244_v62  ;;  %v309_v37 = vld [vmem:[%s2665_s5 + $0x2e0] sm:$0xff]  ;;  %v310_v38 = vld [vmem:[%s2665_s5 + $0x2e8] sm:$0xff] }
  0xd9   : > { %1117 = vst [vmem:[%s2735_s9 + $0x188] sm:$0xff] %v749_v48  ;;  %1118 = vst [vmem:[%s2735_s9 + $0x190] sm:$0xff] %v750_v49  ;;  %v311_v39 = vld [vmem:[%s2665_s5 + $0x2f0] sm:$0xff]  ;;  %v312_v40 = vld [vmem:[%s2665_s5 + $0x2f8] sm:$0xff]  ;;  %v728_v41 = vadd.f32 %v2827_v63, %v245_v4  ;;  %v729_v42 = vadd.f32 %v2827_v63, %v246_v5  ;;  %v730_v43 = vadd.f32 %v2827_v63, %v247_v6 }
  0xda   : > { %1119 = vst [vmem:[%s2735_s9 + $0x198] sm:$0xff] %v751_v50  ;;  %1120 = vst [vmem:[%s2735_s9 + $0x1a0] sm:$0xff] %v752_v55  ;;  %v731_v44 = vadd.f32 %v2827_v63, %v248_v7  ;;  %v281_v45 = vld [vmem:[%s2665_s5 + $0x200] sm:$0xff]  ;;  %v282_v46 = vld [vmem:[%s2665_s5 + $0x208] sm:$0xff]  ;;  %v780_v49 = vadd.f32 %v2877_v32, %v297_v12  ;;  %v781_v50 = vadd.f32 %v2877_v32, %v298_v13 }
  0xdb   : > { %1121 = vst [vmem:[%s2735_s9 + $0x1a8] sm:$0xff] %v753_v56  ;;  %1122 = vst [vmem:[%s2735_s9 + $0x1b0] sm:$0xff] %v754_v57  ;;  %v283_v47 = vld [vmem:[%s2665_s5 + $0x210] sm:$0xff]  ;;  %v284_v48 = vld [vmem:[%s2665_s5 + $0x218] sm:$0xff]  ;;  %v782_v51 = vadd.f32 %v2877_v32, %v299_v14  ;;  %v783_v52 = vadd.f32 %v2877_v32, %v300_v15  ;;  %v784_v57 = vadd.f32 %v2877_v32, %v301_v20 }
  0xdc   : > { %1123 = vst [vmem:[%s2735_s9 + $0x1b8] sm:$0xff] %v755_v58  ;;  %1124 = vst [vmem:[%s2735_s9 + $0x1c0] sm:$0xff] %v756_v0  ;;  %v285_v53 = vld [vmem:[%s2665_s5 + $0x220] sm:$0xff]  ;;  %v286_v54 = vld [vmem:[%s2665_s5 + $0x228] sm:$0xff]  ;;  %v785_v58 = vadd.f32 %v2877_v32, %v302_v21  ;;  %v786_v59 = vadd.f32 %v2877_v32, %v303_v22  ;;  %v787_v60 = vadd.f32 %v2877_v32, %v304_v23 }
  0xdd   : > { %1125 = vst [vmem:[%s2735_s9 + $0x1c8] sm:$0xff] %v757_v1  ;;  %1126 = vst [vmem:[%s2735_s9 + $0x1d0] sm:$0xff] %v758_v2  ;;  %v287_v55 = vld [vmem:[%s2665_s5 + $0x230] sm:$0xff]  ;;  %v288_v56 = vld [vmem:[%s2665_s5 + $0x238] sm:$0xff]  ;;  %v2927_v1 = vpop.permute.xlu0 %607  ;;  %v788_v2 = vadd.f32 %v2877_v32, %v305_v28  ;;  %v790_v4 = vadd.f32 %v2877_v32, %v307_v30  ;;  %v791_v5 = vadd.f32 %v2877_v32, %v308_v31 }
  0xde   : > { %1127 = vst [vmem:[%s2735_s9 + $0x1d8] sm:$0xff] %v759_v3  ;;  %1128 = vst [vmem:[%s2735_s9 + $0x1e0] sm:$0xff] %v760_v8  ;;  %v289_v61 = vld [vmem:[%s2665_s5 + $0x240] sm:$0xff]  ;;  %v290_v62 = vld [vmem:[%s2665_s5 + $0x248] sm:$0xff]  ;;  %v789_v3 = vadd.f32 %v2877_v32, %v306_v29  ;;  %v794_v12 = vadd.f32 %v2877_v32, %v311_v39  ;;  %v795_v13 = vadd.f32 %v2877_v32, %v312_v40 }
  0xdf   : > { %1129 = vst [vmem:[%s2735_s9 + $0x1e8] sm:$0xff] %v761_v9  ;;  %1130 = vst [vmem:[%s2735_s9 + $0x1f0] sm:$0xff] %v762_v10  ;;  %v291_v63 = vld [vmem:[%s2665_s5 + $0x250] sm:$0xff]  ;;  %v292_v0 = vld [vmem:[%s2665_s5 + $0x258] sm:$0xff]  ;;  %v792_v10 = vadd.f32 %v2877_v32, %v309_v37  ;;  %v766_v20 = vadd.f32 %v2927_v1, %v283_v47  ;;  %v767_v21 = vadd.f32 %v2927_v1, %v284_v48 }
  0xe0   : > { %1131 = vst [vmem:[%s2735_s9 + $0x1f8] sm:$0xff] %v763_v11  ;;  %1084 = vst [vmem:[%s2735_s9 + $0x80] sm:$0xff] %v716_v16  ;;  %v293_v6 = vld [vmem:[%s2665_s5 + $0x260] sm:$0xff]  ;;  %v294_v7 = vld [vmem:[%s2665_s5 + $0x268] sm:$0xff]  ;;  %v793_v11 = vadd.f32 %v2877_v32, %v310_v38  ;;  %v770_v28 = vadd.f32 %v2927_v1, %v287_v55  ;;  %v771_v29 = vadd.f32 %v2927_v1, %v288_v56 }
  0xe1   : > { %1085 = vst [vmem:[%s2735_s9 + $0x88] sm:$0xff] %v717_v17  ;;  %1086 = vst [vmem:[%s2735_s9 + $0x90] sm:$0xff] %v718_v18  ;;  %v295_v8 = vld [vmem:[%s2665_s5 + $0x270] sm:$0xff]  ;;  %v296_v9 = vld [vmem:[%s2665_s5 + $0x278] sm:$0xff]  ;;  %v764_v18 = vadd.f32 %v2927_v1, %v281_v45  ;;  %v774_v37 = vadd.f32 %v2927_v1, %v291_v63  ;;  %v775_v38 = vadd.f32 %v2927_v1, %v292_v0 }
  0xe2   : > { %1087 = vst [vmem:[%s2735_s9 + $0x98] sm:$0xff] %v719_v19  ;;  %1088 = vst [vmem:[%s2735_s9 + $0xa0] sm:$0xff] %v720_v24  ;;  %v329_v14 = vld [vmem:[%s2665_s5 + $0x380] sm:$0xff]  ;;  %v330_v15 = vld [vmem:[%s2665_s5 + $0x388] sm:$0xff]  ;;  %v765_v19 = vadd.f32 %v2927_v1, %v282_v46  ;;  %v778_v45 = vadd.f32 %v2927_v1, %v295_v8  ;;  %v779_v46 = vadd.f32 %v2927_v1, %v296_v9 }
  0xe3   : > { %1089 = vst [vmem:[%s2735_s9 + $0xa8] sm:$0xff] %v721_v25  ;;  %1090 = vst [vmem:[%s2735_s9 + $0xb0] sm:$0xff] %v722_v26  ;;  %v331_v16 = vld [vmem:[%s2665_s5 + $0x390] sm:$0xff]  ;;  %v332_v17 = vld [vmem:[%s2665_s5 + $0x398] sm:$0xff]  ;;  %v768_v26 = vadd.f32 %v2927_v1, %v285_v53 }
  0xe4   : > { %1091 = vst [vmem:[%s2735_s9 + $0xb8] sm:$0xff] %v723_v27  ;;  %1092 = vst [vmem:[%s2735_s9 + $0xc0] sm:$0xff] %v724_v33  ;;  %v333_v22 = vld [vmem:[%s2665_s5 + $0x3a0] sm:$0xff]  ;;  %v334_v23 = vld [vmem:[%s2665_s5 + $0x3a8] sm:$0xff]  ;;  %v769_v27 = vadd.f32 %v2927_v1, %v286_v54 }
  0xe5   : > { %1093 = vst [vmem:[%s2735_s9 + $0xc8] sm:$0xff] %v725_v34  ;;  %1094 = vst [vmem:[%s2735_s9 + $0xd0] sm:$0xff] %v726_v35  ;;  %v335_v24 = vld [vmem:[%s2665_s5 + $0x3b0] sm:$0xff]  ;;  %v336_v25 = vld [vmem:[%s2665_s5 + $0x3b8] sm:$0xff]  ;;  %v2977_v34 = vpop.permute.xlu1 %622  ;;  %v772_v35 = vadd.f32 %v2927_v1, %v289_v61 }
  0xe6   : > { %1095 = vst [vmem:[%s2735_s9 + $0xd8] sm:$0xff] %v727_v36  ;;  %1096 = vst [vmem:[%s2735_s9 + $0xe0] sm:$0xff] %v728_v41  ;;  %v337_v30 = vld [vmem:[%s2665_s5 + $0x3c0] sm:$0xff]  ;;  %v338_v31 = vld [vmem:[%s2665_s5 + $0x3c8] sm:$0xff]  ;;  %v773_v36 = vadd.f32 %v2927_v1, %v290_v62  ;;  %v814_v53 = vadd.f32 %v2977_v34, %v331_v16  ;;  %v815_v54 = vadd.f32 %v2977_v34, %v332_v17 }
  0xe7   : > { %1097 = vst [vmem:[%s2735_s9 + $0xe8] sm:$0xff] %v729_v42  ;;  %1098 = vst [vmem:[%s2735_s9 + $0xf0] sm:$0xff] %v730_v43  ;;  %v339_v32 = vld [vmem:[%s2665_s5 + $0x3d0] sm:$0xff]  ;;  %v340_v33 = vld [vmem:[%s2665_s5 + $0x3d8] sm:$0xff]  ;;  %v776_v43 = vadd.f32 %v2927_v1, %v293_v6  ;;  %v818_v61 = vadd.f32 %v2977_v34, %v335_v24  ;;  %v819_v62 = vadd.f32 %v2977_v34, %v336_v25 }
  0xe8   : > { %1099 = vst [vmem:[%s2735_s9 + $0xf8] sm:$0xff] %v731_v44  ;;  %1148 = vst [vmem:[%s2735_s9 + $0x280] sm:$0xff] %v780_v49  ;;  %v341_v39 = vld [vmem:[%s2665_s5 + $0x3e0] sm:$0xff]  ;;  %v342_v40 = vld [vmem:[%s2665_s5 + $0x3e8] sm:$0xff]  ;;  %v777_v44 = vadd.f32 %v2927_v1, %v294_v7  ;;  %v822_v6 = vadd.f32 %v2977_v34, %v339_v32  ;;  %v823_v7 = vadd.f32 %v2977_v34, %v340_v33 }
  0xe9   : > { %1149 = vst [vmem:[%s2735_s9 + $0x288] sm:$0xff] %v781_v50  ;;  %1150 = vst [vmem:[%s2735_s9 + $0x290] sm:$0xff] %v782_v51  ;;  %v343_v41 = vld [vmem:[%s2665_s5 + $0x3f0] sm:$0xff]  ;;  %v344_v42 = vld [vmem:[%s2665_s5 + $0x3f8] sm:$0xff]  ;;  %v812_v51 = vadd.f32 %v2977_v34, %v329_v14 }
  0xea   : > { %1151 = vst [vmem:[%s2735_s9 + $0x298] sm:$0xff] %v783_v52  ;;  %1152 = vst [vmem:[%s2735_s9 + $0x2a0] sm:$0xff] %v784_v57  ;;  %v313_v47 = vld [vmem:[%s2665_s5 + $0x300] sm:$0xff]  ;;  %v314_v48 = vld [vmem:[%s2665_s5 + $0x308] sm:$0xff]  ;;  %v813_v52 = vadd.f32 %v2977_v34, %v330_v15  ;;  %v826_v14 = vadd.f32 %v2977_v34, %v343_v41  ;;  %v827_v15 = vadd.f32 %v2977_v34, %v344_v42 }
  0xeb   : > { %1153 = vst [vmem:[%s2735_s9 + $0x2a8] sm:$0xff] %v785_v58  ;;  %1154 = vst [vmem:[%s2735_s9 + $0x2b0] sm:$0xff] %v786_v59  ;;  %v315_v49 = vld [vmem:[%s2665_s5 + $0x310] sm:$0xff]  ;;  %v316_v50 = vld [vmem:[%s2665_s5 + $0x318] sm:$0xff]  ;;  %v816_v59 = vadd.f32 %v2977_v34, %v333_v22 }
  0xec   : > { %1155 = vst [vmem:[%s2735_s9 + $0x2b8] sm:$0xff] %v787_v60  ;;  %1156 = vst [vmem:[%s2735_s9 + $0x2c0] sm:$0xff] %v788_v2  ;;  %v317_v55 = vld [vmem:[%s2665_s5 + $0x320] sm:$0xff]  ;;  %v318_v56 = vld [vmem:[%s2665_s5 + $0x328] sm:$0xff]  ;;  %v817_v60 = vadd.f32 %v2977_v34, %v334_v23 }
  0xed   : > { %1157 = vst [vmem:[%s2735_s9 + $0x2c8] sm:$0xff] %v789_v3  ;;  %1158 = vst [vmem:[%s2735_s9 + $0x2d0] sm:$0xff] %v790_v4  ;;  %v319_v57 = vld [vmem:[%s2665_s5 + $0x330] sm:$0xff]  ;;  %v320_v58 = vld [vmem:[%s2665_s5 + $0x338] sm:$0xff]  ;;  %v3027_v3 = vpop.permute.xlu0 %617  ;;  %v820_v4 = vadd.f32 %v2977_v34, %v337_v30 }
  0xee   : > { %1159 = vst [vmem:[%s2735_s9 + $0x2d8] sm:$0xff] %v791_v5  ;;  %1160 = vst [vmem:[%s2735_s9 + $0x2e0] sm:$0xff] %v792_v10  ;;  %v321_v63 = vld [vmem:[%s2665_s5 + $0x340] sm:$0xff]  ;;  %v322_v0 = vld [vmem:[%s2665_s5 + $0x348] sm:$0xff]  ;;  %v821_v5 = vadd.f32 %v2977_v34, %v338_v31  ;;  %v798_v22 = vadd.f32 %v3027_v3, %v315_v49  ;;  %v799_v23 = vadd.f32 %v3027_v3, %v316_v50 }
  0xef   : > { %1161 = vst [vmem:[%s2735_s9 + $0x2e8] sm:$0xff] %v793_v11  ;;  %1162 = vst [vmem:[%s2735_s9 + $0x2f0] sm:$0xff] %v794_v12  ;;  %v323_v1 = vld [vmem:[%s2665_s5 + $0x350] sm:$0xff]  ;;  %v324_v2 = vld [vmem:[%s2665_s5 + $0x358] sm:$0xff]  ;;  %v824_v12 = vadd.f32 %v2977_v34, %v341_v39  ;;  %v802_v30 = vadd.f32 %v3027_v3, %v319_v57  ;;  %v803_v31 = vadd.f32 %v3027_v3, %v320_v58 }
  0xf0   : > { %1163 = vst [vmem:[%s2735_s9 + $0x2f8] sm:$0xff] %v795_v13  ;;  %1132 = vst [vmem:[%s2735_s9 + $0x200] sm:$0xff] %v764_v18  ;;  %v325_v8 = vld [vmem:[%s2665_s5 + $0x360] sm:$0xff]  ;;  %v326_v9 = vld [vmem:[%s2665_s5 + $0x368] sm:$0xff]  ;;  %v825_v13 = vadd.f32 %v2977_v34, %v342_v40  ;;  %v806_v39 = vadd.f32 %v3027_v3, %v323_v1  ;;  %v807_v40 = vadd.f32 %v3027_v3, %v324_v2 }
  0xf1   : > { %1133 = vst [vmem:[%s2735_s9 + $0x208] sm:$0xff] %v765_v19  ;;  %1134 = vst [vmem:[%s2735_s9 + $0x210] sm:$0xff] %v766_v20  ;;  %v327_v10 = vld [vmem:[%s2665_s5 + $0x370] sm:$0xff]  ;;  %v328_v11 = vld [vmem:[%s2665_s5 + $0x378] sm:$0xff]  ;;  %v796_v20 = vadd.f32 %v3027_v3, %v313_v47 }
  0xf2   : > { %1135 = vst [vmem:[%s2735_s9 + $0x218] sm:$0xff] %v767_v21  ;;  %1136 = vst [vmem:[%s2735_s9 + $0x220] sm:$0xff] %v768_v26  ;;  %v361_v16 = vld [vmem:[%s2665_s5 + $0x480] sm:$0xff]  ;;  %v362_v17 = vld [vmem:[%s2665_s5 + $0x488] sm:$0xff]  ;;  %v797_v21 = vadd.f32 %v3027_v3, %v314_v48  ;;  %v810_v47 = vadd.f32 %v3027_v3, %v327_v10  ;;  %v811_v48 = vadd.f32 %v3027_v3, %v328_v11 }
  0xf3   : > { %1137 = vst [vmem:[%s2735_s9 + $0x228] sm:$0xff] %v769_v27  ;;  %1138 = vst [vmem:[%s2735_s9 + $0x230] sm:$0xff] %v770_v28  ;;  %v363_v18 = vld [vmem:[%s2665_s5 + $0x490] sm:$0xff]  ;;  %v364_v19 = vld [vmem:[%s2665_s5 + $0x498] sm:$0xff]  ;;  %v800_v28 = vadd.f32 %v3027_v3, %v317_v55 }
  0xf4   : > { %1139 = vst [vmem:[%s2735_s9 + $0x238] sm:$0xff] %v771_v29  ;;  %1140 = vst [vmem:[%s2735_s9 + $0x240] sm:$0xff] %v772_v35  ;;  %v365_v24 = vld [vmem:[%s2665_s5 + $0x4a0] sm:$0xff]  ;;  %v366_v25 = vld [vmem:[%s2665_s5 + $0x4a8] sm:$0xff]  ;;  %v801_v29 = vadd.f32 %v3027_v3, %v318_v56 }
  0xf5   : > { %1141 = vst [vmem:[%s2735_s9 + $0x248] sm:$0xff] %v773_v36  ;;  %1142 = vst [vmem:[%s2735_s9 + $0x250] sm:$0xff] %v774_v37  ;;  %v367_v26 = vld [vmem:[%s2665_s5 + $0x4b0] sm:$0xff]  ;;  %v368_v27 = vld [vmem:[%s2665_s5 + $0x4b8] sm:$0xff]  ;;  %v3077_v36 = vpop.permute.xlu1 %632  ;;  %v804_v37 = vadd.f32 %v3027_v3, %v321_v63 }
  0xf6   : > { %1143 = vst [vmem:[%s2735_s9 + $0x258] sm:$0xff] %v775_v38  ;;  %1144 = vst [vmem:[%s2735_s9 + $0x260] sm:$0xff] %v776_v43  ;;  %v369_v32 = vld [vmem:[%s2665_s5 + $0x4c0] sm:$0xff]  ;;  %v370_v33 = vld [vmem:[%s2665_s5 + $0x4c8] sm:$0xff]  ;;  %v805_v38 = vadd.f32 %v3027_v3, %v322_v0  ;;  %v846_v55 = vadd.f32 %v3077_v36, %v363_v18  ;;  %v847_v56 = vadd.f32 %v3077_v36, %v364_v19 }
  0xf7   : > { %1145 = vst [vmem:[%s2735_s9 + $0x268] sm:$0xff] %v777_v44  ;;  %1146 = vst [vmem:[%s2735_s9 + $0x270] sm:$0xff] %v778_v45  ;;  %v371_v34 = vld [vmem:[%s2665_s5 + $0x4d0] sm:$0xff]  ;;  %v372_v35 = vld [vmem:[%s2665_s5 + $0x4d8] sm:$0xff]  ;;  %v808_v45 = vadd.f32 %v3027_v3, %v325_v8  ;;  %v850_v63 = vadd.f32 %v3077_v36, %v367_v26  ;;  %v851_v0 = vadd.f32 %v3077_v36, %v368_v27 }
  0xf8   : > { %1147 = vst [vmem:[%s2735_s9 + $0x278] sm:$0xff] %v779_v46  ;;  %1180 = vst [vmem:[%s2735_s9 + $0x380] sm:$0xff] %v812_v51  ;;  %v373_v41 = vld [vmem:[%s2665_s5 + $0x4e0] sm:$0xff]  ;;  %v374_v42 = vld [vmem:[%s2665_s5 + $0x4e8] sm:$0xff]  ;;  %v809_v46 = vadd.f32 %v3027_v3, %v326_v9  ;;  %v854_v8 = vadd.f32 %v3077_v36, %v371_v34  ;;  %v855_v9 = vadd.f32 %v3077_v36, %v372_v35 }
  0xf9   : > { %1181 = vst [vmem:[%s2735_s9 + $0x388] sm:$0xff] %v813_v52  ;;  %1182 = vst [vmem:[%s2735_s9 + $0x390] sm:$0xff] %v814_v53  ;;  %v375_v43 = vld [vmem:[%s2665_s5 + $0x4f0] sm:$0xff]  ;;  %v376_v44 = vld [vmem:[%s2665_s5 + $0x4f8] sm:$0xff]  ;;  %v844_v53 = vadd.f32 %v3077_v36, %v361_v16 }
  0xfa   : > { %1183 = vst [vmem:[%s2735_s9 + $0x398] sm:$0xff] %v815_v54  ;;  %1184 = vst [vmem:[%s2735_s9 + $0x3a0] sm:$0xff] %v816_v59  ;;  %v345_v49 = vld [vmem:[%s2665_s5 + $0x400] sm:$0xff]  ;;  %v346_v50 = vld [vmem:[%s2665_s5 + $0x408] sm:$0xff]  ;;  %v845_v54 = vadd.f32 %v3077_v36, %v362_v17  ;;  %v858_v16 = vadd.f32 %v3077_v36, %v375_v43  ;;  %v859_v17 = vadd.f32 %v3077_v36, %v376_v44 }
  0xfb   : > { %1185 = vst [vmem:[%s2735_s9 + $0x3a8] sm:$0xff] %v817_v60  ;;  %1186 = vst [vmem:[%s2735_s9 + $0x3b0] sm:$0xff] %v818_v61  ;;  %v347_v51 = vld [vmem:[%s2665_s5 + $0x410] sm:$0xff]  ;;  %v348_v52 = vld [vmem:[%s2665_s5 + $0x418] sm:$0xff]  ;;  %v848_v61 = vadd.f32 %v3077_v36, %v365_v24 }
  0xfc   : > { %1187 = vst [vmem:[%s2735_s9 + $0x3b8] sm:$0xff] %v819_v62  ;;  %1188 = vst [vmem:[%s2735_s9 + $0x3c0] sm:$0xff] %v820_v4  ;;  %v349_v57 = vld [vmem:[%s2665_s5 + $0x420] sm:$0xff]  ;;  %v350_v58 = vld [vmem:[%s2665_s5 + $0x428] sm:$0xff]  ;;  %v849_v62 = vadd.f32 %v3077_v36, %v366_v25 }
  0xfd   : > { %1189 = vst [vmem:[%s2735_s9 + $0x3c8] sm:$0xff] %v821_v5  ;;  %1190 = vst [vmem:[%s2735_s9 + $0x3d0] sm:$0xff] %v822_v6  ;;  %v351_v59 = vld [vmem:[%s2665_s5 + $0x430] sm:$0xff]  ;;  %v352_v60 = vld [vmem:[%s2665_s5 + $0x438] sm:$0xff]  ;;  %v3127_v5 = vpop.permute.xlu0 %627  ;;  %v852_v6 = vadd.f32 %v3077_v36, %v369_v32 }
  0xfe   : > { %1191 = vst [vmem:[%s2735_s9 + $0x3d8] sm:$0xff] %v823_v7  ;;  %1192 = vst [vmem:[%s2735_s9 + $0x3e0] sm:$0xff] %v824_v12  ;;  %v353_v1 = vld [vmem:[%s2665_s5 + $0x440] sm:$0xff]  ;;  %v354_v2 = vld [vmem:[%s2665_s5 + $0x448] sm:$0xff]  ;;  %v853_v7 = vadd.f32 %v3077_v36, %v370_v33  ;;  %v830_v24 = vadd.f32 %v3127_v5, %v347_v51  ;;  %v831_v25 = vadd.f32 %v3127_v5, %v348_v52 }
  0xff   : > { %1193 = vst [vmem:[%s2735_s9 + $0x3e8] sm:$0xff] %v825_v13  ;;  %1194 = vst [vmem:[%s2735_s9 + $0x3f0] sm:$0xff] %v826_v14  ;;  %v355_v3 = vld [vmem:[%s2665_s5 + $0x450] sm:$0xff]  ;;  %v356_v4 = vld [vmem:[%s2665_s5 + $0x458] sm:$0xff]  ;;  %v856_v14 = vadd.f32 %v3077_v36, %v373_v41  ;;  %v834_v32 = vadd.f32 %v3127_v5, %v351_v59  ;;  %v835_v33 = vadd.f32 %v3127_v5, %v352_v60 }
 0x100   : > { %1195 = vst [vmem:[%s2735_s9 + $0x3f8] sm:$0xff] %v827_v15  ;;  %1164 = vst [vmem:[%s2735_s9 + $0x300] sm:$0xff] %v796_v20  ;;  %v357_v10 = vld [vmem:[%s2665_s5 + $0x460] sm:$0xff]  ;;  %v358_v11 = vld [vmem:[%s2665_s5 + $0x468] sm:$0xff]  ;;  %v857_v15 = vadd.f32 %v3077_v36, %v374_v42  ;;  %v838_v41 = vadd.f32 %v3127_v5, %v355_v3  ;;  %v839_v42 = vadd.f32 %v3127_v5, %v356_v4 }
 0x101   : > { %1165 = vst [vmem:[%s2735_s9 + $0x308] sm:$0xff] %v797_v21  ;;  %1166 = vst [vmem:[%s2735_s9 + $0x310] sm:$0xff] %v798_v22  ;;  %v359_v12 = vld [vmem:[%s2665_s5 + $0x470] sm:$0xff]  ;;  %v360_v13 = vld [vmem:[%s2665_s5 + $0x478] sm:$0xff]  ;;  %v828_v22 = vadd.f32 %v3127_v5, %v345_v49 }
 0x102   : > { %1167 = vst [vmem:[%s2735_s9 + $0x318] sm:$0xff] %v799_v23  ;;  %1168 = vst [vmem:[%s2735_s9 + $0x320] sm:$0xff] %v800_v28  ;;  %v393_v18 = vld [vmem:[%s2665_s5 + $0x580] sm:$0xff]  ;;  %v394_v19 = vld [vmem:[%s2665_s5 + $0x588] sm:$0xff]  ;;  %v829_v23 = vadd.f32 %v3127_v5, %v346_v50  ;;  %v842_v49 = vadd.f32 %v3127_v5, %v359_v12  ;;  %v843_v50 = vadd.f32 %v3127_v5, %v360_v13 }
 0x103   : > { %1169 = vst [vmem:[%s2735_s9 + $0x328] sm:$0xff] %v801_v29  ;;  %1170 = vst [vmem:[%s2735_s9 + $0x330] sm:$0xff] %v802_v30  ;;  %v395_v20 = vld [vmem:[%s2665_s5 + $0x590] sm:$0xff]  ;;  %v396_v21 = vld [vmem:[%s2665_s5 + $0x598] sm:$0xff]  ;;  %v832_v30 = vadd.f32 %v3127_v5, %v349_v57 }
 0x104   : > { %1171 = vst [vmem:[%s2735_s9 + $0x338] sm:$0xff] %v803_v31  ;;  %1172 = vst [vmem:[%s2735_s9 + $0x340] sm:$0xff] %v804_v37  ;;  %v397_v26 = vld [vmem:[%s2665_s5 + $0x5a0] sm:$0xff]  ;;  %v398_v27 = vld [vmem:[%s2665_s5 + $0x5a8] sm:$0xff]  ;;  %v833_v31 = vadd.f32 %v3127_v5, %v350_v58 }
 0x105   : > { %1173 = vst [vmem:[%s2735_s9 + $0x348] sm:$0xff] %v805_v38  ;;  %1174 = vst [vmem:[%s2735_s9 + $0x350] sm:$0xff] %v806_v39  ;;  %v399_v28 = vld [vmem:[%s2665_s5 + $0x5b0] sm:$0xff]  ;;  %v400_v29 = vld [vmem:[%s2665_s5 + $0x5b8] sm:$0xff]  ;;  %v3177_v38 = vpop.permute.xlu1 %642  ;;  %v836_v39 = vadd.f32 %v3127_v5, %v353_v1 }
 0x106   : > { %1175 = vst [vmem:[%s2735_s9 + $0x358] sm:$0xff] %v807_v40  ;;  %1176 = vst [vmem:[%s2735_s9 + $0x360] sm:$0xff] %v808_v45  ;;  %v401_v34 = vld [vmem:[%s2665_s5 + $0x5c0] sm:$0xff]  ;;  %v402_v35 = vld [vmem:[%s2665_s5 + $0x5c8] sm:$0xff]  ;;  %v837_v40 = vadd.f32 %v3127_v5, %v354_v2  ;;  %v878_v57 = vadd.f32 %v3177_v38, %v395_v20  ;;  %v879_v58 = vadd.f32 %v3177_v38, %v396_v21 }
 0x107   : > { %1177 = vst [vmem:[%s2735_s9 + $0x368] sm:$0xff] %v809_v46  ;;  %1178 = vst [vmem:[%s2735_s9 + $0x370] sm:$0xff] %v810_v47  ;;  %v403_v36 = vld [vmem:[%s2665_s5 + $0x5d0] sm:$0xff]  ;;  %v404_v37 = vld [vmem:[%s2665_s5 + $0x5d8] sm:$0xff]  ;;  %v840_v47 = vadd.f32 %v3127_v5, %v357_v10  ;;  %v882_v1 = vadd.f32 %v3177_v38, %v399_v28  ;;  %v883_v2 = vadd.f32 %v3177_v38, %v400_v29 }
 0x108   : > { %1179 = vst [vmem:[%s2735_s9 + $0x378] sm:$0xff] %v811_v48  ;;  %1212 = vst [vmem:[%s2735_s9 + $0x480] sm:$0xff] %v844_v53  ;;  %v405_v43 = vld [vmem:[%s2665_s5 + $0x5e0] sm:$0xff]  ;;  %v406_v44 = vld [vmem:[%s2665_s5 + $0x5e8] sm:$0xff]  ;;  %v841_v48 = vadd.f32 %v3127_v5, %v358_v11  ;;  %v886_v10 = vadd.f32 %v3177_v38, %v403_v36  ;;  %v887_v11 = vadd.f32 %v3177_v38, %v404_v37 }
 0x109   : > { %1213 = vst [vmem:[%s2735_s9 + $0x488] sm:$0xff] %v845_v54  ;;  %1214 = vst [vmem:[%s2735_s9 + $0x490] sm:$0xff] %v846_v55  ;;  %v407_v45 = vld [vmem:[%s2665_s5 + $0x5f0] sm:$0xff]  ;;  %v408_v46 = vld [vmem:[%s2665_s5 + $0x5f8] sm:$0xff]  ;;  %v876_v55 = vadd.f32 %v3177_v38, %v393_v18 }
 0x10a   : > { %1215 = vst [vmem:[%s2735_s9 + $0x498] sm:$0xff] %v847_v56  ;;  %1216 = vst [vmem:[%s2735_s9 + $0x4a0] sm:$0xff] %v848_v61  ;;  %v377_v51 = vld [vmem:[%s2665_s5 + $0x500] sm:$0xff]  ;;  %v378_v52 = vld [vmem:[%s2665_s5 + $0x508] sm:$0xff]  ;;  %v877_v56 = vadd.f32 %v3177_v38, %v394_v19  ;;  %v890_v18 = vadd.f32 %v3177_v38, %v407_v45  ;;  %v891_v19 = vadd.f32 %v3177_v38, %v408_v46 }
 0x10b   : > { %1217 = vst [vmem:[%s2735_s9 + $0x4a8] sm:$0xff] %v849_v62  ;;  %1218 = vst [vmem:[%s2735_s9 + $0x4b0] sm:$0xff] %v850_v63  ;;  %v379_v53 = vld [vmem:[%s2665_s5 + $0x510] sm:$0xff]  ;;  %v380_v54 = vld [vmem:[%s2665_s5 + $0x518] sm:$0xff]  ;;  %v880_v63 = vadd.f32 %v3177_v38, %v397_v26 }
 0x10c   : > { %1219 = vst [vmem:[%s2735_s9 + $0x4b8] sm:$0xff] %v851_v0  ;;  %1220 = vst [vmem:[%s2735_s9 + $0x4c0] sm:$0xff] %v852_v6  ;;  %v381_v59 = vld [vmem:[%s2665_s5 + $0x520] sm:$0xff]  ;;  %v382_v60 = vld [vmem:[%s2665_s5 + $0x528] sm:$0xff]  ;;  %v881_v0 = vadd.f32 %v3177_v38, %v398_v27 }
 0x10d   : > { %1221 = vst [vmem:[%s2735_s9 + $0x4c8] sm:$0xff] %v853_v7  ;;  %1222 = vst [vmem:[%s2735_s9 + $0x4d0] sm:$0xff] %v854_v8  ;;  %v383_v61 = vld [vmem:[%s2665_s5 + $0x530] sm:$0xff]  ;;  %v384_v62 = vld [vmem:[%s2665_s5 + $0x538] sm:$0xff]  ;;  %v3227_v7 = vpop.permute.xlu0 %637  ;;  %v884_v8 = vadd.f32 %v3177_v38, %v401_v34 }
 0x10e   : > { %1223 = vst [vmem:[%s2735_s9 + $0x4d8] sm:$0xff] %v855_v9  ;;  %1224 = vst [vmem:[%s2735_s9 + $0x4e0] sm:$0xff] %v856_v14  ;;  %v385_v3 = vld [vmem:[%s2665_s5 + $0x540] sm:$0xff]  ;;  %v386_v4 = vld [vmem:[%s2665_s5 + $0x548] sm:$0xff]  ;;  %v885_v9 = vadd.f32 %v3177_v38, %v402_v35  ;;  %v862_v26 = vadd.f32 %v3227_v7, %v379_v53  ;;  %v863_v27 = vadd.f32 %v3227_v7, %v380_v54 }
 0x10f   : > { %1225 = vst [vmem:[%s2735_s9 + $0x4e8] sm:$0xff] %v857_v15  ;;  %1226 = vst [vmem:[%s2735_s9 + $0x4f0] sm:$0xff] %v858_v16  ;;  %v387_v5 = vld [vmem:[%s2665_s5 + $0x550] sm:$0xff]  ;;  %v388_v6 = vld [vmem:[%s2665_s5 + $0x558] sm:$0xff]  ;;  %v888_v16 = vadd.f32 %v3177_v38, %v405_v43  ;;  %v866_v34 = vadd.f32 %v3227_v7, %v383_v61  ;;  %v867_v35 = vadd.f32 %v3227_v7, %v384_v62 }
 0x110   : > { %1227 = vst [vmem:[%s2735_s9 + $0x4f8] sm:$0xff] %v859_v17  ;;  %1196 = vst [vmem:[%s2735_s9 + $0x400] sm:$0xff] %v828_v22  ;;  %v389_v12 = vld [vmem:[%s2665_s5 + $0x560] sm:$0xff]  ;;  %v390_v13 = vld [vmem:[%s2665_s5 + $0x568] sm:$0xff]  ;;  %v889_v17 = vadd.f32 %v3177_v38, %v406_v44  ;;  %v870_v43 = vadd.f32 %v3227_v7, %v387_v5  ;;  %v871_v44 = vadd.f32 %v3227_v7, %v388_v6 }
 0x111   : > { %1197 = vst [vmem:[%s2735_s9 + $0x408] sm:$0xff] %v829_v23  ;;  %1198 = vst [vmem:[%s2735_s9 + $0x410] sm:$0xff] %v830_v24  ;;  %v391_v14 = vld [vmem:[%s2665_s5 + $0x570] sm:$0xff]  ;;  %v392_v15 = vld [vmem:[%s2665_s5 + $0x578] sm:$0xff]  ;;  %v860_v24 = vadd.f32 %v3227_v7, %v377_v51 }
 0x112   : > { %1199 = vst [vmem:[%s2735_s9 + $0x418] sm:$0xff] %v831_v25  ;;  %1200 = vst [vmem:[%s2735_s9 + $0x420] sm:$0xff] %v832_v30  ;;  %v425_v20 = vld [vmem:[%s2665_s5 + $0x680] sm:$0xff]  ;;  %v426_v21 = vld [vmem:[%s2665_s5 + $0x688] sm:$0xff]  ;;  %v861_v25 = vadd.f32 %v3227_v7, %v378_v52  ;;  %v874_v51 = vadd.f32 %v3227_v7, %v391_v14  ;;  %v875_v52 = vadd.f32 %v3227_v7, %v392_v15 }
 0x113   : > { %1201 = vst [vmem:[%s2735_s9 + $0x428] sm:$0xff] %v833_v31  ;;  %1202 = vst [vmem:[%s2735_s9 + $0x430] sm:$0xff] %v834_v32  ;;  %v427_v22 = vld [vmem:[%s2665_s5 + $0x690] sm:$0xff]  ;;  %v428_v23 = vld [vmem:[%s2665_s5 + $0x698] sm:$0xff]  ;;  %v864_v32 = vadd.f32 %v3227_v7, %v381_v59 }
 0x114   : > { %1203 = vst [vmem:[%s2735_s9 + $0x438] sm:$0xff] %v835_v33  ;;  %1204 = vst [vmem:[%s2735_s9 + $0x440] sm:$0xff] %v836_v39  ;;  %v429_v28 = vld [vmem:[%s2665_s5 + $0x6a0] sm:$0xff]  ;;  %v430_v29 = vld [vmem:[%s2665_s5 + $0x6a8] sm:$0xff]  ;;  %v865_v33 = vadd.f32 %v3227_v7, %v382_v60 }
 0x115   : > { %1205 = vst [vmem:[%s2735_s9 + $0x448] sm:$0xff] %v837_v40  ;;  %1206 = vst [vmem:[%s2735_s9 + $0x450] sm:$0xff] %v838_v41  ;;  %v431_v30 = vld [vmem:[%s2665_s5 + $0x6b0] sm:$0xff]  ;;  %v432_v31 = vld [vmem:[%s2665_s5 + $0x6b8] sm:$0xff]  ;;  %v3277_v40 = vpop.permute.xlu1 %652  ;;  %v868_v41 = vadd.f32 %v3227_v7, %v385_v3 }
 0x116   : > { %1207 = vst [vmem:[%s2735_s9 + $0x458] sm:$0xff] %v839_v42  ;;  %1208 = vst [vmem:[%s2735_s9 + $0x460] sm:$0xff] %v840_v47  ;;  %v433_v36 = vld [vmem:[%s2665_s5 + $0x6c0] sm:$0xff]  ;;  %v434_v37 = vld [vmem:[%s2665_s5 + $0x6c8] sm:$0xff]  ;;  %v869_v42 = vadd.f32 %v3227_v7, %v386_v4  ;;  %v910_v59 = vadd.f32 %v3277_v40, %v427_v22  ;;  %v911_v60 = vadd.f32 %v3277_v40, %v428_v23 }
 0x117   : > { %1209 = vst [vmem:[%s2735_s9 + $0x468] sm:$0xff] %v841_v48  ;;  %1210 = vst [vmem:[%s2735_s9 + $0x470] sm:$0xff] %v842_v49  ;;  %v435_v38 = vld [vmem:[%s2665_s5 + $0x6d0] sm:$0xff]  ;;  %v436_v39 = vld [vmem:[%s2665_s5 + $0x6d8] sm:$0xff]  ;;  %v872_v49 = vadd.f32 %v3227_v7, %v389_v12  ;;  %v914_v3 = vadd.f32 %v3277_v40, %v431_v30  ;;  %v915_v4 = vadd.f32 %v3277_v40, %v432_v31 }
 0x118   : > { %1211 = vst [vmem:[%s2735_s9 + $0x478] sm:$0xff] %v843_v50  ;;  %1244 = vst [vmem:[%s2735_s9 + $0x580] sm:$0xff] %v876_v55  ;;  %v437_v45 = vld [vmem:[%s2665_s5 + $0x6e0] sm:$0xff]  ;;  %v438_v46 = vld [vmem:[%s2665_s5 + $0x6e8] sm:$0xff]  ;;  %v873_v50 = vadd.f32 %v3227_v7, %v390_v13  ;;  %v918_v12 = vadd.f32 %v3277_v40, %v435_v38  ;;  %v919_v13 = vadd.f32 %v3277_v40, %v436_v39 }
 0x119   : > { %1245 = vst [vmem:[%s2735_s9 + $0x588] sm:$0xff] %v877_v56  ;;  %1246 = vst [vmem:[%s2735_s9 + $0x590] sm:$0xff] %v878_v57  ;;  %v439_v47 = vld [vmem:[%s2665_s5 + $0x6f0] sm:$0xff]  ;;  %v440_v48 = vld [vmem:[%s2665_s5 + $0x6f8] sm:$0xff]  ;;  %v908_v57 = vadd.f32 %v3277_v40, %v425_v20 }
 0x11a   : > { %1247 = vst [vmem:[%s2735_s9 + $0x598] sm:$0xff] %v879_v58  ;;  %1248 = vst [vmem:[%s2735_s9 + $0x5a0] sm:$0xff] %v880_v63  ;;  %v409_v53 = vld [vmem:[%s2665_s5 + $0x600] sm:$0xff]  ;;  %v410_v54 = vld [vmem:[%s2665_s5 + $0x608] sm:$0xff]  ;;  %v909_v58 = vadd.f32 %v3277_v40, %v426_v21  ;;  %v922_v20 = vadd.f32 %v3277_v40, %v439_v47  ;;  %v923_v21 = vadd.f32 %v3277_v40, %v440_v48 }
 0x11b   : > { %1249 = vst [vmem:[%s2735_s9 + $0x5a8] sm:$0xff] %v881_v0  ;;  %1250 = vst [vmem:[%s2735_s9 + $0x5b0] sm:$0xff] %v882_v1  ;;  %v411_v55 = vld [vmem:[%s2665_s5 + $0x610] sm:$0xff]  ;;  %v412_v56 = vld [vmem:[%s2665_s5 + $0x618] sm:$0xff]  ;;  %v912_v1 = vadd.f32 %v3277_v40, %v429_v28 }
 0x11c   : > { %1251 = vst [vmem:[%s2735_s9 + $0x5b8] sm:$0xff] %v883_v2  ;;  %1252 = vst [vmem:[%s2735_s9 + $0x5c0] sm:$0xff] %v884_v8  ;;  %v413_v61 = vld [vmem:[%s2665_s5 + $0x620] sm:$0xff]  ;;  %v414_v62 = vld [vmem:[%s2665_s5 + $0x628] sm:$0xff]  ;;  %v913_v2 = vadd.f32 %v3277_v40, %v430_v29 }
 0x11d   : > { %1253 = vst [vmem:[%s2735_s9 + $0x5c8] sm:$0xff] %v885_v9  ;;  %1254 = vst [vmem:[%s2735_s9 + $0x5d0] sm:$0xff] %v886_v10  ;;  %v415_v63 = vld [vmem:[%s2665_s5 + $0x630] sm:$0xff]  ;;  %v416_v0 = vld [vmem:[%s2665_s5 + $0x638] sm:$0xff]  ;;  %v3327_v9 = vpop.permute.xlu0 %647  ;;  %v916_v10 = vadd.f32 %v3277_v40, %v433_v36 }
 0x11e   : > { %1255 = vst [vmem:[%s2735_s9 + $0x5d8] sm:$0xff] %v887_v11  ;;  %1256 = vst [vmem:[%s2735_s9 + $0x5e0] sm:$0xff] %v888_v16  ;;  %v417_v5 = vld [vmem:[%s2665_s5 + $0x640] sm:$0xff]  ;;  %v418_v6 = vld [vmem:[%s2665_s5 + $0x648] sm:$0xff]  ;;  %v917_v11 = vadd.f32 %v3277_v40, %v434_v37  ;;  %v894_v28 = vadd.f32 %v3327_v9, %v411_v55  ;;  %v895_v29 = vadd.f32 %v3327_v9, %v412_v56 }
 0x11f   : > { %1257 = vst [vmem:[%s2735_s9 + $0x5e8] sm:$0xff] %v889_v17  ;;  %1258 = vst [vmem:[%s2735_s9 + $0x5f0] sm:$0xff] %v890_v18  ;;  %v419_v7 = vld [vmem:[%s2665_s5 + $0x650] sm:$0xff]  ;;  %v420_v8 = vld [vmem:[%s2665_s5 + $0x658] sm:$0xff]  ;;  %v920_v18 = vadd.f32 %v3277_v40, %v437_v45  ;;  %v898_v36 = vadd.f32 %v3327_v9, %v415_v63  ;;  %v899_v37 = vadd.f32 %v3327_v9, %v416_v0 }
 0x120   : > { %1259 = vst [vmem:[%s2735_s9 + $0x5f8] sm:$0xff] %v891_v19  ;;  %1228 = vst [vmem:[%s2735_s9 + $0x500] sm:$0xff] %v860_v24  ;;  %v421_v14 = vld [vmem:[%s2665_s5 + $0x660] sm:$0xff]  ;;  %v422_v15 = vld [vmem:[%s2665_s5 + $0x668] sm:$0xff]  ;;  %v921_v19 = vadd.f32 %v3277_v40, %v438_v46  ;;  %v902_v45 = vadd.f32 %v3327_v9, %v419_v7  ;;  %v903_v46 = vadd.f32 %v3327_v9, %v420_v8 }
 0x121   : > { %1229 = vst [vmem:[%s2735_s9 + $0x508] sm:$0xff] %v861_v25  ;;  %1230 = vst [vmem:[%s2735_s9 + $0x510] sm:$0xff] %v862_v26  ;;  %v423_v16 = vld [vmem:[%s2665_s5 + $0x670] sm:$0xff]  ;;  %v424_v17 = vld [vmem:[%s2665_s5 + $0x678] sm:$0xff]  ;;  %v892_v26 = vadd.f32 %v3327_v9, %v409_v53 }
 0x122   : > { %1231 = vst [vmem:[%s2735_s9 + $0x518] sm:$0xff] %v863_v27  ;;  %1232 = vst [vmem:[%s2735_s9 + $0x520] sm:$0xff] %v864_v32  ;;  %v457_v22 = vld [vmem:[%s2665_s5 + $0x780] sm:$0xff]  ;;  %v458_v23 = vld [vmem:[%s2665_s5 + $0x788] sm:$0xff]  ;;  %v893_v27 = vadd.f32 %v3327_v9, %v410_v54  ;;  %v906_v53 = vadd.f32 %v3327_v9, %v423_v16  ;;  %v907_v54 = vadd.f32 %v3327_v9, %v424_v17 }
 0x123   : > { %1233 = vst [vmem:[%s2735_s9 + $0x528] sm:$0xff] %v865_v33  ;;  %1234 = vst [vmem:[%s2735_s9 + $0x530] sm:$0xff] %v866_v34  ;;  %v459_v24 = vld [vmem:[%s2665_s5 + $0x790] sm:$0xff]  ;;  %v460_v25 = vld [vmem:[%s2665_s5 + $0x798] sm:$0xff]  ;;  %v896_v34 = vadd.f32 %v3327_v9, %v413_v61 }
 0x124   : > { %1235 = vst [vmem:[%s2735_s9 + $0x538] sm:$0xff] %v867_v35  ;;  %1236 = vst [vmem:[%s2735_s9 + $0x540] sm:$0xff] %v868_v41  ;;  %v461_v30 = vld [vmem:[%s2665_s5 + $0x7a0] sm:$0xff]  ;;  %v462_v31 = vld [vmem:[%s2665_s5 + $0x7a8] sm:$0xff]  ;;  %v897_v35 = vadd.f32 %v3327_v9, %v414_v62 }
 0x125   : > { %1237 = vst [vmem:[%s2735_s9 + $0x548] sm:$0xff] %v869_v42  ;;  %1238 = vst [vmem:[%s2735_s9 + $0x550] sm:$0xff] %v870_v43  ;;  %v463_v32 = vld [vmem:[%s2665_s5 + $0x7b0] sm:$0xff]  ;;  %v464_v33 = vld [vmem:[%s2665_s5 + $0x7b8] sm:$0xff]  ;;  %v3377_v42 = vpop.permute.xlu1 %662  ;;  %v900_v43 = vadd.f32 %v3327_v9, %v417_v5 }
 0x126   : > { %1239 = vst [vmem:[%s2735_s9 + $0x558] sm:$0xff] %v871_v44  ;;  %1240 = vst [vmem:[%s2735_s9 + $0x560] sm:$0xff] %v872_v49  ;;  %v465_v38 = vld [vmem:[%s2665_s5 + $0x7c0] sm:$0xff]  ;;  %v466_v39 = vld [vmem:[%s2665_s5 + $0x7c8] sm:$0xff]  ;;  %v901_v44 = vadd.f32 %v3327_v9, %v418_v6  ;;  %v942_v61 = vadd.f32 %v3377_v42, %v459_v24  ;;  %v943_v62 = vadd.f32 %v3377_v42, %v460_v25 }
 0x127   : > { %1241 = vst [vmem:[%s2735_s9 + $0x568] sm:$0xff] %v873_v50  ;;  %1242 = vst [vmem:[%s2735_s9 + $0x570] sm:$0xff] %v874_v51  ;;  %v467_v40 = vld [vmem:[%s2665_s5 + $0x7d0] sm:$0xff]  ;;  %v468_v41 = vld [vmem:[%s2665_s5 + $0x7d8] sm:$0xff]  ;;  %v904_v51 = vadd.f32 %v3327_v9, %v421_v14  ;;  %v946_v5 = vadd.f32 %v3377_v42, %v463_v32  ;;  %v947_v6 = vadd.f32 %v3377_v42, %v464_v33 }
 0x128   : > { %1243 = vst [vmem:[%s2735_s9 + $0x578] sm:$0xff] %v875_v52  ;;  %1276 = vst [vmem:[%s2735_s9 + $0x680] sm:$0xff] %v908_v57  ;;  %v469_v47 = vld [vmem:[%s2665_s5 + $0x7e0] sm:$0xff]  ;;  %v470_v48 = vld [vmem:[%s2665_s5 + $0x7e8] sm:$0xff]  ;;  %v905_v52 = vadd.f32 %v3327_v9, %v422_v15  ;;  %v950_v14 = vadd.f32 %v3377_v42, %v467_v40  ;;  %v951_v15 = vadd.f32 %v3377_v42, %v468_v41 }
 0x129   : > { %1277 = vst [vmem:[%s2735_s9 + $0x688] sm:$0xff] %v909_v58  ;;  %1278 = vst [vmem:[%s2735_s9 + $0x690] sm:$0xff] %v910_v59  ;;  %v471_v49 = vld [vmem:[%s2665_s5 + $0x7f0] sm:$0xff]  ;;  %v472_v50 = vld [vmem:[%s2665_s5 + $0x7f8] sm:$0xff]  ;;  %v940_v59 = vadd.f32 %v3377_v42, %v457_v22 }
 0x12a   : > { %1279 = vst [vmem:[%s2735_s9 + $0x698] sm:$0xff] %v911_v60  ;;  %1280 = vst [vmem:[%s2735_s9 + $0x6a0] sm:$0xff] %v912_v1  ;;  %v441_v55 = vld [vmem:[%s2665_s5 + $0x700] sm:$0xff]  ;;  %v442_v56 = vld [vmem:[%s2665_s5 + $0x708] sm:$0xff]  ;;  %v941_v60 = vadd.f32 %v3377_v42, %v458_v23  ;;  %v954_v22 = vadd.f32 %v3377_v42, %v471_v49  ;;  %v955_v23 = vadd.f32 %v3377_v42, %v472_v50 }
 0x12b   : > { %1281 = vst [vmem:[%s2735_s9 + $0x6a8] sm:$0xff] %v913_v2  ;;  %1282 = vst [vmem:[%s2735_s9 + $0x6b0] sm:$0xff] %v914_v3  ;;  %v443_v57 = vld [vmem:[%s2665_s5 + $0x710] sm:$0xff]  ;;  %v444_v58 = vld [vmem:[%s2665_s5 + $0x718] sm:$0xff]  ;;  %v944_v3 = vadd.f32 %v3377_v42, %v461_v30 }
 0x12c   : > { %1283 = vst [vmem:[%s2735_s9 + $0x6b8] sm:$0xff] %v915_v4  ;;  %1284 = vst [vmem:[%s2735_s9 + $0x6c0] sm:$0xff] %v916_v10  ;;  %v445_v63 = vld [vmem:[%s2665_s5 + $0x720] sm:$0xff]  ;;  %v446_v0 = vld [vmem:[%s2665_s5 + $0x728] sm:$0xff]  ;;  %v945_v4 = vadd.f32 %v3377_v42, %v462_v31 }
 0x12d   : > { %1285 = vst [vmem:[%s2735_s9 + $0x6c8] sm:$0xff] %v917_v11  ;;  %1286 = vst [vmem:[%s2735_s9 + $0x6d0] sm:$0xff] %v918_v12  ;;  %v447_v1 = vld [vmem:[%s2665_s5 + $0x730] sm:$0xff]  ;;  %v448_v2 = vld [vmem:[%s2665_s5 + $0x738] sm:$0xff]  ;;  %v3427_v11 = vpop.permute.xlu0 %657  ;;  %v948_v12 = vadd.f32 %v3377_v42, %v465_v38 }
 0x12e   : > { %1287 = vst [vmem:[%s2735_s9 + $0x6d8] sm:$0xff] %v919_v13  ;;  %1288 = vst [vmem:[%s2735_s9 + $0x6e0] sm:$0xff] %v920_v18  ;;  %v449_v7 = vld [vmem:[%s2665_s5 + $0x740] sm:$0xff]  ;;  %v450_v8 = vld [vmem:[%s2665_s5 + $0x748] sm:$0xff]  ;;  %v949_v13 = vadd.f32 %v3377_v42, %v466_v39  ;;  %v926_v30 = vadd.f32 %v3427_v11, %v443_v57  ;;  %v927_v31 = vadd.f32 %v3427_v11, %v444_v58 }
 0x12f   : > { %1289 = vst [vmem:[%s2735_s9 + $0x6e8] sm:$0xff] %v921_v19  ;;  %1290 = vst [vmem:[%s2735_s9 + $0x6f0] sm:$0xff] %v922_v20  ;;  %v451_v9 = vld [vmem:[%s2665_s5 + $0x750] sm:$0xff]  ;;  %v452_v10 = vld [vmem:[%s2665_s5 + $0x758] sm:$0xff]  ;;  %v952_v20 = vadd.f32 %v3377_v42, %v469_v47  ;;  %v930_v38 = vadd.f32 %v3427_v11, %v447_v1  ;;  %v931_v39 = vadd.f32 %v3427_v11, %v448_v2 }
 0x130   : > { %1291 = vst [vmem:[%s2735_s9 + $0x6f8] sm:$0xff] %v923_v21  ;;  %1260 = vst [vmem:[%s2735_s9 + $0x600] sm:$0xff] %v892_v26  ;;  %v453_v16 = vld [vmem:[%s2665_s5 + $0x760] sm:$0xff]  ;;  %v454_v17 = vld [vmem:[%s2665_s5 + $0x768] sm:$0xff]  ;;  %v953_v21 = vadd.f32 %v3377_v42, %v470_v48  ;;  %v934_v47 = vadd.f32 %v3427_v11, %v451_v9  ;;  %v935_v48 = vadd.f32 %v3427_v11, %v452_v10 }
 0x131   : > { %1261 = vst [vmem:[%s2735_s9 + $0x608] sm:$0xff] %v893_v27  ;;  %1262 = vst [vmem:[%s2735_s9 + $0x610] sm:$0xff] %v894_v28  ;;  %v455_v18 = vld [vmem:[%s2665_s5 + $0x770] sm:$0xff]  ;;  %v456_v19 = vld [vmem:[%s2665_s5 + $0x778] sm:$0xff]  ;;  %v924_v28 = vadd.f32 %v3427_v11, %v441_v55 }
 0x132   : > { %1263 = vst [vmem:[%s2735_s9 + $0x618] sm:$0xff] %v895_v29  ;;  %1264 = vst [vmem:[%s2735_s9 + $0x620] sm:$0xff] %v896_v34  ;;  %v489_v24 = vld [vmem:[%s2665_s5 + $0x880] sm:$0xff]  ;;  %v490_v25 = vld [vmem:[%s2665_s5 + $0x888] sm:$0xff]  ;;  %v925_v29 = vadd.f32 %v3427_v11, %v442_v56  ;;  %v938_v55 = vadd.f32 %v3427_v11, %v455_v18  ;;  %v939_v56 = vadd.f32 %v3427_v11, %v456_v19 }
 0x133   : > { %1265 = vst [vmem:[%s2735_s9 + $0x628] sm:$0xff] %v897_v35  ;;  %1266 = vst [vmem:[%s2735_s9 + $0x630] sm:$0xff] %v898_v36  ;;  %v491_v26 = vld [vmem:[%s2665_s5 + $0x890] sm:$0xff]  ;;  %v492_v27 = vld [vmem:[%s2665_s5 + $0x898] sm:$0xff]  ;;  %v928_v36 = vadd.f32 %v3427_v11, %v445_v63 }
 0x134   : > { %1267 = vst [vmem:[%s2735_s9 + $0x638] sm:$0xff] %v899_v37  ;;  %1268 = vst [vmem:[%s2735_s9 + $0x640] sm:$0xff] %v900_v43  ;;  %v493_v32 = vld [vmem:[%s2665_s5 + $0x8a0] sm:$0xff]  ;;  %v494_v33 = vld [vmem:[%s2665_s5 + $0x8a8] sm:$0xff]  ;;  %v929_v37 = vadd.f32 %v3427_v11, %v446_v0 }
 0x135   : > { %1269 = vst [vmem:[%s2735_s9 + $0x648] sm:$0xff] %v901_v44  ;;  %1270 = vst [vmem:[%s2735_s9 + $0x650] sm:$0xff] %v902_v45  ;;  %v495_v34 = vld [vmem:[%s2665_s5 + $0x8b0] sm:$0xff]  ;;  %v496_v35 = vld [vmem:[%s2665_s5 + $0x8b8] sm:$0xff]  ;;  %v3477_v44 = vpop.permute.xlu1 %672  ;;  %v932_v45 = vadd.f32 %v3427_v11, %v449_v7 }
 0x136   : > { %1271 = vst [vmem:[%s2735_s9 + $0x658] sm:$0xff] %v903_v46  ;;  %1272 = vst [vmem:[%s2735_s9 + $0x660] sm:$0xff] %v904_v51  ;;  %v497_v40 = vld [vmem:[%s2665_s5 + $0x8c0] sm:$0xff]  ;;  %v498_v41 = vld [vmem:[%s2665_s5 + $0x8c8] sm:$0xff]  ;;  %v933_v46 = vadd.f32 %v3427_v11, %v450_v8  ;;  %v974_v63 = vadd.f32 %v3477_v44, %v491_v26  ;;  %v975_v0 = vadd.f32 %v3477_v44, %v492_v27 }
 0x137   : > { %1273 = vst [vmem:[%s2735_s9 + $0x668] sm:$0xff] %v905_v52  ;;  %1274 = vst [vmem:[%s2735_s9 + $0x670] sm:$0xff] %v906_v53  ;;  %v499_v42 = vld [vmem:[%s2665_s5 + $0x8d0] sm:$0xff]  ;;  %v500_v43 = vld [vmem:[%s2665_s5 + $0x8d8] sm:$0xff]  ;;  %v936_v53 = vadd.f32 %v3427_v11, %v453_v16  ;;  %v978_v7 = vadd.f32 %v3477_v44, %v495_v34  ;;  %v979_v8 = vadd.f32 %v3477_v44, %v496_v35 }
 0x138   : > { %1275 = vst [vmem:[%s2735_s9 + $0x678] sm:$0xff] %v907_v54  ;;  %1308 = vst [vmem:[%s2735_s9 + $0x780] sm:$0xff] %v940_v59  ;;  %v501_v49 = vld [vmem:[%s2665_s5 + $0x8e0] sm:$0xff]  ;;  %v502_v50 = vld [vmem:[%s2665_s5 + $0x8e8] sm:$0xff]  ;;  %v937_v54 = vadd.f32 %v3427_v11, %v454_v17  ;;  %v982_v16 = vadd.f32 %v3477_v44, %v499_v42  ;;  %v983_v17 = vadd.f32 %v3477_v44, %v500_v43 }
 0x139   : > { %1309 = vst [vmem:[%s2735_s9 + $0x788] sm:$0xff] %v941_v60  ;;  %1310 = vst [vmem:[%s2735_s9 + $0x790] sm:$0xff] %v942_v61  ;;  %v503_v51 = vld [vmem:[%s2665_s5 + $0x8f0] sm:$0xff]  ;;  %v504_v52 = vld [vmem:[%s2665_s5 + $0x8f8] sm:$0xff]  ;;  %v972_v61 = vadd.f32 %v3477_v44, %v489_v24 }
 0x13a   : > { %1311 = vst [vmem:[%s2735_s9 + $0x798] sm:$0xff] %v943_v62  ;;  %1312 = vst [vmem:[%s2735_s9 + $0x7a0] sm:$0xff] %v944_v3  ;;  %v473_v57 = vld [vmem:[%s2665_s5 + $0x800] sm:$0xff]  ;;  %v474_v58 = vld [vmem:[%s2665_s5 + $0x808] sm:$0xff]  ;;  %v973_v62 = vadd.f32 %v3477_v44, %v490_v25  ;;  %v986_v24 = vadd.f32 %v3477_v44, %v503_v51  ;;  %v987_v25 = vadd.f32 %v3477_v44, %v504_v52 }
 0x13b   : > { %1313 = vst [vmem:[%s2735_s9 + $0x7a8] sm:$0xff] %v945_v4  ;;  %1314 = vst [vmem:[%s2735_s9 + $0x7b0] sm:$0xff] %v946_v5  ;;  %v475_v59 = vld [vmem:[%s2665_s5 + $0x810] sm:$0xff]  ;;  %v476_v60 = vld [vmem:[%s2665_s5 + $0x818] sm:$0xff]  ;;  %v976_v5 = vadd.f32 %v3477_v44, %v493_v32 }
 0x13c   : > { %1315 = vst [vmem:[%s2735_s9 + $0x7b8] sm:$0xff] %v947_v6  ;;  %1316 = vst [vmem:[%s2735_s9 + $0x7c0] sm:$0xff] %v948_v12  ;;  %v477_v1 = vld [vmem:[%s2665_s5 + $0x820] sm:$0xff]  ;;  %v478_v2 = vld [vmem:[%s2665_s5 + $0x828] sm:$0xff]  ;;  %v977_v6 = vadd.f32 %v3477_v44, %v494_v33 }
 0x13d   : > { %1317 = vst [vmem:[%s2735_s9 + $0x7c8] sm:$0xff] %v949_v13  ;;  %1318 = vst [vmem:[%s2735_s9 + $0x7d0] sm:$0xff] %v950_v14  ;;  %v479_v3 = vld [vmem:[%s2665_s5 + $0x830] sm:$0xff]  ;;  %v480_v4 = vld [vmem:[%s2665_s5 + $0x838] sm:$0xff]  ;;  %v3527_v13 = vpop.permute.xlu0 %667  ;;  %v980_v14 = vadd.f32 %v3477_v44, %v497_v40 }
 0x13e   : > { %1319 = vst [vmem:[%s2735_s9 + $0x7d8] sm:$0xff] %v951_v15  ;;  %1320 = vst [vmem:[%s2735_s9 + $0x7e0] sm:$0xff] %v952_v20  ;;  %v481_v9 = vld [vmem:[%s2665_s5 + $0x840] sm:$0xff]  ;;  %v482_v10 = vld [vmem:[%s2665_s5 + $0x848] sm:$0xff]  ;;  %v981_v15 = vadd.f32 %v3477_v44, %v498_v41  ;;  %v958_v32 = vadd.f32 %v3527_v13, %v475_v59  ;;  %v959_v33 = vadd.f32 %v3527_v13, %v476_v60 }
 0x13f   : > { %1321 = vst [vmem:[%s2735_s9 + $0x7e8] sm:$0xff] %v953_v21  ;;  %1322 = vst [vmem:[%s2735_s9 + $0x7f0] sm:$0xff] %v954_v22  ;;  %v483_v11 = vld [vmem:[%s2665_s5 + $0x850] sm:$0xff]  ;;  %v484_v12 = vld [vmem:[%s2665_s5 + $0x858] sm:$0xff]  ;;  %v984_v22 = vadd.f32 %v3477_v44, %v501_v49  ;;  %v962_v40 = vadd.f32 %v3527_v13, %v479_v3  ;;  %v963_v41 = vadd.f32 %v3527_v13, %v480_v4 }
 0x140   : > { %1323 = vst [vmem:[%s2735_s9 + $0x7f8] sm:$0xff] %v955_v23  ;;  %1292 = vst [vmem:[%s2735_s9 + $0x700] sm:$0xff] %v924_v28  ;;  %v485_v18 = vld [vmem:[%s2665_s5 + $0x860] sm:$0xff]  ;;  %v486_v19 = vld [vmem:[%s2665_s5 + $0x868] sm:$0xff]  ;;  %v985_v23 = vadd.f32 %v3477_v44, %v502_v50  ;;  %v966_v49 = vadd.f32 %v3527_v13, %v483_v11  ;;  %v967_v50 = vadd.f32 %v3527_v13, %v484_v12 }
 0x141   : > { %1293 = vst [vmem:[%s2735_s9 + $0x708] sm:$0xff] %v925_v29  ;;  %1294 = vst [vmem:[%s2735_s9 + $0x710] sm:$0xff] %v926_v30  ;;  %v487_v20 = vld [vmem:[%s2665_s5 + $0x870] sm:$0xff]  ;;  %v488_v21 = vld [vmem:[%s2665_s5 + $0x878] sm:$0xff]  ;;  %v956_v30 = vadd.f32 %v3527_v13, %v473_v57 }
 0x142   : > { %1295 = vst [vmem:[%s2735_s9 + $0x718] sm:$0xff] %v927_v31  ;;  %1296 = vst [vmem:[%s2735_s9 + $0x720] sm:$0xff] %v928_v36  ;;  %v521_v26 = vld [vmem:[%s2665_s5 + $0x980] sm:$0xff]  ;;  %v522_v27 = vld [vmem:[%s2665_s5 + $0x988] sm:$0xff]  ;;  %v957_v31 = vadd.f32 %v3527_v13, %v474_v58  ;;  %v970_v57 = vadd.f32 %v3527_v13, %v487_v20  ;;  %v971_v58 = vadd.f32 %v3527_v13, %v488_v21 }
 0x143   : > { %1297 = vst [vmem:[%s2735_s9 + $0x728] sm:$0xff] %v929_v37  ;;  %1298 = vst [vmem:[%s2735_s9 + $0x730] sm:$0xff] %v930_v38  ;;  %v523_v28 = vld [vmem:[%s2665_s5 + $0x990] sm:$0xff]  ;;  %v524_v29 = vld [vmem:[%s2665_s5 + $0x998] sm:$0xff]  ;;  %v960_v38 = vadd.f32 %v3527_v13, %v477_v1 }
 0x144   : > { %1299 = vst [vmem:[%s2735_s9 + $0x738] sm:$0xff] %v931_v39  ;;  %1300 = vst [vmem:[%s2735_s9 + $0x740] sm:$0xff] %v932_v45  ;;  %v525_v34 = vld [vmem:[%s2665_s5 + $0x9a0] sm:$0xff]  ;;  %v526_v35 = vld [vmem:[%s2665_s5 + $0x9a8] sm:$0xff]  ;;  %v961_v39 = vadd.f32 %v3527_v13, %v478_v2 }
 0x145   : > { %1301 = vst [vmem:[%s2735_s9 + $0x748] sm:$0xff] %v933_v46  ;;  %1302 = vst [vmem:[%s2735_s9 + $0x750] sm:$0xff] %v934_v47  ;;  %v527_v36 = vld [vmem:[%s2665_s5 + $0x9b0] sm:$0xff]  ;;  %v528_v37 = vld [vmem:[%s2665_s5 + $0x9b8] sm:$0xff]  ;;  %v3577_v46 = vpop.permute.xlu1 %682  ;;  %v964_v47 = vadd.f32 %v3527_v13, %v481_v9 }
 0x146   : > { %1303 = vst [vmem:[%s2735_s9 + $0x758] sm:$0xff] %v935_v48  ;;  %1304 = vst [vmem:[%s2735_s9 + $0x760] sm:$0xff] %v936_v53  ;;  %v529_v42 = vld [vmem:[%s2665_s5 + $0x9c0] sm:$0xff]  ;;  %v530_v43 = vld [vmem:[%s2665_s5 + $0x9c8] sm:$0xff]  ;;  %v965_v48 = vadd.f32 %v3527_v13, %v482_v10  ;;  %v1006_v1 = vadd.f32 %v3577_v46, %v523_v28  ;;  %v1007_v2 = vadd.f32 %v3577_v46, %v524_v29 }
 0x147   : > { %1305 = vst [vmem:[%s2735_s9 + $0x768] sm:$0xff] %v937_v54  ;;  %1306 = vst [vmem:[%s2735_s9 + $0x770] sm:$0xff] %v938_v55  ;;  %v531_v44 = vld [vmem:[%s2665_s5 + $0x9d0] sm:$0xff]  ;;  %v532_v45 = vld [vmem:[%s2665_s5 + $0x9d8] sm:$0xff]  ;;  %v968_v55 = vadd.f32 %v3527_v13, %v485_v18  ;;  %v1010_v9 = vadd.f32 %v3577_v46, %v527_v36  ;;  %v1011_v10 = vadd.f32 %v3577_v46, %v528_v37 }
 0x148   : > { %1307 = vst [vmem:[%s2735_s9 + $0x778] sm:$0xff] %v939_v56  ;;  %1340 = vst [vmem:[%s2735_s9 + $0x880] sm:$0xff] %v972_v61  ;;  %v533_v51 = vld [vmem:[%s2665_s5 + $0x9e0] sm:$0xff]  ;;  %v534_v52 = vld [vmem:[%s2665_s5 + $0x9e8] sm:$0xff]  ;;  %v969_v56 = vadd.f32 %v3527_v13, %v486_v19  ;;  %v1014_v18 = vadd.f32 %v3577_v46, %v531_v44  ;;  %v1015_v19 = vadd.f32 %v3577_v46, %v532_v45 }
 0x149   : > { %1341 = vst [vmem:[%s2735_s9 + $0x888] sm:$0xff] %v973_v62  ;;  %1342 = vst [vmem:[%s2735_s9 + $0x890] sm:$0xff] %v974_v63  ;;  %v535_v53 = vld [vmem:[%s2665_s5 + $0x9f0] sm:$0xff]  ;;  %v536_v54 = vld [vmem:[%s2665_s5 + $0x9f8] sm:$0xff]  ;;  %v1004_v63 = vadd.f32 %v3577_v46, %v521_v26 }
 0x14a   : > { %1343 = vst [vmem:[%s2735_s9 + $0x898] sm:$0xff] %v975_v0  ;;  %1344 = vst [vmem:[%s2735_s9 + $0x8a0] sm:$0xff] %v976_v5  ;;  %v505_v59 = vld [vmem:[%s2665_s5 + $0x900] sm:$0xff]  ;;  %v506_v60 = vld [vmem:[%s2665_s5 + $0x908] sm:$0xff]  ;;  %v1005_v0 = vadd.f32 %v3577_v46, %v522_v27  ;;  %v1018_v26 = vadd.f32 %v3577_v46, %v535_v53  ;;  %v1019_v27 = vadd.f32 %v3577_v46, %v536_v54 }
 0x14b   : > { %1345 = vst [vmem:[%s2735_s9 + $0x8a8] sm:$0xff] %v977_v6  ;;  %1346 = vst [vmem:[%s2735_s9 + $0x8b0] sm:$0xff] %v978_v7  ;;  %v507_v61 = vld [vmem:[%s2665_s5 + $0x910] sm:$0xff]  ;;  %v508_v62 = vld [vmem:[%s2665_s5 + $0x918] sm:$0xff]  ;;  %v1008_v7 = vadd.f32 %v3577_v46, %v525_v34 }
 0x14c   : > { %1347 = vst [vmem:[%s2735_s9 + $0x8b8] sm:$0xff] %v979_v8  ;;  %1348 = vst [vmem:[%s2735_s9 + $0x8c0] sm:$0xff] %v980_v14  ;;  %v509_v3 = vld [vmem:[%s2665_s5 + $0x920] sm:$0xff]  ;;  %v510_v4 = vld [vmem:[%s2665_s5 + $0x928] sm:$0xff]  ;;  %v1009_v8 = vadd.f32 %v3577_v46, %v526_v35 }
 0x14d   : > { %1349 = vst [vmem:[%s2735_s9 + $0x8c8] sm:$0xff] %v981_v15  ;;  %1350 = vst [vmem:[%s2735_s9 + $0x8d0] sm:$0xff] %v982_v16  ;;  %v511_v5 = vld [vmem:[%s2665_s5 + $0x930] sm:$0xff]  ;;  %v512_v6 = vld [vmem:[%s2665_s5 + $0x938] sm:$0xff]  ;;  %v3627_v15 = vpop.permute.xlu0 %677  ;;  %v1012_v16 = vadd.f32 %v3577_v46, %v529_v42 }
 0x14e   : > { %1351 = vst [vmem:[%s2735_s9 + $0x8d8] sm:$0xff] %v983_v17  ;;  %1352 = vst [vmem:[%s2735_s9 + $0x8e0] sm:$0xff] %v984_v22  ;;  %v513_v11 = vld [vmem:[%s2665_s5 + $0x940] sm:$0xff]  ;;  %v514_v12 = vld [vmem:[%s2665_s5 + $0x948] sm:$0xff]  ;;  %v1013_v17 = vadd.f32 %v3577_v46, %v530_v43  ;;  %v990_v34 = vadd.f32 %v3627_v15, %v507_v61  ;;  %v991_v35 = vadd.f32 %v3627_v15, %v508_v62 }
 0x14f   : > { %1353 = vst [vmem:[%s2735_s9 + $0x8e8] sm:$0xff] %v985_v23  ;;  %1354 = vst [vmem:[%s2735_s9 + $0x8f0] sm:$0xff] %v986_v24  ;;  %v515_v13 = vld [vmem:[%s2665_s5 + $0x950] sm:$0xff]  ;;  %v516_v14 = vld [vmem:[%s2665_s5 + $0x958] sm:$0xff]  ;;  %v1016_v24 = vadd.f32 %v3577_v46, %v533_v51  ;;  %v994_v42 = vadd.f32 %v3627_v15, %v511_v5  ;;  %v995_v43 = vadd.f32 %v3627_v15, %v512_v6 }
 0x150   : > { %1355 = vst [vmem:[%s2735_s9 + $0x8f8] sm:$0xff] %v987_v25  ;;  %1324 = vst [vmem:[%s2735_s9 + $0x800] sm:$0xff] %v956_v30  ;;  %v517_v20 = vld [vmem:[%s2665_s5 + $0x960] sm:$0xff]  ;;  %v518_v21 = vld [vmem:[%s2665_s5 + $0x968] sm:$0xff]  ;;  %v1017_v25 = vadd.f32 %v3577_v46, %v534_v52  ;;  %v998_v51 = vadd.f32 %v3627_v15, %v515_v13  ;;  %v999_v52 = vadd.f32 %v3627_v15, %v516_v14 }
 0x151   : > { %1325 = vst [vmem:[%s2735_s9 + $0x808] sm:$0xff] %v957_v31  ;;  %1326 = vst [vmem:[%s2735_s9 + $0x810] sm:$0xff] %v958_v32  ;;  %v519_v22 = vld [vmem:[%s2665_s5 + $0x970] sm:$0xff]  ;;  %v520_v23 = vld [vmem:[%s2665_s5 + $0x978] sm:$0xff]  ;;  %v988_v32 = vadd.f32 %v3627_v15, %v505_v59 }
 0x152   : > { %1327 = vst [vmem:[%s2735_s9 + $0x818] sm:$0xff] %v959_v33  ;;  %1328 = vst [vmem:[%s2735_s9 + $0x820] sm:$0xff] %v960_v38  ;;  %v553_v28 = vld [vmem:[%s2665_s5 + $0xa80] sm:$0xff]  ;;  %v554_v29 = vld [vmem:[%s2665_s5 + $0xa88] sm:$0xff]  ;;  %v989_v33 = vadd.f32 %v3627_v15, %v506_v60  ;;  %v1002_v59 = vadd.f32 %v3627_v15, %v519_v22  ;;  %v1003_v60 = vadd.f32 %v3627_v15, %v520_v23 }
 0x153   : > { %1329 = vst [vmem:[%s2735_s9 + $0x828] sm:$0xff] %v961_v39  ;;  %1330 = vst [vmem:[%s2735_s9 + $0x830] sm:$0xff] %v962_v40  ;;  %v555_v30 = vld [vmem:[%s2665_s5 + $0xa90] sm:$0xff]  ;;  %v556_v31 = vld [vmem:[%s2665_s5 + $0xa98] sm:$0xff]  ;;  %v992_v40 = vadd.f32 %v3627_v15, %v509_v3 }
 0x154   : > { %1331 = vst [vmem:[%s2735_s9 + $0x838] sm:$0xff] %v963_v41  ;;  %1332 = vst [vmem:[%s2735_s9 + $0x840] sm:$0xff] %v964_v47  ;;  %v557_v36 = vld [vmem:[%s2665_s5 + $0xaa0] sm:$0xff]  ;;  %v558_v37 = vld [vmem:[%s2665_s5 + $0xaa8] sm:$0xff]  ;;  %v993_v41 = vadd.f32 %v3627_v15, %v510_v4 }
 0x155   : > { %1333 = vst [vmem:[%s2735_s9 + $0x848] sm:$0xff] %v965_v48  ;;  %1334 = vst [vmem:[%s2735_s9 + $0x850] sm:$0xff] %v966_v49  ;;  %v559_v38 = vld [vmem:[%s2665_s5 + $0xab0] sm:$0xff]  ;;  %v560_v39 = vld [vmem:[%s2665_s5 + $0xab8] sm:$0xff]  ;;  %v3677_v48 = vpop.permute.xlu1 %692  ;;  %v996_v49 = vadd.f32 %v3627_v15, %v513_v11 }
 0x156   : > { %1335 = vst [vmem:[%s2735_s9 + $0x858] sm:$0xff] %v967_v50  ;;  %1336 = vst [vmem:[%s2735_s9 + $0x860] sm:$0xff] %v968_v55  ;;  %v561_v44 = vld [vmem:[%s2665_s5 + $0xac0] sm:$0xff]  ;;  %v562_v45 = vld [vmem:[%s2665_s5 + $0xac8] sm:$0xff]  ;;  %v997_v50 = vadd.f32 %v3627_v15, %v514_v12  ;;  %v1037_v3 = vadd.f32 %v3677_v48, %v554_v29  ;;  %v1038_v4 = vadd.f32 %v3677_v48, %v555_v30 }
 0x157   : > { %1337 = vst [vmem:[%s2735_s9 + $0x868] sm:$0xff] %v969_v56  ;;  %1338 = vst [vmem:[%s2735_s9 + $0x870] sm:$0xff] %v970_v57  ;;  %v563_v46 = vld [vmem:[%s2665_s5 + $0xad0] sm:$0xff]  ;;  %v564_v47 = vld [vmem:[%s2665_s5 + $0xad8] sm:$0xff]  ;;  %v1000_v57 = vadd.f32 %v3627_v15, %v517_v20  ;;  %v1039_v5 = vadd.f32 %v3677_v48, %v556_v31  ;;  %v1041_v11 = vadd.f32 %v3677_v48, %v558_v37 }
 0x158   : > { %1339 = vst [vmem:[%s2735_s9 + $0x878] sm:$0xff] %v971_v58  ;;  %1372 = vst [vmem:[%s2735_s9 + $0x980] sm:$0xff] %v1004_v63  ;;  %v565_v53 = vld [vmem:[%s2665_s5 + $0xae0] sm:$0xff]  ;;  %v566_v54 = vld [vmem:[%s2665_s5 + $0xae8] sm:$0xff]  ;;  %v1001_v58 = vadd.f32 %v3627_v15, %v518_v21  ;;  %v1042_v12 = vadd.f32 %v3677_v48, %v559_v38  ;;  %v1043_v13 = vadd.f32 %v3677_v48, %v560_v39 }
 0x159   : > { %1373 = vst [vmem:[%s2735_s9 + $0x988] sm:$0xff] %v1005_v0  ;;  %1374 = vst [vmem:[%s2735_s9 + $0x990] sm:$0xff] %v1006_v1  ;;  %v567_v55 = vld [vmem:[%s2665_s5 + $0xaf0] sm:$0xff]  ;;  %v568_v56 = vld [vmem:[%s2665_s5 + $0xaf8] sm:$0xff]  ;;  %v3703_v1 = vpop.permute.xlu0 %687  ;;  %v1047_v20 = vadd.f32 %v3677_v48, %v564_v47 }
 0x15a   : > { %1375 = vst [vmem:[%s2735_s9 + $0x998] sm:$0xff] %v1007_v2  ;;  %1376 = vst [vmem:[%s2735_s9 + $0x9a0] sm:$0xff] %v1008_v7  ;;  %v537_v61 = vld [vmem:[%s2665_s5 + $0xa00] sm:$0xff]  ;;  %v538_v62 = vld [vmem:[%s2665_s5 + $0xa08] sm:$0xff]  ;;  %v1036_v2 = vadd.f32 %v3677_v48, %v553_v28 }
 0x15b   : > { %1377 = vst [vmem:[%s2735_s9 + $0x9a8] sm:$0xff] %v1009_v8  ;;  %1378 = vst [vmem:[%s2735_s9 + $0x9b0] sm:$0xff] %v1010_v9  ;;  %v539_v63 = vld [vmem:[%s2665_s5 + $0xa10] sm:$0xff]  ;;  %v540_v0 = vld [vmem:[%s2665_s5 + $0xa18] sm:$0xff]  ;;  %v1020_v31 = vadd.f32 %v3703_v1, %v537_v61 }
 0x15c   : > { %1379 = vst [vmem:[%s2735_s9 + $0x9b8] sm:$0xff] %v1011_v10  ;;  %1380 = vst [vmem:[%s2735_s9 + $0x9c0] sm:$0xff] %v1012_v16  ;;  %v541_v6 = vld [vmem:[%s2665_s5 + $0xa20] sm:$0xff]  ;;  %v542_v7 = vld [vmem:[%s2665_s5 + $0xa28] sm:$0xff]  ;;  %v1040_v10 = vadd.f32 %v3677_v48, %v557_v36 }
 0x15d   : > { %1381 = vst [vmem:[%s2735_s9 + $0x9c8] sm:$0xff] %v1013_v17  ;;  %1382 = vst [vmem:[%s2735_s9 + $0x9d0] sm:$0xff] %v1014_v18  ;;  %v543_v8 = vld [vmem:[%s2665_s5 + $0xa30] sm:$0xff]  ;;  %v544_v9 = vld [vmem:[%s2665_s5 + $0xa38] sm:$0xff]  ;;  %v1044_v17 = vadd.f32 %v3677_v48, %v561_v44  ;;  %v1045_v18 = vadd.f32 %v3677_v48, %v562_v45  ;;  %v1024_v38 = vadd.f32 %v3703_v1, %v541_v6  ;;  %v698_v45 = vpop.permute.xlu0 %697 }
 0x15e   : > { %1383 = vst [vmem:[%s2735_s9 + $0x9d8] sm:$0xff] %v1015_v19  ;;  %1384 = vst [vmem:[%s2735_s9 + $0x9e0] sm:$0xff] %v1016_v24  ;;  %v545_v14 = vld [vmem:[%s2665_s5 + $0xa40] sm:$0xff]  ;;  %v546_v15 = vld [vmem:[%s2665_s5 + $0xa48] sm:$0xff]  ;;  %v1046_v19 = vadd.f32 %v3677_v48, %v563_v46  ;;  %v1048_v24 = vadd.f32 %v3677_v48, %v565_v53  ;;  %v1025_v39 = vadd.f32 %v3703_v1, %v542_v7 }
 0x15f   : > { %1385 = vst [vmem:[%s2735_s9 + $0x9e8] sm:$0xff] %v1017_v25  ;;  %1386 = vst [vmem:[%s2735_s9 + $0x9f0] sm:$0xff] %v1018_v26  ;;  %v547_v16 = vld [vmem:[%s2665_s5 + $0xa50] sm:$0xff]  ;;  %v548_v21 = vld [vmem:[%s2665_s5 + $0xa58] sm:$0xff]  ;;  %v1049_v25 = vadd.f32 %v3677_v48, %v566_v54  ;;  %v1050_v26 = vadd.f32 %v3677_v48, %v567_v55  ;;  %v1028_v46 = vadd.f32 %v3703_v1, %v545_v14 }
 0x160   : > { %1387 = vst [vmem:[%s2735_s9 + $0x9f8] sm:$0xff] %v1019_v27  ;;  %1356 = vst [vmem:[%s2735_s9 + $0x900] sm:$0xff] %v988_v32  ;;  %v549_v22 = vld [vmem:[%s2665_s5 + $0xa60] sm:$0xff]  ;;  %v550_v23 = vld [vmem:[%s2665_s5 + $0xa68] sm:$0xff]  ;;  %v1051_v27 = vadd.f32 %v3677_v48, %v568_v56  ;;  %v1021_v32 = vadd.f32 %v3703_v1, %v538_v62  ;;  %v1029_v47 = vadd.f32 %v3703_v1, %v546_v15 }
 0x161   : > { %1357 = vst [vmem:[%s2735_s9 + $0x908] sm:$0xff] %v989_v33  ;;  %1358 = vst [vmem:[%s2735_s9 + $0x910] sm:$0xff] %v990_v34  ;;  %v551_v28 = vld [vmem:[%s2665_s5 + $0xa70] sm:$0xff]  ;;  %v552_v29 = vld [vmem:[%s2665_s5 + $0xa78] sm:$0xff]  ;;  %v1022_v33 = vadd.f32 %v3703_v1, %v539_v63  ;;  %v1023_v34 = vadd.f32 %v3703_v1, %v540_v0  ;;  %v1030_v48 = vadd.f32 %v3703_v1, %v547_v16 }
 0x162   : > { %1359 = vst [vmem:[%s2735_s9 + $0x918] sm:$0xff] %v991_v35  ;;  %1360 = vst [vmem:[%s2735_s9 + $0x920] sm:$0xff] %v992_v40  ;;  %v569_v30 = vld [vmem:[%s2665_s5 + $0xb00] sm:$0xf]  ;;  %v570_v35 = vld [vmem:[%s2665_s5 + $0xb08] sm:$0xf]  ;;  %v1026_v40 = vadd.f32 %v3703_v1, %v543_v8  ;;  %v1032_v53 = vadd.f32 %v3703_v1, %v549_v22  ;;  %v1033_v54 = vadd.f32 %v3703_v1, %v550_v23 }
 0x163   : > { %1361 = vst [vmem:[%s2735_s9 + $0x928] sm:$0xff] %v993_v41  ;;  %1362 = vst [vmem:[%s2735_s9 + $0x930] sm:$0xff] %v994_v42  ;;  %v571_v36 = vld [vmem:[%s2665_s5 + $0xb10] sm:$0xf]  ;;  %v572_v37 = vld [vmem:[%s2665_s5 + $0xb18] sm:$0xf]  ;;  %v1027_v41 = vadd.f32 %v3703_v1, %v544_v9  ;;  %v1034_v55 = vadd.f32 %v3703_v1, %v551_v28  ;;  %v1035_v56 = vadd.f32 %v3703_v1, %v552_v29 }
 0x164   : > { %1363 = vst [vmem:[%s2735_s9 + $0x938] sm:$0xff] %v995_v43  ;;  %1364 = vst [vmem:[%s2735_s9 + $0x940] sm:$0xff] %v996_v49  ;;  %v573_v42 = vld [vmem:[%s2665_s5 + $0xb20] sm:$0xf]  ;;  %v574_v43 = vld [vmem:[%s2665_s5 + $0xb28] sm:$0xf]  ;;  %v1031_v49 = vadd.f32 %v3703_v1, %v548_v21  ;;  %v1052_v63 = vadd.f32 %v698_v45, %v569_v30  ;;  %v1053_v0 = vadd.f32 %v698_v45, %v570_v35 }
 0x165   : > { %1365 = vst [vmem:[%s2735_s9 + $0x948] sm:$0xff] %v997_v50  ;;  %1366 = vst [vmem:[%s2735_s9 + $0x950] sm:$0xff] %v998_v51  ;;  %v575_v44 = vld [vmem:[%s2665_s5 + $0xb30] sm:$0xf]  ;;  %v576_v50 = vld [vmem:[%s2665_s5 + $0xb38] sm:$0xf]  ;;  %v1054_v1 = vadd.f32 %v698_v45, %v571_v36 }
 0x166   : > { %1367 = vst [vmem:[%s2735_s9 + $0x958] sm:$0xff] %v999_v52  ;;  %1368 = vst [vmem:[%s2735_s9 + $0x960] sm:$0xff] %v1000_v57  ;;  %v577_v51 = vld [vmem:[%s2665_s5 + $0xb40] sm:$0xf]  ;;  %v578_v52 = vld [vmem:[%s2665_s5 + $0xb48] sm:$0xf]  ;;  %v1059_v6 = vadd.f32 %v698_v45, %v576_v50 }
 0x167   : > { %1369 = vst [vmem:[%s2735_s9 + $0x968] sm:$0xff] %v1001_v58  ;;  %1370 = vst [vmem:[%s2735_s9 + $0x970] sm:$0xff] %v1002_v59  ;;  %v579_v57 = vld [vmem:[%s2665_s5 + $0xb50] sm:$0xf]  ;;  %v580_v58 = vld [vmem:[%s2665_s5 + $0xb58] sm:$0xf]  ;;  %v1060_v7 = vadd.f32 %v698_v45, %v577_v51  ;;  %v1061_v8 = vadd.f32 %v698_v45, %v578_v52 }
 0x168   : > { %1371 = vst [vmem:[%s2735_s9 + $0x978] sm:$0xff] %v1003_v60  ;;  %1404 = vst [vmem:[%s2735_s9 + $0xa80] sm:$0xff] %v1036_v2  ;;  %v581_v59 = vld [vmem:[%s2665_s5 + $0xb60] sm:$0xf]  ;;  %v582_v60 = vld [vmem:[%s2665_s5 + $0xb68] sm:$0xf]  ;;  %v1055_v2 = vadd.f32 %v698_v45, %v572_v37  ;;  %v1062_v9 = vadd.f32 %v698_v45, %v579_v57 }
 0x169   : > { %1405 = vst [vmem:[%s2735_s9 + $0xa88] sm:$0xff] %v1037_v3  ;;  %1406 = vst [vmem:[%s2735_s9 + $0xa90] sm:$0xff] %v1038_v4  ;;  %v583_v61 = vld [vmem:[%s2665_s5 + $0xb70] sm:$0xf]  ;;  %v584_v62 = vld [vmem:[%s2665_s5 + $0xb78] sm:$0xf]  ;;  %v1056_v3 = vadd.f32 %v698_v45, %v573_v42  ;;  %v1057_v4 = vadd.f32 %v698_v45, %v574_v43 }
 0x16a   : > { %1407 = vst [vmem:[%s2735_s9 + $0xa98] sm:$0xff] %v1039_v5  ;;  %1408 = vst [vmem:[%s2735_s9 + $0xaa0] sm:$0xff] %v1040_v10  ;;  %v1058_v5 = vadd.f32 %v698_v45, %v575_v44  ;;  %v1063_v10 = vadd.f32 %v698_v45, %v580_v58  ;;  %v1067_v14 = vadd.f32 %v698_v45, %v584_v62  ;;  %v1460_v15 = vld [vmem:[%s2735_s9] sm:$0xff] (%p4603_p7)  ;;  %v1462_v16 = vld [vmem:[%s2735_s9 + $0x8] sm:$0xff] (%p4603_p7) }
 0x16b   : > { %1409 = vst [vmem:[%s2735_s9 + $0xaa8] sm:$0xff] %v1041_v11  ;;  %1410 = vst [vmem:[%s2735_s9 + $0xab0] sm:$0xff] %v1042_v12  ;;  %v1064_v11 = vadd.f32 %v698_v45, %v581_v59  ;;  %v1065_v12 = vadd.f32 %v698_v45, %v582_v60  ;;  %v1472_v21 = vld [vmem:[%s2735_s9 + $0x30] sm:$0xff] (%p4603_p7)  ;;  %v1474_v22 = vld [vmem:[%s2735_s9 + $0x38] sm:$0xff] (%p4603_p7) }
 0x16c   : > { %1411 = vst [vmem:[%s2735_s9 + $0xab8] sm:$0xff] %v1043_v13  ;;  %1412 = vst [vmem:[%s2735_s9 + $0xac0] sm:$0xff] %v1044_v17  ;;  %v1066_v13 = vadd.f32 %v698_v45, %v583_v61  ;;  %v1464_v17 = vld [vmem:[%s2735_s9 + $0x10] sm:$0xff] (%p4603_p7)  ;;  %v1476_v23 = vld [vmem:[%s2735_s9 + $0x40] sm:$0xff] (%p4603_p7) }
 0x16d   : > { %1413 = vst [vmem:[%s2735_s9 + $0xac8] sm:$0xff] %v1045_v18  ;;  %1414 = vst [vmem:[%s2735_s9 + $0xad0] sm:$0xff] %v1046_v19  ;;  %v1466_v18 = vld [vmem:[%s2735_s9 + $0x18] sm:$0xff] (%p4603_p7)  ;;  %v1468_v19 = vld [vmem:[%s2735_s9 + $0x20] sm:$0xff] (%p4603_p7) }
 0x16e   : > { %1415 = vst [vmem:[%s2735_s9 + $0xad8] sm:$0xff] %v1047_v20  ;;  %1416 = vst [vmem:[%s2735_s9 + $0xae0] sm:$0xff] %v1048_v24  ;;  %v1470_v20 = vld [vmem:[%s2735_s9 + $0x28] sm:$0xff] (%p4603_p7)  ;;  %v1488_v29 = vld [vmem:[%s2735_s9 + $0x70] sm:$0xff] (%p4603_p7) }
 0x16f   : > { %1417 = vst [vmem:[%s2735_s9 + $0xae8] sm:$0xff] %v1049_v25  ;;  %1418 = vst [vmem:[%s2735_s9 + $0xaf0] sm:$0xff] %v1050_v26  ;;  %v1478_v24 = vld [vmem:[%s2735_s9 + $0x48] sm:$0xff] (%p4603_p7)  ;;  %v1480_v25 = vld [vmem:[%s2735_s9 + $0x50] sm:$0xff] (%p4603_p7) }
 0x170   : > { %1419 = vst [vmem:[%s2735_s9 + $0xaf8] sm:$0xff] %v1051_v27  ;;  %1388 = vst [vmem:[%s2735_s9 + $0xa00] sm:$0xff] %v1020_v31  ;;  %v1482_v26 = vld [vmem:[%s2735_s9 + $0x58] sm:$0xff] (%p4603_p7)  ;;  %v1484_v27 = vld [vmem:[%s2735_s9 + $0x60] sm:$0xff] (%p4603_p7) }
 0x171   : > { %1389 = vst [vmem:[%s2735_s9 + $0xa08] sm:$0xff] %v1021_v32  ;;  %1390 = vst [vmem:[%s2735_s9 + $0xa10] sm:$0xff] %v1022_v33  ;;  %v1486_v28 = vld [vmem:[%s2735_s9 + $0x68] sm:$0xff] (%p4603_p7)  ;;  %v1490_v30 = vld [vmem:[%s2735_s9 + $0x78] sm:$0xff] (%p4603_p7) }
 0x172   : > { %1391 = vst [vmem:[%s2735_s9 + $0xa18] sm:$0xff] %v1023_v34  ;;  %1392 = vst [vmem:[%s2735_s9 + $0xa20] sm:$0xff] %v1024_v38  ;;  %v1492_v31 = vld [vmem:[%s2735_s9 + $0x80] sm:$0xff] (%p4603_p7)  ;;  %v1494_v32 = vld [vmem:[%s2735_s9 + $0x88] sm:$0xff] (%p4603_p7) }
 0x173   : > { %1393 = vst [vmem:[%s2735_s9 + $0xa28] sm:$0xff] %v1025_v39  ;;  %1394 = vst [vmem:[%s2735_s9 + $0xa30] sm:$0xff] %v1026_v40  ;;  %v1496_v33 = vld [vmem:[%s2735_s9 + $0x90] sm:$0xff] (%p4603_p7)  ;;  %v1498_v34 = vld [vmem:[%s2735_s9 + $0x98] sm:$0xff] (%p4603_p7) }
 0x174   : > { %1395 = vst [vmem:[%s2735_s9 + $0xa38] sm:$0xff] %v1027_v41  ;;  %1396 = vst [vmem:[%s2735_s9 + $0xa40] sm:$0xff] %v1028_v46  ;;  %v1500_v35 = vld [vmem:[%s2735_s9 + $0xa0] sm:$0xff] (%p4603_p7)  ;;  %v1502_v36 = vld [vmem:[%s2735_s9 + $0xa8] sm:$0xff] (%p4603_p7) }
 0x175   : > { %1397 = vst [vmem:[%s2735_s9 + $0xa48] sm:$0xff] %v1029_v47  ;;  %1398 = vst [vmem:[%s2735_s9 + $0xa50] sm:$0xff] %v1030_v48  ;;  %v1504_v37 = vld [vmem:[%s2735_s9 + $0xb0] sm:$0xff] (%p4603_p7)  ;;  %v1506_v38 = vld [vmem:[%s2735_s9 + $0xb8] sm:$0xff] (%p4603_p7) }
 0x176   : > { %1399 = vst [vmem:[%s2735_s9 + $0xa58] sm:$0xff] %v1031_v49  ;;  %1400 = vst [vmem:[%s2735_s9 + $0xa60] sm:$0xff] %v1032_v53  ;;  %v1508_v39 = vld [vmem:[%s2735_s9 + $0xc0] sm:$0xff] (%p4603_p7)  ;;  %v1510_v40 = vld [vmem:[%s2735_s9 + $0xc8] sm:$0xff] (%p4603_p7) }
 0x177   : > { %1401 = vst [vmem:[%s2735_s9 + $0xa68] sm:$0xff] %v1033_v54  ;;  %1402 = vst [vmem:[%s2735_s9 + $0xa70] sm:$0xff] %v1034_v55  ;;  %v1512_v41 = vld [vmem:[%s2735_s9 + $0xd0] sm:$0xff] (%p4603_p7)  ;;  %v1514_v42 = vld [vmem:[%s2735_s9 + $0xd8] sm:$0xff] (%p4603_p7) }
 0x178   : > { %1403 = vst [vmem:[%s2735_s9 + $0xa78] sm:$0xff] %v1035_v56  ;;  %1420 = vst [vmem:[%s2735_s9 + $0xb00] sm:$0xf] %v1052_v63  ;;  %v1516_v43 = vld [vmem:[%s2735_s9 + $0xe0] sm:$0xff] (%p4603_p7)  ;;  %v1518_v44 = vld [vmem:[%s2735_s9 + $0xe8] sm:$0xff] (%p4603_p7) }
 0x179   : > { %1421 = vst [vmem:[%s2735_s9 + $0xb08] sm:$0xf] %v1053_v0  ;;  %1422 = vst [vmem:[%s2735_s9 + $0xb10] sm:$0xf] %v1054_v1  ;;  %v1520_v45 = vld [vmem:[%s2735_s9 + $0xf0] sm:$0xff] (%p4603_p7)  ;;  %v1522_v46 = vld [vmem:[%s2735_s9 + $0xf8] sm:$0xff] (%p4603_p7) }
 0x17a   : > { %1423 = vst [vmem:[%s2735_s9 + $0xb18] sm:$0xf] %v1055_v2  ;;  %1424 = vst [vmem:[%s2735_s9 + $0xb20] sm:$0xf] %v1056_v3  ;;  %1442 = sbr.rel (!%p4603_p7) target bundleno = 569 (0x239), region = 36  ;;  %v1524_v47 = vld [vmem:[%s2735_s9 + $0x100] sm:$0xff] (%p4603_p7) }
 0x17b   : > { %1425 = vst [vmem:[%s2735_s9 + $0xb28] sm:$0xf] %v1057_v4  ;;  %1426 = vst [vmem:[%s2735_s9 + $0xb30] sm:$0xf] %v1058_v5  ;;  %v1526_v48 = vld [vmem:[%s2735_s9 + $0x108] sm:$0xff] (%p4603_p7)  ;;  %v1528_v49 = vld [vmem:[%s2735_s9 + $0x110] sm:$0xff] (%p4603_p7) }
 0x17c   : > { %1427 = vst [vmem:[%s2735_s9 + $0xb38] sm:$0xf] %v1059_v6  ;;  %1428 = vst [vmem:[%s2735_s9 + $0xb40] sm:$0xf] %v1060_v7  ;;  %v1530_v50 = vld [vmem:[%s2735_s9 + $0x118] sm:$0xff] (%p4603_p7)  ;;  %v1532_v51 = vld [vmem:[%s2735_s9 + $0x120] sm:$0xff] (%p4603_p7) }
 0x17d   : > { %1429 = vst [vmem:[%s2735_s9 + $0xb48] sm:$0xf] %v1061_v8  ;;  %1430 = vst [vmem:[%s2735_s9 + $0xb50] sm:$0xf] %v1062_v9  ;;  %v1534_v52 = vld [vmem:[%s2735_s9 + $0x128] sm:$0xff] (%p4603_p7)  ;;  %v1536_v53 = vld [vmem:[%s2735_s9 + $0x130] sm:$0xff] (%p4603_p7) }
 0x17e   : > { %1431 = vst [vmem:[%s2735_s9 + $0xb58] sm:$0xf] %v1063_v10  ;;  %1432 = vst [vmem:[%s2735_s9 + $0xb60] sm:$0xf] %v1064_v11  ;;  %v1538_v54 = vld [vmem:[%s2735_s9 + $0x138] sm:$0xff] (%p4603_p7)  ;;  %v1540_v55 = vld [vmem:[%s2735_s9 + $0x140] sm:$0xff] (%p4603_p7) }
 0x17f   : > { %1433 = vst [vmem:[%s2735_s9 + $0xb68] sm:$0xf] %v1065_v12  ;;  %1434 = vst [vmem:[%s2735_s9 + $0xb70] sm:$0xf] %v1066_v13  ;;  %v1542_v56 = vld [vmem:[%s2735_s9 + $0x148] sm:$0xff] (%p4603_p7)  ;;  %v1544_v57 = vld [vmem:[%s2735_s9 + $0x150] sm:$0xff] (%p4603_p7) }
 0x180   : > { %1435 = vst [vmem:[%s2735_s9 + $0xb78] sm:$0xf] %v1067_v14  ;;  %1461 = vst [vmem:[%s3840_s14] sm:$0xff] (%p4603_p7), %v1460_v15  ;;  %v1546_v58 = vld [vmem:[%s2735_s9 + $0x158] sm:$0xff] (%p4603_p7)  ;;  %v1548_v59 = vld [vmem:[%s2735_s9 + $0x160] sm:$0xff] (%p4603_p7) }
 0x181   : > { %1463 = vst [vmem:[%s3840_s14 + $0x8] sm:$0xff] %v1462_v16  ;;  %1465 = vst [vmem:[%s3840_s14 + $0x10] sm:$0xff] %v1464_v17  ;;  %v1550_v60 = vld [vmem:[%s2735_s9 + $0x168] sm:$0xff]  ;;  %v1552_v61 = vld [vmem:[%s2735_s9 + $0x170] sm:$0xff] }
 0x182   : > { %1467 = vst [vmem:[%s3840_s14 + $0x18] sm:$0xff] %v1466_v18  ;;  %1469 = vst [vmem:[%s3840_s14 + $0x20] sm:$0xff] %v1468_v19  ;;  %v1554_v62 = vld [vmem:[%s2735_s9 + $0x178] sm:$0xff]  ;;  %v1556_v63 = vld [vmem:[%s2735_s9 + $0x180] sm:$0xff] }
 0x183   : > { %1471 = vst [vmem:[%s3840_s14 + $0x28] sm:$0xff] %v1470_v20  ;;  %1473 = vst [vmem:[%s3840_s14 + $0x30] sm:$0xff] %v1472_v21  ;;  %v1558_v0 = vld [vmem:[%s2735_s9 + $0x188] sm:$0xff]  ;;  %v1560_v1 = vld [vmem:[%s2735_s9 + $0x190] sm:$0xff] }
 0x184   : > { %1475 = vst [vmem:[%s3840_s14 + $0x38] sm:$0xff] %v1474_v22  ;;  %1477 = vst [vmem:[%s3840_s14 + $0x40] sm:$0xff] %v1476_v23  ;;  %v1562_v2 = vld [vmem:[%s2735_s9 + $0x198] sm:$0xff]  ;;  %v1564_v3 = vld [vmem:[%s2735_s9 + $0x1a0] sm:$0xff] }
 0x185   : > { %1479 = vst [vmem:[%s3840_s14 + $0x48] sm:$0xff] %v1478_v24  ;;  %1481 = vst [vmem:[%s3840_s14 + $0x50] sm:$0xff] %v1480_v25  ;;  %v1566_v4 = vld [vmem:[%s2735_s9 + $0x1a8] sm:$0xff]  ;;  %v1568_v5 = vld [vmem:[%s2735_s9 + $0x1b0] sm:$0xff] }
 0x186   : > { %1483 = vst [vmem:[%s3840_s14 + $0x58] sm:$0xff] %v1482_v26  ;;  %1485 = vst [vmem:[%s3840_s14 + $0x60] sm:$0xff] %v1484_v27  ;;  %v1570_v6 = vld [vmem:[%s2735_s9 + $0x1b8] sm:$0xff]  ;;  %v1572_v7 = vld [vmem:[%s2735_s9 + $0x1c0] sm:$0xff] }
 0x187   : > { %1487 = vst [vmem:[%s3840_s14 + $0x68] sm:$0xff] %v1486_v28  ;;  %1489 = vst [vmem:[%s3840_s14 + $0x70] sm:$0xff] %v1488_v29  ;;  %v1574_v8 = vld [vmem:[%s2735_s9 + $0x1c8] sm:$0xff]  ;;  %v1576_v9 = vld [vmem:[%s2735_s9 + $0x1d0] sm:$0xff] }
 0x188   : > { %1491 = vst [vmem:[%s3840_s14 + $0x78] sm:$0xff] %v1490_v30  ;;  %1493 = vst [vmem:[%s3840_s14 + $0x100] sm:$0xff] %v1492_v31  ;;  %v1578_v10 = vld [vmem:[%s2735_s9 + $0x1d8] sm:$0xff]  ;;  %v1580_v11 = vld [vmem:[%s2735_s9 + $0x1e0] sm:$0xff] }
 0x189   : > { %1495 = vst [vmem:[%s3840_s14 + $0x108] sm:$0xff] %v1494_v32  ;;  %1497 = vst [vmem:[%s3840_s14 + $0x110] sm:$0xff] %v1496_v33  ;;  %v1582_v12 = vld [vmem:[%s2735_s9 + $0x1e8] sm:$0xff]  ;;  %v1584_v13 = vld [vmem:[%s2735_s9 + $0x1f0] sm:$0xff] }
 0x18a   : > { %1499 = vst [vmem:[%s3840_s14 + $0x118] sm:$0xff] %v1498_v34  ;;  %1501 = vst [vmem:[%s3840_s14 + $0x120] sm:$0xff] %v1500_v35  ;;  %v1586_v14 = vld [vmem:[%s2735_s9 + $0x1f8] sm:$0xff]  ;;  %v1588_v15 = vld [vmem:[%s2735_s9 + $0x200] sm:$0xff] }
 0x18b   : > { %1503 = vst [vmem:[%s3840_s14 + $0x128] sm:$0xff] %v1502_v36  ;;  %1505 = vst [vmem:[%s3840_s14 + $0x130] sm:$0xff] %v1504_v37  ;;  %v1590_v16 = vld [vmem:[%s2735_s9 + $0x208] sm:$0xff]  ;;  %v1592_v17 = vld [vmem:[%s2735_s9 + $0x210] sm:$0xff] }
 0x18c   : > { %1507 = vst [vmem:[%s3840_s14 + $0x138] sm:$0xff] %v1506_v38  ;;  %1509 = vst [vmem:[%s3840_s14 + $0x140] sm:$0xff] %v1508_v39  ;;  %v1594_v18 = vld [vmem:[%s2735_s9 + $0x218] sm:$0xff]  ;;  %v1596_v19 = vld [vmem:[%s2735_s9 + $0x220] sm:$0xff] }
 0x18d   : > { %1511 = vst [vmem:[%s3840_s14 + $0x148] sm:$0xff] %v1510_v40  ;;  %1513 = vst [vmem:[%s3840_s14 + $0x150] sm:$0xff] %v1512_v41  ;;  %v1598_v20 = vld [vmem:[%s2735_s9 + $0x228] sm:$0xff]  ;;  %v1600_v21 = vld [vmem:[%s2735_s9 + $0x230] sm:$0xff] }
 0x18e   : > { %1515 = vst [vmem:[%s3840_s14 + $0x158] sm:$0xff] %v1514_v42  ;;  %1517 = vst [vmem:[%s3840_s14 + $0x160] sm:$0xff] %v1516_v43  ;;  %v1602_v22 = vld [vmem:[%s2735_s9 + $0x238] sm:$0xff]  ;;  %v1604_v23 = vld [vmem:[%s2735_s9 + $0x240] sm:$0xff] }
 0x18f   : > { %1519 = vst [vmem:[%s3840_s14 + $0x168] sm:$0xff] %v1518_v44  ;;  %1521 = vst [vmem:[%s3840_s14 + $0x170] sm:$0xff] %v1520_v45  ;;  %v1606_v24 = vld [vmem:[%s2735_s9 + $0x248] sm:$0xff]  ;;  %v1608_v25 = vld [vmem:[%s2735_s9 + $0x250] sm:$0xff] }
 0x190   : > { %1523 = vst [vmem:[%s3840_s14 + $0x178] sm:$0xff] %v1522_v46  ;;  %1525 = vst [vmem:[%s3840_s14 + $0x200] sm:$0xff] %v1524_v47  ;;  %v1610_v26 = vld [vmem:[%s2735_s9 + $0x258] sm:$0xff]  ;;  %v1612_v27 = vld [vmem:[%s2735_s9 + $0x260] sm:$0xff] }
 0x191   : > { %1527 = vst [vmem:[%s3840_s14 + $0x208] sm:$0xff] %v1526_v48  ;;  %1529 = vst [vmem:[%s3840_s14 + $0x210] sm:$0xff] %v1528_v49  ;;  %v1614_v28 = vld [vmem:[%s2735_s9 + $0x268] sm:$0xff]  ;;  %v1616_v29 = vld [vmem:[%s2735_s9 + $0x270] sm:$0xff] }
 0x192   : > { %1531 = vst [vmem:[%s3840_s14 + $0x218] sm:$0xff] %v1530_v50  ;;  %1533 = vst [vmem:[%s3840_s14 + $0x220] sm:$0xff] %v1532_v51  ;;  %v1618_v30 = vld [vmem:[%s2735_s9 + $0x278] sm:$0xff]  ;;  %v1620_v31 = vld [vmem:[%s2735_s9 + $0x280] sm:$0xff] }
 0x193   : > { %1535 = vst [vmem:[%s3840_s14 + $0x228] sm:$0xff] %v1534_v52  ;;  %1537 = vst [vmem:[%s3840_s14 + $0x230] sm:$0xff] %v1536_v53  ;;  %v1622_v32 = vld [vmem:[%s2735_s9 + $0x288] sm:$0xff]  ;;  %v1624_v33 = vld [vmem:[%s2735_s9 + $0x290] sm:$0xff] }
 0x194   : > { %1539 = vst [vmem:[%s3840_s14 + $0x238] sm:$0xff] %v1538_v54  ;;  %1541 = vst [vmem:[%s3840_s14 + $0x240] sm:$0xff] %v1540_v55  ;;  %v1626_v34 = vld [vmem:[%s2735_s9 + $0x298] sm:$0xff]  ;;  %v1628_v35 = vld [vmem:[%s2735_s9 + $0x2a0] sm:$0xff] }
 0x195   : > { %1543 = vst [vmem:[%s3840_s14 + $0x248] sm:$0xff] %v1542_v56  ;;  %1545 = vst [vmem:[%s3840_s14 + $0x250] sm:$0xff] %v1544_v57  ;;  %v1630_v36 = vld [vmem:[%s2735_s9 + $0x2a8] sm:$0xff]  ;;  %v1632_v37 = vld [vmem:[%s2735_s9 + $0x2b0] sm:$0xff] }
 0x196   : > { %1547 = vst [vmem:[%s3840_s14 + $0x258] sm:$0xff] %v1546_v58  ;;  %1549 = vst [vmem:[%s3840_s14 + $0x260] sm:$0xff] %v1548_v59  ;;  %v1634_v38 = vld [vmem:[%s2735_s9 + $0x2b8] sm:$0xff]  ;;  %v1636_v39 = vld [vmem:[%s2735_s9 + $0x2c0] sm:$0xff] }
 0x197   : > { %1551 = vst [vmem:[%s3840_s14 + $0x268] sm:$0xff] %v1550_v60  ;;  %1553 = vst [vmem:[%s3840_s14 + $0x270] sm:$0xff] %v1552_v61  ;;  %v1638_v40 = vld [vmem:[%s2735_s9 + $0x2c8] sm:$0xff]  ;;  %v1640_v41 = vld [vmem:[%s2735_s9 + $0x2d0] sm:$0xff] }
 0x198   : > { %1555 = vst [vmem:[%s3840_s14 + $0x278] sm:$0xff] %v1554_v62  ;;  %1557 = vst [vmem:[%s3840_s14 + $0x300] sm:$0xff] %v1556_v63  ;;  %v1642_v42 = vld [vmem:[%s2735_s9 + $0x2d8] sm:$0xff]  ;;  %v1644_v43 = vld [vmem:[%s2735_s9 + $0x2e0] sm:$0xff] }
 0x199   : > { %1559 = vst [vmem:[%s3840_s14 + $0x308] sm:$0xff] %v1558_v0  ;;  %1561 = vst [vmem:[%s3840_s14 + $0x310] sm:$0xff] %v1560_v1  ;;  %v1646_v44 = vld [vmem:[%s2735_s9 + $0x2e8] sm:$0xff]  ;;  %v1648_v45 = vld [vmem:[%s2735_s9 + $0x2f0] sm:$0xff] }
 0x19a   : > { %1563 = vst [vmem:[%s3840_s14 + $0x318] sm:$0xff] %v1562_v2  ;;  %1565 = vst [vmem:[%s3840_s14 + $0x320] sm:$0xff] %v1564_v3  ;;  %v1650_v46 = vld [vmem:[%s2735_s9 + $0x2f8] sm:$0xff]  ;;  %v1652_v47 = vld [vmem:[%s2735_s9 + $0x300] sm:$0xff] }
 0x19b   : > { %1567 = vst [vmem:[%s3840_s14 + $0x328] sm:$0xff] %v1566_v4  ;;  %1569 = vst [vmem:[%s3840_s14 + $0x330] sm:$0xff] %v1568_v5  ;;  %v1654_v48 = vld [vmem:[%s2735_s9 + $0x308] sm:$0xff]  ;;  %v1656_v49 = vld [vmem:[%s2735_s9 + $0x310] sm:$0xff] }
 0x19c   : > { %1571 = vst [vmem:[%s3840_s14 + $0x338] sm:$0xff] %v1570_v6  ;;  %1573 = vst [vmem:[%s3840_s14 + $0x340] sm:$0xff] %v1572_v7  ;;  %v1658_v50 = vld [vmem:[%s2735_s9 + $0x318] sm:$0xff]  ;;  %v1660_v51 = vld [vmem:[%s2735_s9 + $0x320] sm:$0xff] }
 0x19d   : > { %1575 = vst [vmem:[%s3840_s14 + $0x348] sm:$0xff] %v1574_v8  ;;  %1577 = vst [vmem:[%s3840_s14 + $0x350] sm:$0xff] %v1576_v9  ;;  %v1662_v52 = vld [vmem:[%s2735_s9 + $0x328] sm:$0xff]  ;;  %v1664_v53 = vld [vmem:[%s2735_s9 + $0x330] sm:$0xff] }
 0x19e   : > { %1579 = vst [vmem:[%s3840_s14 + $0x358] sm:$0xff] %v1578_v10  ;;  %1581 = vst [vmem:[%s3840_s14 + $0x360] sm:$0xff] %v1580_v11  ;;  %v1666_v54 = vld [vmem:[%s2735_s9 + $0x338] sm:$0xff]  ;;  %v1668_v55 = vld [vmem:[%s2735_s9 + $0x340] sm:$0xff] }
 0x19f   : > { %1583 = vst [vmem:[%s3840_s14 + $0x368] sm:$0xff] %v1582_v12  ;;  %1585 = vst [vmem:[%s3840_s14 + $0x370] sm:$0xff] %v1584_v13  ;;  %v1670_v56 = vld [vmem:[%s2735_s9 + $0x348] sm:$0xff]  ;;  %v1672_v57 = vld [vmem:[%s2735_s9 + $0x350] sm:$0xff] }
 0x1a0   : > { %1587 = vst [vmem:[%s3840_s14 + $0x378] sm:$0xff] %v1586_v14  ;;  %1589 = vst [vmem:[%s3840_s14 + $0x400] sm:$0xff] %v1588_v15  ;;  %v1674_v58 = vld [vmem:[%s2735_s9 + $0x358] sm:$0xff]  ;;  %v1676_v59 = vld [vmem:[%s2735_s9 + $0x360] sm:$0xff] }
 0x1a1   : > { %1591 = vst [vmem:[%s3840_s14 + $0x408] sm:$0xff] %v1590_v16  ;;  %1593 = vst [vmem:[%s3840_s14 + $0x410] sm:$0xff] %v1592_v17  ;;  %v1678_v60 = vld [vmem:[%s2735_s9 + $0x368] sm:$0xff]  ;;  %v1680_v61 = vld [vmem:[%s2735_s9 + $0x370] sm:$0xff] }
 0x1a2   : > { %1595 = vst [vmem:[%s3840_s14 + $0x418] sm:$0xff] %v1594_v18  ;;  %1597 = vst [vmem:[%s3840_s14 + $0x420] sm:$0xff] %v1596_v19  ;;  %v1682_v62 = vld [vmem:[%s2735_s9 + $0x378] sm:$0xff]  ;;  %v1684_v63 = vld [vmem:[%s2735_s9 + $0x380] sm:$0xff] }
 0x1a3   : > { %1599 = vst [vmem:[%s3840_s14 + $0x428] sm:$0xff] %v1598_v20  ;;  %1601 = vst [vmem:[%s3840_s14 + $0x430] sm:$0xff] %v1600_v21  ;;  %v1686_v0 = vld [vmem:[%s2735_s9 + $0x388] sm:$0xff]  ;;  %v1688_v1 = vld [vmem:[%s2735_s9 + $0x390] sm:$0xff] }
 0x1a4   : > { %1603 = vst [vmem:[%s3840_s14 + $0x438] sm:$0xff] %v1602_v22  ;;  %1605 = vst [vmem:[%s3840_s14 + $0x440] sm:$0xff] %v1604_v23  ;;  %v1690_v2 = vld [vmem:[%s2735_s9 + $0x398] sm:$0xff]  ;;  %v1692_v3 = vld [vmem:[%s2735_s9 + $0x3a0] sm:$0xff] }
 0x1a5   : > { %1607 = vst [vmem:[%s3840_s14 + $0x448] sm:$0xff] %v1606_v24  ;;  %1609 = vst [vmem:[%s3840_s14 + $0x450] sm:$0xff] %v1608_v25  ;;  %v1694_v4 = vld [vmem:[%s2735_s9 + $0x3a8] sm:$0xff]  ;;  %v1696_v5 = vld [vmem:[%s2735_s9 + $0x3b0] sm:$0xff] }
 0x1a6   : > { %1611 = vst [vmem:[%s3840_s14 + $0x458] sm:$0xff] %v1610_v26  ;;  %1613 = vst [vmem:[%s3840_s14 + $0x460] sm:$0xff] %v1612_v27  ;;  %v1698_v6 = vld [vmem:[%s2735_s9 + $0x3b8] sm:$0xff]  ;;  %v1700_v7 = vld [vmem:[%s2735_s9 + $0x3c0] sm:$0xff] }
 0x1a7   : > { %1615 = vst [vmem:[%s3840_s14 + $0x468] sm:$0xff] %v1614_v28  ;;  %1617 = vst [vmem:[%s3840_s14 + $0x470] sm:$0xff] %v1616_v29  ;;  %v1702_v8 = vld [vmem:[%s2735_s9 + $0x3c8] sm:$0xff]  ;;  %v1704_v9 = vld [vmem:[%s2735_s9 + $0x3d0] sm:$0xff] }
 0x1a8   : > { %1619 = vst [vmem:[%s3840_s14 + $0x478] sm:$0xff] %v1618_v30  ;;  %1621 = vst [vmem:[%s3840_s14 + $0x500] sm:$0xff] %v1620_v31  ;;  %v1706_v10 = vld [vmem:[%s2735_s9 + $0x3d8] sm:$0xff]  ;;  %v1708_v11 = vld [vmem:[%s2735_s9 + $0x3e0] sm:$0xff] }
 0x1a9   : > { %1623 = vst [vmem:[%s3840_s14 + $0x508] sm:$0xff] %v1622_v32  ;;  %1625 = vst [vmem:[%s3840_s14 + $0x510] sm:$0xff] %v1624_v33  ;;  %v1710_v12 = vld [vmem:[%s2735_s9 + $0x3e8] sm:$0xff]  ;;  %v1712_v13 = vld [vmem:[%s2735_s9 + $0x3f0] sm:$0xff] }
 0x1aa   : > { %1627 = vst [vmem:[%s3840_s14 + $0x518] sm:$0xff] %v1626_v34  ;;  %1629 = vst [vmem:[%s3840_s14 + $0x520] sm:$0xff] %v1628_v35  ;;  %v1714_v14 = vld [vmem:[%s2735_s9 + $0x3f8] sm:$0xff]  ;;  %v1716_v15 = vld [vmem:[%s2735_s9 + $0x400] sm:$0xff] }
 0x1ab   : > { %1631 = vst [vmem:[%s3840_s14 + $0x528] sm:$0xff] %v1630_v36  ;;  %1633 = vst [vmem:[%s3840_s14 + $0x530] sm:$0xff] %v1632_v37  ;;  %v1718_v16 = vld [vmem:[%s2735_s9 + $0x408] sm:$0xff]  ;;  %v1720_v17 = vld [vmem:[%s2735_s9 + $0x410] sm:$0xff] }
 0x1ac   : > { %1635 = vst [vmem:[%s3840_s14 + $0x538] sm:$0xff] %v1634_v38  ;;  %1637 = vst [vmem:[%s3840_s14 + $0x540] sm:$0xff] %v1636_v39  ;;  %v1722_v18 = vld [vmem:[%s2735_s9 + $0x418] sm:$0xff]  ;;  %v1724_v19 = vld [vmem:[%s2735_s9 + $0x420] sm:$0xff] }
 0x1ad   : > { %1639 = vst [vmem:[%s3840_s14 + $0x548] sm:$0xff] %v1638_v40  ;;  %1641 = vst [vmem:[%s3840_s14 + $0x550] sm:$0xff] %v1640_v41  ;;  %v1726_v20 = vld [vmem:[%s2735_s9 + $0x428] sm:$0xff]  ;;  %v1728_v21 = vld [vmem:[%s2735_s9 + $0x430] sm:$0xff] }
 0x1ae   : > { %1643 = vst [vmem:[%s3840_s14 + $0x558] sm:$0xff] %v1642_v42  ;;  %1645 = vst [vmem:[%s3840_s14 + $0x560] sm:$0xff] %v1644_v43  ;;  %v1730_v22 = vld [vmem:[%s2735_s9 + $0x438] sm:$0xff]  ;;  %v1732_v23 = vld [vmem:[%s2735_s9 + $0x440] sm:$0xff] }
 0x1af   : > { %1647 = vst [vmem:[%s3840_s14 + $0x568] sm:$0xff] %v1646_v44  ;;  %1649 = vst [vmem:[%s3840_s14 + $0x570] sm:$0xff] %v1648_v45  ;;  %v1734_v24 = vld [vmem:[%s2735_s9 + $0x448] sm:$0xff]  ;;  %v1736_v25 = vld [vmem:[%s2735_s9 + $0x450] sm:$0xff] }
 0x1b0   : > { %1651 = vst [vmem:[%s3840_s14 + $0x578] sm:$0xff] %v1650_v46  ;;  %1653 = vst [vmem:[%s3840_s14 + $0x600] sm:$0xff] %v1652_v47  ;;  %v1738_v26 = vld [vmem:[%s2735_s9 + $0x458] sm:$0xff]  ;;  %v1740_v27 = vld [vmem:[%s2735_s9 + $0x460] sm:$0xff] }
 0x1b1   : > { %1655 = vst [vmem:[%s3840_s14 + $0x608] sm:$0xff] %v1654_v48  ;;  %1657 = vst [vmem:[%s3840_s14 + $0x610] sm:$0xff] %v1656_v49  ;;  %v1742_v28 = vld [vmem:[%s2735_s9 + $0x468] sm:$0xff]  ;;  %v1744_v29 = vld [vmem:[%s2735_s9 + $0x470] sm:$0xff] }
 0x1b2   : > { %1659 = vst [vmem:[%s3840_s14 + $0x618] sm:$0xff] %v1658_v50  ;;  %1661 = vst [vmem:[%s3840_s14 + $0x620] sm:$0xff] %v1660_v51  ;;  %v1746_v30 = vld [vmem:[%s2735_s9 + $0x478] sm:$0xff]  ;;  %v1748_v31 = vld [vmem:[%s2735_s9 + $0x480] sm:$0xff] }
 0x1b3   : > { %1663 = vst [vmem:[%s3840_s14 + $0x628] sm:$0xff] %v1662_v52  ;;  %1665 = vst [vmem:[%s3840_s14 + $0x630] sm:$0xff] %v1664_v53  ;;  %v1750_v32 = vld [vmem:[%s2735_s9 + $0x488] sm:$0xff]  ;;  %v1752_v33 = vld [vmem:[%s2735_s9 + $0x490] sm:$0xff] }
 0x1b4   : > { %1667 = vst [vmem:[%s3840_s14 + $0x638] sm:$0xff] %v1666_v54  ;;  %1669 = vst [vmem:[%s3840_s14 + $0x640] sm:$0xff] %v1668_v55  ;;  %v1754_v34 = vld [vmem:[%s2735_s9 + $0x498] sm:$0xff]  ;;  %v1756_v35 = vld [vmem:[%s2735_s9 + $0x4a0] sm:$0xff] }
 0x1b5   : > { %1671 = vst [vmem:[%s3840_s14 + $0x648] sm:$0xff] %v1670_v56  ;;  %1673 = vst [vmem:[%s3840_s14 + $0x650] sm:$0xff] %v1672_v57  ;;  %v1758_v36 = vld [vmem:[%s2735_s9 + $0x4a8] sm:$0xff]  ;;  %v1760_v37 = vld [vmem:[%s2735_s9 + $0x4b0] sm:$0xff] }
 0x1b6   : > { %1675 = vst [vmem:[%s3840_s14 + $0x658] sm:$0xff] %v1674_v58  ;;  %1677 = vst [vmem:[%s3840_s14 + $0x660] sm:$0xff] %v1676_v59  ;;  %v1762_v38 = vld [vmem:[%s2735_s9 + $0x4b8] sm:$0xff]  ;;  %v1764_v39 = vld [vmem:[%s2735_s9 + $0x4c0] sm:$0xff] }
 0x1b7   : > { %1679 = vst [vmem:[%s3840_s14 + $0x668] sm:$0xff] %v1678_v60  ;;  %1681 = vst [vmem:[%s3840_s14 + $0x670] sm:$0xff] %v1680_v61  ;;  %v1766_v40 = vld [vmem:[%s2735_s9 + $0x4c8] sm:$0xff]  ;;  %v1768_v41 = vld [vmem:[%s2735_s9 + $0x4d0] sm:$0xff] }
 0x1b8   : > { %1683 = vst [vmem:[%s3840_s14 + $0x678] sm:$0xff] %v1682_v62  ;;  %1685 = vst [vmem:[%s3840_s14 + $0x700] sm:$0xff] %v1684_v63  ;;  %v1770_v42 = vld [vmem:[%s2735_s9 + $0x4d8] sm:$0xff]  ;;  %v1772_v43 = vld [vmem:[%s2735_s9 + $0x4e0] sm:$0xff] }
 0x1b9   : > { %1687 = vst [vmem:[%s3840_s14 + $0x708] sm:$0xff] %v1686_v0  ;;  %1689 = vst [vmem:[%s3840_s14 + $0x710] sm:$0xff] %v1688_v1  ;;  %v1774_v44 = vld [vmem:[%s2735_s9 + $0x4e8] sm:$0xff]  ;;  %v1776_v45 = vld [vmem:[%s2735_s9 + $0x4f0] sm:$0xff] }
 0x1ba   : > { %1691 = vst [vmem:[%s3840_s14 + $0x718] sm:$0xff] %v1690_v2  ;;  %1693 = vst [vmem:[%s3840_s14 + $0x720] sm:$0xff] %v1692_v3  ;;  %v1778_v46 = vld [vmem:[%s2735_s9 + $0x4f8] sm:$0xff]  ;;  %v1780_v47 = vld [vmem:[%s2735_s9 + $0x500] sm:$0xff] }
 0x1bb   : > { %1695 = vst [vmem:[%s3840_s14 + $0x728] sm:$0xff] %v1694_v4  ;;  %1697 = vst [vmem:[%s3840_s14 + $0x730] sm:$0xff] %v1696_v5  ;;  %v1782_v48 = vld [vmem:[%s2735_s9 + $0x508] sm:$0xff]  ;;  %v1784_v49 = vld [vmem:[%s2735_s9 + $0x510] sm:$0xff] }
 0x1bc   : > { %1699 = vst [vmem:[%s3840_s14 + $0x738] sm:$0xff] %v1698_v6  ;;  %1701 = vst [vmem:[%s3840_s14 + $0x740] sm:$0xff] %v1700_v7  ;;  %v1786_v50 = vld [vmem:[%s2735_s9 + $0x518] sm:$0xff]  ;;  %v1788_v51 = vld [vmem:[%s2735_s9 + $0x520] sm:$0xff] }
 0x1bd   : > { %1703 = vst [vmem:[%s3840_s14 + $0x748] sm:$0xff] %v1702_v8  ;;  %1705 = vst [vmem:[%s3840_s14 + $0x750] sm:$0xff] %v1704_v9  ;;  %v1790_v52 = vld [vmem:[%s2735_s9 + $0x528] sm:$0xff]  ;;  %v1792_v53 = vld [vmem:[%s2735_s9 + $0x530] sm:$0xff] }
 0x1be   : > { %1707 = vst [vmem:[%s3840_s14 + $0x758] sm:$0xff] %v1706_v10  ;;  %1709 = vst [vmem:[%s3840_s14 + $0x760] sm:$0xff] %v1708_v11  ;;  %v1794_v54 = vld [vmem:[%s2735_s9 + $0x538] sm:$0xff]  ;;  %v1796_v55 = vld [vmem:[%s2735_s9 + $0x540] sm:$0xff] }
 0x1bf   : > { %1711 = vst [vmem:[%s3840_s14 + $0x768] sm:$0xff] %v1710_v12  ;;  %1713 = vst [vmem:[%s3840_s14 + $0x770] sm:$0xff] %v1712_v13  ;;  %v1798_v56 = vld [vmem:[%s2735_s9 + $0x548] sm:$0xff]  ;;  %v1800_v57 = vld [vmem:[%s2735_s9 + $0x550] sm:$0xff] }
 0x1c0   : > { %1715 = vst [vmem:[%s3840_s14 + $0x778] sm:$0xff] %v1714_v14  ;;  %1717 = vst [vmem:[%s3840_s14 + $0x800] sm:$0xff] %v1716_v15  ;;  %v1802_v58 = vld [vmem:[%s2735_s9 + $0x558] sm:$0xff]  ;;  %v1804_v59 = vld [vmem:[%s2735_s9 + $0x560] sm:$0xff] }
 0x1c1   : > { %1719 = vst [vmem:[%s3840_s14 + $0x808] sm:$0xff] %v1718_v16  ;;  %1721 = vst [vmem:[%s3840_s14 + $0x810] sm:$0xff] %v1720_v17  ;;  %v1806_v60 = vld [vmem:[%s2735_s9 + $0x568] sm:$0xff]  ;;  %v1808_v61 = vld [vmem:[%s2735_s9 + $0x570] sm:$0xff] }
 0x1c2   : > { %1723 = vst [vmem:[%s3840_s14 + $0x818] sm:$0xff] %v1722_v18  ;;  %1725 = vst [vmem:[%s3840_s14 + $0x820] sm:$0xff] %v1724_v19  ;;  %v1810_v62 = vld [vmem:[%s2735_s9 + $0x578] sm:$0xff]  ;;  %v1812_v63 = vld [vmem:[%s2735_s9 + $0x580] sm:$0xff] }
 0x1c3   : > { %1727 = vst [vmem:[%s3840_s14 + $0x828] sm:$0xff] %v1726_v20  ;;  %1729 = vst [vmem:[%s3840_s14 + $0x830] sm:$0xff] %v1728_v21  ;;  %v1814_v0 = vld [vmem:[%s2735_s9 + $0x588] sm:$0xff]  ;;  %v1816_v1 = vld [vmem:[%s2735_s9 + $0x590] sm:$0xff] }
 0x1c4   : > { %1731 = vst [vmem:[%s3840_s14 + $0x838] sm:$0xff] %v1730_v22  ;;  %1733 = vst [vmem:[%s3840_s14 + $0x840] sm:$0xff] %v1732_v23  ;;  %v1818_v2 = vld [vmem:[%s2735_s9 + $0x598] sm:$0xff]  ;;  %v1820_v3 = vld [vmem:[%s2735_s9 + $0x5a0] sm:$0xff] }
 0x1c5   : > { %1735 = vst [vmem:[%s3840_s14 + $0x848] sm:$0xff] %v1734_v24  ;;  %1737 = vst [vmem:[%s3840_s14 + $0x850] sm:$0xff] %v1736_v25  ;;  %v1822_v4 = vld [vmem:[%s2735_s9 + $0x5a8] sm:$0xff]  ;;  %v1824_v5 = vld [vmem:[%s2735_s9 + $0x5b0] sm:$0xff] }
 0x1c6   : > { %1739 = vst [vmem:[%s3840_s14 + $0x858] sm:$0xff] %v1738_v26  ;;  %1741 = vst [vmem:[%s3840_s14 + $0x860] sm:$0xff] %v1740_v27  ;;  %v1826_v6 = vld [vmem:[%s2735_s9 + $0x5b8] sm:$0xff]  ;;  %v1828_v7 = vld [vmem:[%s2735_s9 + $0x5c0] sm:$0xff] }
 0x1c7   : > { %1743 = vst [vmem:[%s3840_s14 + $0x868] sm:$0xff] %v1742_v28  ;;  %1745 = vst [vmem:[%s3840_s14 + $0x870] sm:$0xff] %v1744_v29  ;;  %v1830_v8 = vld [vmem:[%s2735_s9 + $0x5c8] sm:$0xff]  ;;  %v1832_v9 = vld [vmem:[%s2735_s9 + $0x5d0] sm:$0xff] }
 0x1c8   : > { %1747 = vst [vmem:[%s3840_s14 + $0x878] sm:$0xff] %v1746_v30  ;;  %1749 = vst [vmem:[%s3840_s14 + $0x900] sm:$0xff] %v1748_v31  ;;  %v1834_v10 = vld [vmem:[%s2735_s9 + $0x5d8] sm:$0xff]  ;;  %v1836_v11 = vld [vmem:[%s2735_s9 + $0x5e0] sm:$0xff] }
 0x1c9   : > { %1751 = vst [vmem:[%s3840_s14 + $0x908] sm:$0xff] %v1750_v32  ;;  %1753 = vst [vmem:[%s3840_s14 + $0x910] sm:$0xff] %v1752_v33  ;;  %v1838_v12 = vld [vmem:[%s2735_s9 + $0x5e8] sm:$0xff]  ;;  %v1840_v13 = vld [vmem:[%s2735_s9 + $0x5f0] sm:$0xff] }
 0x1ca   : > { %1755 = vst [vmem:[%s3840_s14 + $0x918] sm:$0xff] %v1754_v34  ;;  %1757 = vst [vmem:[%s3840_s14 + $0x920] sm:$0xff] %v1756_v35  ;;  %v1842_v14 = vld [vmem:[%s2735_s9 + $0x5f8] sm:$0xff]  ;;  %v1844_v15 = vld [vmem:[%s2735_s9 + $0x600] sm:$0xff] }
 0x1cb   : > { %1759 = vst [vmem:[%s3840_s14 + $0x928] sm:$0xff] %v1758_v36  ;;  %1761 = vst [vmem:[%s3840_s14 + $0x930] sm:$0xff] %v1760_v37  ;;  %v1846_v16 = vld [vmem:[%s2735_s9 + $0x608] sm:$0xff]  ;;  %v1848_v17 = vld [vmem:[%s2735_s9 + $0x610] sm:$0xff] }
 0x1cc   : > { %1763 = vst [vmem:[%s3840_s14 + $0x938] sm:$0xff] %v1762_v38  ;;  %1765 = vst [vmem:[%s3840_s14 + $0x940] sm:$0xff] %v1764_v39  ;;  %v1850_v18 = vld [vmem:[%s2735_s9 + $0x618] sm:$0xff]  ;;  %v1852_v19 = vld [vmem:[%s2735_s9 + $0x620] sm:$0xff] }
 0x1cd   : > { %1767 = vst [vmem:[%s3840_s14 + $0x948] sm:$0xff] %v1766_v40  ;;  %1769 = vst [vmem:[%s3840_s14 + $0x950] sm:$0xff] %v1768_v41  ;;  %v1854_v20 = vld [vmem:[%s2735_s9 + $0x628] sm:$0xff]  ;;  %v1856_v21 = vld [vmem:[%s2735_s9 + $0x630] sm:$0xff] }
 0x1ce   : > { %1771 = vst [vmem:[%s3840_s14 + $0x958] sm:$0xff] %v1770_v42  ;;  %1773 = vst [vmem:[%s3840_s14 + $0x960] sm:$0xff] %v1772_v43  ;;  %v1858_v22 = vld [vmem:[%s2735_s9 + $0x638] sm:$0xff]  ;;  %v1860_v23 = vld [vmem:[%s2735_s9 + $0x640] sm:$0xff] }
 0x1cf   : > { %1775 = vst [vmem:[%s3840_s14 + $0x968] sm:$0xff] %v1774_v44  ;;  %1777 = vst [vmem:[%s3840_s14 + $0x970] sm:$0xff] %v1776_v45  ;;  %v1862_v24 = vld [vmem:[%s2735_s9 + $0x648] sm:$0xff]  ;;  %v1864_v25 = vld [vmem:[%s2735_s9 + $0x650] sm:$0xff] }
 0x1d0   : > { %1779 = vst [vmem:[%s3840_s14 + $0x978] sm:$0xff] %v1778_v46  ;;  %1781 = vst [vmem:[%s3840_s14 + $0xa00] sm:$0xff] %v1780_v47  ;;  %v1866_v26 = vld [vmem:[%s2735_s9 + $0x658] sm:$0xff]  ;;  %v1868_v27 = vld [vmem:[%s2735_s9 + $0x660] sm:$0xff] }
 0x1d1   : > { %1783 = vst [vmem:[%s3840_s14 + $0xa08] sm:$0xff] %v1782_v48  ;;  %1785 = vst [vmem:[%s3840_s14 + $0xa10] sm:$0xff] %v1784_v49  ;;  %v1870_v28 = vld [vmem:[%s2735_s9 + $0x668] sm:$0xff]  ;;  %v1872_v29 = vld [vmem:[%s2735_s9 + $0x670] sm:$0xff] }
 0x1d2   : > { %1787 = vst [vmem:[%s3840_s14 + $0xa18] sm:$0xff] %v1786_v50  ;;  %1789 = vst [vmem:[%s3840_s14 + $0xa20] sm:$0xff] %v1788_v51  ;;  %v1874_v30 = vld [vmem:[%s2735_s9 + $0x678] sm:$0xff]  ;;  %v1876_v31 = vld [vmem:[%s2735_s9 + $0x680] sm:$0xff] }
 0x1d3   : > { %1791 = vst [vmem:[%s3840_s14 + $0xa28] sm:$0xff] %v1790_v52  ;;  %1793 = vst [vmem:[%s3840_s14 + $0xa30] sm:$0xff] %v1792_v53  ;;  %v1878_v32 = vld [vmem:[%s2735_s9 + $0x688] sm:$0xff]  ;;  %v1880_v33 = vld [vmem:[%s2735_s9 + $0x690] sm:$0xff] }
 0x1d4   : > { %1795 = vst [vmem:[%s3840_s14 + $0xa38] sm:$0xff] %v1794_v54  ;;  %1797 = vst [vmem:[%s3840_s14 + $0xa40] sm:$0xff] %v1796_v55  ;;  %v1882_v34 = vld [vmem:[%s2735_s9 + $0x698] sm:$0xff]  ;;  %v1884_v35 = vld [vmem:[%s2735_s9 + $0x6a0] sm:$0xff] }
 0x1d5   : > { %1799 = vst [vmem:[%s3840_s14 + $0xa48] sm:$0xff] %v1798_v56  ;;  %1801 = vst [vmem:[%s3840_s14 + $0xa50] sm:$0xff] %v1800_v57  ;;  %v1886_v36 = vld [vmem:[%s2735_s9 + $0x6a8] sm:$0xff]  ;;  %v1888_v37 = vld [vmem:[%s2735_s9 + $0x6b0] sm:$0xff] }
 0x1d6   : > { %1803 = vst [vmem:[%s3840_s14 + $0xa58] sm:$0xff] %v1802_v58  ;;  %1805 = vst [vmem:[%s3840_s14 + $0xa60] sm:$0xff] %v1804_v59  ;;  %v1890_v38 = vld [vmem:[%s2735_s9 + $0x6b8] sm:$0xff]  ;;  %v1892_v39 = vld [vmem:[%s2735_s9 + $0x6c0] sm:$0xff] }
 0x1d7   : > { %1807 = vst [vmem:[%s3840_s14 + $0xa68] sm:$0xff] %v1806_v60  ;;  %1809 = vst [vmem:[%s3840_s14 + $0xa70] sm:$0xff] %v1808_v61  ;;  %v1894_v40 = vld [vmem:[%s2735_s9 + $0x6c8] sm:$0xff]  ;;  %v1896_v41 = vld [vmem:[%s2735_s9 + $0x6d0] sm:$0xff] }
 0x1d8   : > { %1811 = vst [vmem:[%s3840_s14 + $0xa78] sm:$0xff] %v1810_v62  ;;  %1813 = vst [vmem:[%s3840_s14 + $0xb00] sm:$0xff] %v1812_v63  ;;  %v1898_v42 = vld [vmem:[%s2735_s9 + $0x6d8] sm:$0xff]  ;;  %v1900_v43 = vld [vmem:[%s2735_s9 + $0x6e0] sm:$0xff] }
 0x1d9   : > { %1815 = vst [vmem:[%s3840_s14 + $0xb08] sm:$0xff] %v1814_v0  ;;  %1817 = vst [vmem:[%s3840_s14 + $0xb10] sm:$0xff] %v1816_v1  ;;  %v1902_v44 = vld [vmem:[%s2735_s9 + $0x6e8] sm:$0xff]  ;;  %v1904_v45 = vld [vmem:[%s2735_s9 + $0x6f0] sm:$0xff] }
 0x1da   : > { %1819 = vst [vmem:[%s3840_s14 + $0xb18] sm:$0xff] %v1818_v2  ;;  %1821 = vst [vmem:[%s3840_s14 + $0xb20] sm:$0xff] %v1820_v3  ;;  %v1906_v46 = vld [vmem:[%s2735_s9 + $0x6f8] sm:$0xff]  ;;  %v1908_v47 = vld [vmem:[%s2735_s9 + $0x700] sm:$0xff] }
 0x1db   : > { %1823 = vst [vmem:[%s3840_s14 + $0xb28] sm:$0xff] %v1822_v4  ;;  %1825 = vst [vmem:[%s3840_s14 + $0xb30] sm:$0xff] %v1824_v5  ;;  %v1910_v48 = vld [vmem:[%s2735_s9 + $0x708] sm:$0xff]  ;;  %v1912_v49 = vld [vmem:[%s2735_s9 + $0x710] sm:$0xff] }
 0x1dc   : > { %1827 = vst [vmem:[%s3840_s14 + $0xb38] sm:$0xff] %v1826_v6  ;;  %1829 = vst [vmem:[%s3840_s14 + $0xb40] sm:$0xff] %v1828_v7  ;;  %v1914_v50 = vld [vmem:[%s2735_s9 + $0x718] sm:$0xff]  ;;  %v1916_v51 = vld [vmem:[%s2735_s9 + $0x720] sm:$0xff] }
 0x1dd   : > { %1831 = vst [vmem:[%s3840_s14 + $0xb48] sm:$0xff] %v1830_v8  ;;  %1833 = vst [vmem:[%s3840_s14 + $0xb50] sm:$0xff] %v1832_v9  ;;  %v1918_v52 = vld [vmem:[%s2735_s9 + $0x728] sm:$0xff]  ;;  %v1920_v53 = vld [vmem:[%s2735_s9 + $0x730] sm:$0xff] }
 0x1de   : > { %1835 = vst [vmem:[%s3840_s14 + $0xb58] sm:$0xff] %v1834_v10  ;;  %1837 = vst [vmem:[%s3840_s14 + $0xb60] sm:$0xff] %v1836_v11  ;;  %v1922_v54 = vld [vmem:[%s2735_s9 + $0x738] sm:$0xff]  ;;  %v1924_v55 = vld [vmem:[%s2735_s9 + $0x740] sm:$0xff] }
 0x1df   : > { %1839 = vst [vmem:[%s3840_s14 + $0xb68] sm:$0xff] %v1838_v12  ;;  %1841 = vst [vmem:[%s3840_s14 + $0xb70] sm:$0xff] %v1840_v13  ;;  %v1926_v56 = vld [vmem:[%s2735_s9 + $0x748] sm:$0xff]  ;;  %v1928_v57 = vld [vmem:[%s2735_s9 + $0x750] sm:$0xff] }
 0x1e0   : > { %1843 = vst [vmem:[%s3840_s14 + $0xb78] sm:$0xff] %v1842_v14  ;;  %1845 = vst [vmem:[%s3840_s14 + $0xc00] sm:$0xff] %v1844_v15  ;;  %v1930_v58 = vld [vmem:[%s2735_s9 + $0x758] sm:$0xff]  ;;  %v1932_v59 = vld [vmem:[%s2735_s9 + $0x760] sm:$0xff] }
 0x1e1   : > { %1847 = vst [vmem:[%s3840_s14 + $0xc08] sm:$0xff] %v1846_v16  ;;  %1849 = vst [vmem:[%s3840_s14 + $0xc10] sm:$0xff] %v1848_v17  ;;  %v1934_v60 = vld [vmem:[%s2735_s9 + $0x768] sm:$0xff]  ;;  %v1936_v61 = vld [vmem:[%s2735_s9 + $0x770] sm:$0xff] }
 0x1e2   : > { %1851 = vst [vmem:[%s3840_s14 + $0xc18] sm:$0xff] %v1850_v18  ;;  %1853 = vst [vmem:[%s3840_s14 + $0xc20] sm:$0xff] %v1852_v19  ;;  %v1938_v62 = vld [vmem:[%s2735_s9 + $0x778] sm:$0xff]  ;;  %v1940_v63 = vld [vmem:[%s2735_s9 + $0x780] sm:$0xff] }
 0x1e3   : > { %1855 = vst [vmem:[%s3840_s14 + $0xc28] sm:$0xff] %v1854_v20  ;;  %1857 = vst [vmem:[%s3840_s14 + $0xc30] sm:$0xff] %v1856_v21  ;;  %v1942_v0 = vld [vmem:[%s2735_s9 + $0x788] sm:$0xff]  ;;  %v1944_v1 = vld [vmem:[%s2735_s9 + $0x790] sm:$0xff] }
 0x1e4   : > { %1859 = vst [vmem:[%s3840_s14 + $0xc38] sm:$0xff] %v1858_v22  ;;  %1861 = vst [vmem:[%s3840_s14 + $0xc40] sm:$0xff] %v1860_v23  ;;  %v1946_v2 = vld [vmem:[%s2735_s9 + $0x798] sm:$0xff]  ;;  %v1948_v3 = vld [vmem:[%s2735_s9 + $0x7a0] sm:$0xff] }
 0x1e5   : > { %1863 = vst [vmem:[%s3840_s14 + $0xc48] sm:$0xff] %v1862_v24  ;;  %1865 = vst [vmem:[%s3840_s14 + $0xc50] sm:$0xff] %v1864_v25  ;;  %v1950_v4 = vld [vmem:[%s2735_s9 + $0x7a8] sm:$0xff]  ;;  %v1952_v5 = vld [vmem:[%s2735_s9 + $0x7b0] sm:$0xff] }
 0x1e6   : > { %1867 = vst [vmem:[%s3840_s14 + $0xc58] sm:$0xff] %v1866_v26  ;;  %1869 = vst [vmem:[%s3840_s14 + $0xc60] sm:$0xff] %v1868_v27  ;;  %v1954_v6 = vld [vmem:[%s2735_s9 + $0x7b8] sm:$0xff]  ;;  %v1956_v7 = vld [vmem:[%s2735_s9 + $0x7c0] sm:$0xff] }
 0x1e7   : > { %1871 = vst [vmem:[%s3840_s14 + $0xc68] sm:$0xff] %v1870_v28  ;;  %1873 = vst [vmem:[%s3840_s14 + $0xc70] sm:$0xff] %v1872_v29  ;;  %v1958_v8 = vld [vmem:[%s2735_s9 + $0x7c8] sm:$0xff]  ;;  %v1960_v9 = vld [vmem:[%s2735_s9 + $0x7d0] sm:$0xff] }
 0x1e8   : > { %1875 = vst [vmem:[%s3840_s14 + $0xc78] sm:$0xff] %v1874_v30  ;;  %1877 = vst [vmem:[%s3840_s14 + $0xd00] sm:$0xff] %v1876_v31  ;;  %v1962_v10 = vld [vmem:[%s2735_s9 + $0x7d8] sm:$0xff]  ;;  %v1964_v11 = vld [vmem:[%s2735_s9 + $0x7e0] sm:$0xff] }
 0x1e9   : > { %1879 = vst [vmem:[%s3840_s14 + $0xd08] sm:$0xff] %v1878_v32  ;;  %1881 = vst [vmem:[%s3840_s14 + $0xd10] sm:$0xff] %v1880_v33  ;;  %v1966_v12 = vld [vmem:[%s2735_s9 + $0x7e8] sm:$0xff]  ;;  %v1968_v13 = vld [vmem:[%s2735_s9 + $0x7f0] sm:$0xff] }
 0x1ea   : > { %1883 = vst [vmem:[%s3840_s14 + $0xd18] sm:$0xff] %v1882_v34  ;;  %1885 = vst [vmem:[%s3840_s14 + $0xd20] sm:$0xff] %v1884_v35  ;;  %v1970_v14 = vld [vmem:[%s2735_s9 + $0x7f8] sm:$0xff]  ;;  %v1972_v15 = vld [vmem:[%s2735_s9 + $0x800] sm:$0xff] }
 0x1eb   : > { %1887 = vst [vmem:[%s3840_s14 + $0xd28] sm:$0xff] %v1886_v36  ;;  %1889 = vst [vmem:[%s3840_s14 + $0xd30] sm:$0xff] %v1888_v37  ;;  %v1974_v16 = vld [vmem:[%s2735_s9 + $0x808] sm:$0xff]  ;;  %v1976_v17 = vld [vmem:[%s2735_s9 + $0x810] sm:$0xff] }
 0x1ec   : > { %1891 = vst [vmem:[%s3840_s14 + $0xd38] sm:$0xff] %v1890_v38  ;;  %1893 = vst [vmem:[%s3840_s14 + $0xd40] sm:$0xff] %v1892_v39  ;;  %v1978_v18 = vld [vmem:[%s2735_s9 + $0x818] sm:$0xff]  ;;  %v1980_v19 = vld [vmem:[%s2735_s9 + $0x820] sm:$0xff] }
 0x1ed   : > { %1895 = vst [vmem:[%s3840_s14 + $0xd48] sm:$0xff] %v1894_v40  ;;  %1897 = vst [vmem:[%s3840_s14 + $0xd50] sm:$0xff] %v1896_v41  ;;  %v1982_v20 = vld [vmem:[%s2735_s9 + $0x828] sm:$0xff]  ;;  %v1984_v21 = vld [vmem:[%s2735_s9 + $0x830] sm:$0xff] }
 0x1ee   : > { %1899 = vst [vmem:[%s3840_s14 + $0xd58] sm:$0xff] %v1898_v42  ;;  %1901 = vst [vmem:[%s3840_s14 + $0xd60] sm:$0xff] %v1900_v43  ;;  %v1986_v22 = vld [vmem:[%s2735_s9 + $0x838] sm:$0xff]  ;;  %v1988_v23 = vld [vmem:[%s2735_s9 + $0x840] sm:$0xff] }
 0x1ef   : > { %1903 = vst [vmem:[%s3840_s14 + $0xd68] sm:$0xff] %v1902_v44  ;;  %1905 = vst [vmem:[%s3840_s14 + $0xd70] sm:$0xff] %v1904_v45  ;;  %v1990_v24 = vld [vmem:[%s2735_s9 + $0x848] sm:$0xff]  ;;  %v1992_v25 = vld [vmem:[%s2735_s9 + $0x850] sm:$0xff] }
 0x1f0   : > { %1907 = vst [vmem:[%s3840_s14 + $0xd78] sm:$0xff] %v1906_v46  ;;  %1909 = vst [vmem:[%s3840_s14 + $0xe00] sm:$0xff] %v1908_v47  ;;  %v1994_v26 = vld [vmem:[%s2735_s9 + $0x858] sm:$0xff]  ;;  %v1996_v27 = vld [vmem:[%s2735_s9 + $0x860] sm:$0xff] }
 0x1f1   : > { %1911 = vst [vmem:[%s3840_s14 + $0xe08] sm:$0xff] %v1910_v48  ;;  %1913 = vst [vmem:[%s3840_s14 + $0xe10] sm:$0xff] %v1912_v49  ;;  %v1998_v28 = vld [vmem:[%s2735_s9 + $0x868] sm:$0xff]  ;;  %v2000_v29 = vld [vmem:[%s2735_s9 + $0x870] sm:$0xff] }
 0x1f2   : > { %1915 = vst [vmem:[%s3840_s14 + $0xe18] sm:$0xff] %v1914_v50  ;;  %1917 = vst [vmem:[%s3840_s14 + $0xe20] sm:$0xff] %v1916_v51  ;;  %v2002_v30 = vld [vmem:[%s2735_s9 + $0x878] sm:$0xff]  ;;  %v2004_v31 = vld [vmem:[%s2735_s9 + $0x880] sm:$0xff] }
 0x1f3   : > { %1919 = vst [vmem:[%s3840_s14 + $0xe28] sm:$0xff] %v1918_v52  ;;  %1921 = vst [vmem:[%s3840_s14 + $0xe30] sm:$0xff] %v1920_v53  ;;  %v2006_v32 = vld [vmem:[%s2735_s9 + $0x888] sm:$0xff]  ;;  %v2008_v33 = vld [vmem:[%s2735_s9 + $0x890] sm:$0xff] }
 0x1f4   : > { %1923 = vst [vmem:[%s3840_s14 + $0xe38] sm:$0xff] %v1922_v54  ;;  %1925 = vst [vmem:[%s3840_s14 + $0xe40] sm:$0xff] %v1924_v55  ;;  %v2010_v34 = vld [vmem:[%s2735_s9 + $0x898] sm:$0xff]  ;;  %v2012_v35 = vld [vmem:[%s2735_s9 + $0x8a0] sm:$0xff] }
 0x1f5   : > { %1927 = vst [vmem:[%s3840_s14 + $0xe48] sm:$0xff] %v1926_v56  ;;  %1929 = vst [vmem:[%s3840_s14 + $0xe50] sm:$0xff] %v1928_v57  ;;  %v2014_v36 = vld [vmem:[%s2735_s9 + $0x8a8] sm:$0xff]  ;;  %v2016_v37 = vld [vmem:[%s2735_s9 + $0x8b0] sm:$0xff] }
 0x1f6   : > { %1931 = vst [vmem:[%s3840_s14 + $0xe58] sm:$0xff] %v1930_v58  ;;  %1933 = vst [vmem:[%s3840_s14 + $0xe60] sm:$0xff] %v1932_v59  ;;  %v2018_v38 = vld [vmem:[%s2735_s9 + $0x8b8] sm:$0xff]  ;;  %v2020_v39 = vld [vmem:[%s2735_s9 + $0x8c0] sm:$0xff] }
 0x1f7   : > { %1935 = vst [vmem:[%s3840_s14 + $0xe68] sm:$0xff] %v1934_v60  ;;  %1937 = vst [vmem:[%s3840_s14 + $0xe70] sm:$0xff] %v1936_v61  ;;  %v2022_v40 = vld [vmem:[%s2735_s9 + $0x8c8] sm:$0xff]  ;;  %v2024_v41 = vld [vmem:[%s2735_s9 + $0x8d0] sm:$0xff] }
 0x1f8   : > { %1939 = vst [vmem:[%s3840_s14 + $0xe78] sm:$0xff] %v1938_v62  ;;  %1941 = vst [vmem:[%s3840_s14 + $0xf00] sm:$0xff] %v1940_v63  ;;  %v2026_v42 = vld [vmem:[%s2735_s9 + $0x8d8] sm:$0xff]  ;;  %v2028_v43 = vld [vmem:[%s2735_s9 + $0x8e0] sm:$0xff] }
 0x1f9   : > { %1943 = vst [vmem:[%s3840_s14 + $0xf08] sm:$0xff] %v1942_v0  ;;  %1945 = vst [vmem:[%s3840_s14 + $0xf10] sm:$0xff] %v1944_v1  ;;  %v2030_v44 = vld [vmem:[%s2735_s9 + $0x8e8] sm:$0xff]  ;;  %v2032_v45 = vld [vmem:[%s2735_s9 + $0x8f0] sm:$0xff] }
 0x1fa   : > { %1947 = vst [vmem:[%s3840_s14 + $0xf18] sm:$0xff] %v1946_v2  ;;  %1949 = vst [vmem:[%s3840_s14 + $0xf20] sm:$0xff] %v1948_v3  ;;  %v2034_v46 = vld [vmem:[%s2735_s9 + $0x8f8] sm:$0xff]  ;;  %v2036_v47 = vld [vmem:[%s2735_s9 + $0x900] sm:$0xff] }
 0x1fb   : > { %1951 = vst [vmem:[%s3840_s14 + $0xf28] sm:$0xff] %v1950_v4  ;;  %1953 = vst [vmem:[%s3840_s14 + $0xf30] sm:$0xff] %v1952_v5  ;;  %v2038_v48 = vld [vmem:[%s2735_s9 + $0x908] sm:$0xff]  ;;  %v2040_v49 = vld [vmem:[%s2735_s9 + $0x910] sm:$0xff] }
 0x1fc   : > { %1955 = vst [vmem:[%s3840_s14 + $0xf38] sm:$0xff] %v1954_v6  ;;  %1957 = vst [vmem:[%s3840_s14 + $0xf40] sm:$0xff] %v1956_v7  ;;  %v2042_v50 = vld [vmem:[%s2735_s9 + $0x918] sm:$0xff]  ;;  %v2044_v51 = vld [vmem:[%s2735_s9 + $0x920] sm:$0xff] }
 0x1fd   : > { %1959 = vst [vmem:[%s3840_s14 + $0xf48] sm:$0xff] %v1958_v8  ;;  %1961 = vst [vmem:[%s3840_s14 + $0xf50] sm:$0xff] %v1960_v9  ;;  %v2046_v52 = vld [vmem:[%s2735_s9 + $0x928] sm:$0xff]  ;;  %v2048_v53 = vld [vmem:[%s2735_s9 + $0x930] sm:$0xff] }
 0x1fe   : > { %1963 = vst [vmem:[%s3840_s14 + $0xf58] sm:$0xff] %v1962_v10  ;;  %1965 = vst [vmem:[%s3840_s14 + $0xf60] sm:$0xff] %v1964_v11  ;;  %v2050_v54 = vld [vmem:[%s2735_s9 + $0x938] sm:$0xff]  ;;  %v2052_v55 = vld [vmem:[%s2735_s9 + $0x940] sm:$0xff] }
 0x1ff   : > { %1967 = vst [vmem:[%s3840_s14 + $0xf68] sm:$0xff] %v1966_v12  ;;  %1969 = vst [vmem:[%s3840_s14 + $0xf70] sm:$0xff] %v1968_v13  ;;  %v2054_v56 = vld [vmem:[%s2735_s9 + $0x948] sm:$0xff]  ;;  %v2056_v57 = vld [vmem:[%s2735_s9 + $0x950] sm:$0xff] }
 0x200   : > { %1971 = vst [vmem:[%s3840_s14 + $0xf78] sm:$0xff] %v1970_v14  ;;  %1973 = vst [vmem:[%s3840_s14 + $0x1000] sm:$0xff] %v1972_v15  ;;  %v2058_v58 = vld [vmem:[%s2735_s9 + $0x958] sm:$0xff]  ;;  %v2060_v59 = vld [vmem:[%s2735_s9 + $0x960] sm:$0xff] }
 0x201   : > { %1975 = vst [vmem:[%s3840_s14 + $0x1008] sm:$0xff] %v1974_v16  ;;  %1977 = vst [vmem:[%s3840_s14 + $0x1010] sm:$0xff] %v1976_v17  ;;  %v2062_v60 = vld [vmem:[%s2735_s9 + $0x968] sm:$0xff]  ;;  %v2064_v61 = vld [vmem:[%s2735_s9 + $0x970] sm:$0xff] }
 0x202   : > { %1979 = vst [vmem:[%s3840_s14 + $0x1018] sm:$0xff] %v1978_v18  ;;  %1981 = vst [vmem:[%s3840_s14 + $0x1020] sm:$0xff] %v1980_v19  ;;  %v2066_v62 = vld [vmem:[%s2735_s9 + $0x978] sm:$0xff]  ;;  %v2068_v63 = vld [vmem:[%s2735_s9 + $0x980] sm:$0xff] }
 0x203   : > { %1983 = vst [vmem:[%s3840_s14 + $0x1028] sm:$0xff] %v1982_v20  ;;  %1985 = vst [vmem:[%s3840_s14 + $0x1030] sm:$0xff] %v1984_v21  ;;  %v2070_v0 = vld [vmem:[%s2735_s9 + $0x988] sm:$0xff]  ;;  %v2072_v1 = vld [vmem:[%s2735_s9 + $0x990] sm:$0xff] }
 0x204   : > { %1987 = vst [vmem:[%s3840_s14 + $0x1038] sm:$0xff] %v1986_v22  ;;  %1989 = vst [vmem:[%s3840_s14 + $0x1040] sm:$0xff] %v1988_v23  ;;  %v2074_v2 = vld [vmem:[%s2735_s9 + $0x998] sm:$0xff]  ;;  %v2076_v3 = vld [vmem:[%s2735_s9 + $0x9a0] sm:$0xff] }
 0x205   : > { %1991 = vst [vmem:[%s3840_s14 + $0x1048] sm:$0xff] %v1990_v24  ;;  %1993 = vst [vmem:[%s3840_s14 + $0x1050] sm:$0xff] %v1992_v25  ;;  %v2078_v4 = vld [vmem:[%s2735_s9 + $0x9a8] sm:$0xff]  ;;  %v2080_v5 = vld [vmem:[%s2735_s9 + $0x9b0] sm:$0xff] }
 0x206   : > { %1995 = vst [vmem:[%s3840_s14 + $0x1058] sm:$0xff] %v1994_v26  ;;  %1997 = vst [vmem:[%s3840_s14 + $0x1060] sm:$0xff] %v1996_v27  ;;  %v2082_v6 = vld [vmem:[%s2735_s9 + $0x9b8] sm:$0xff]  ;;  %v2084_v7 = vld [vmem:[%s2735_s9 + $0x9c0] sm:$0xff] }
 0x207   : > { %1999 = vst [vmem:[%s3840_s14 + $0x1068] sm:$0xff] %v1998_v28  ;;  %2001 = vst [vmem:[%s3840_s14 + $0x1070] sm:$0xff] %v2000_v29  ;;  %v2086_v8 = vld [vmem:[%s2735_s9 + $0x9c8] sm:$0xff]  ;;  %v2088_v9 = vld [vmem:[%s2735_s9 + $0x9d0] sm:$0xff] }
 0x208   : > { %2003 = vst [vmem:[%s3840_s14 + $0x1078] sm:$0xff] %v2002_v30  ;;  %2005 = vst [vmem:[%s3840_s14 + $0x1100] sm:$0xff] %v2004_v31  ;;  %v2090_v10 = vld [vmem:[%s2735_s9 + $0x9d8] sm:$0xff]  ;;  %v2092_v11 = vld [vmem:[%s2735_s9 + $0x9e0] sm:$0xff] }
 0x209   : > { %2007 = vst [vmem:[%s3840_s14 + $0x1108] sm:$0xff] %v2006_v32  ;;  %2009 = vst [vmem:[%s3840_s14 + $0x1110] sm:$0xff] %v2008_v33  ;;  %v2094_v12 = vld [vmem:[%s2735_s9 + $0x9e8] sm:$0xff]  ;;  %v2096_v13 = vld [vmem:[%s2735_s9 + $0x9f0] sm:$0xff] }
 0x20a   : > { %2011 = vst [vmem:[%s3840_s14 + $0x1118] sm:$0xff] %v2010_v34  ;;  %2013 = vst [vmem:[%s3840_s14 + $0x1120] sm:$0xff] %v2012_v35  ;;  %v2098_v14 = vld [vmem:[%s2735_s9 + $0x9f8] sm:$0xff]  ;;  %v2100_v15 = vld [vmem:[%s2735_s9 + $0xa00] sm:$0xff] }
 0x20b   : > { %2015 = vst [vmem:[%s3840_s14 + $0x1128] sm:$0xff] %v2014_v36  ;;  %2017 = vst [vmem:[%s3840_s14 + $0x1130] sm:$0xff] %v2016_v37  ;;  %v2102_v16 = vld [vmem:[%s2735_s9 + $0xa08] sm:$0xff]  ;;  %v2104_v17 = vld [vmem:[%s2735_s9 + $0xa10] sm:$0xff] }
 0x20c   : > { %2019 = vst [vmem:[%s3840_s14 + $0x1138] sm:$0xff] %v2018_v38  ;;  %2021 = vst [vmem:[%s3840_s14 + $0x1140] sm:$0xff] %v2020_v39  ;;  %v2106_v18 = vld [vmem:[%s2735_s9 + $0xa18] sm:$0xff]  ;;  %v2108_v19 = vld [vmem:[%s2735_s9 + $0xa20] sm:$0xff] }
 0x20d   : > { %2023 = vst [vmem:[%s3840_s14 + $0x1148] sm:$0xff] %v2022_v40  ;;  %2025 = vst [vmem:[%s3840_s14 + $0x1150] sm:$0xff] %v2024_v41  ;;  %v2110_v20 = vld [vmem:[%s2735_s9 + $0xa28] sm:$0xff]  ;;  %v2112_v21 = vld [vmem:[%s2735_s9 + $0xa30] sm:$0xff] }
 0x20e   : > { %2027 = vst [vmem:[%s3840_s14 + $0x1158] sm:$0xff] %v2026_v42  ;;  %2029 = vst [vmem:[%s3840_s14 + $0x1160] sm:$0xff] %v2028_v43  ;;  %v2114_v22 = vld [vmem:[%s2735_s9 + $0xa38] sm:$0xff]  ;;  %v2116_v23 = vld [vmem:[%s2735_s9 + $0xa40] sm:$0xff] }
 0x20f   : > { %2031 = vst [vmem:[%s3840_s14 + $0x1168] sm:$0xff] %v2030_v44  ;;  %2033 = vst [vmem:[%s3840_s14 + $0x1170] sm:$0xff] %v2032_v45  ;;  %v2118_v24 = vld [vmem:[%s2735_s9 + $0xa48] sm:$0xff]  ;;  %v2120_v25 = vld [vmem:[%s2735_s9 + $0xa50] sm:$0xff] }
 0x210   : > { %2035 = vst [vmem:[%s3840_s14 + $0x1178] sm:$0xff] %v2034_v46  ;;  %2037 = vst [vmem:[%s3840_s14 + $0x1200] sm:$0xff] %v2036_v47  ;;  %v2122_v26 = vld [vmem:[%s2735_s9 + $0xa58] sm:$0xff]  ;;  %v2124_v27 = vld [vmem:[%s2735_s9 + $0xa60] sm:$0xff] }
 0x211   : > { %2039 = vst [vmem:[%s3840_s14 + $0x1208] sm:$0xff] %v2038_v48  ;;  %2041 = vst [vmem:[%s3840_s14 + $0x1210] sm:$0xff] %v2040_v49  ;;  %v2126_v28 = vld [vmem:[%s2735_s9 + $0xa68] sm:$0xff]  ;;  %v2128_v29 = vld [vmem:[%s2735_s9 + $0xa70] sm:$0xff] }
 0x212   : > { %2043 = vst [vmem:[%s3840_s14 + $0x1218] sm:$0xff] %v2042_v50  ;;  %2045 = vst [vmem:[%s3840_s14 + $0x1220] sm:$0xff] %v2044_v51  ;;  %v2130_v30 = vld [vmem:[%s2735_s9 + $0xa78] sm:$0xff]  ;;  %v2132_v31 = vld [vmem:[%s2735_s9 + $0xa80] sm:$0xff] }
 0x213   : > { %2047 = vst [vmem:[%s3840_s14 + $0x1228] sm:$0xff] %v2046_v52  ;;  %2049 = vst [vmem:[%s3840_s14 + $0x1230] sm:$0xff] %v2048_v53  ;;  %v2134_v32 = vld [vmem:[%s2735_s9 + $0xa88] sm:$0xff]  ;;  %v2136_v33 = vld [vmem:[%s2735_s9 + $0xa90] sm:$0xff] }
 0x214   : > { %2051 = vst [vmem:[%s3840_s14 + $0x1238] sm:$0xff] %v2050_v54  ;;  %2053 = vst [vmem:[%s3840_s14 + $0x1240] sm:$0xff] %v2052_v55  ;;  %v2138_v34 = vld [vmem:[%s2735_s9 + $0xa98] sm:$0xff]  ;;  %v2140_v35 = vld [vmem:[%s2735_s9 + $0xaa0] sm:$0xff] }
 0x215   : > { %2055 = vst [vmem:[%s3840_s14 + $0x1248] sm:$0xff] %v2054_v56  ;;  %2057 = vst [vmem:[%s3840_s14 + $0x1250] sm:$0xff] %v2056_v57  ;;  %v2142_v36 = vld [vmem:[%s2735_s9 + $0xaa8] sm:$0xff]  ;;  %v2144_v37 = vld [vmem:[%s2735_s9 + $0xab0] sm:$0xff] }
 0x216   : > { %2059 = vst [vmem:[%s3840_s14 + $0x1258] sm:$0xff] %v2058_v58  ;;  %2061 = vst [vmem:[%s3840_s14 + $0x1260] sm:$0xff] %v2060_v59  ;;  %v2146_v38 = vld [vmem:[%s2735_s9 + $0xab8] sm:$0xff]  ;;  %v2148_v39 = vld [vmem:[%s2735_s9 + $0xac0] sm:$0xff] }
 0x217   : > { %2063 = vst [vmem:[%s3840_s14 + $0x1268] sm:$0xff] %v2062_v60  ;;  %2065 = vst [vmem:[%s3840_s14 + $0x1270] sm:$0xff] %v2064_v61  ;;  %v2150_v40 = vld [vmem:[%s2735_s9 + $0xac8] sm:$0xff]  ;;  %v2152_v41 = vld [vmem:[%s2735_s9 + $0xad0] sm:$0xff] }
 0x218   : > { %2067 = vst [vmem:[%s3840_s14 + $0x1278] sm:$0xff] %v2066_v62  ;;  %2069 = vst [vmem:[%s3840_s14 + $0x1300] sm:$0xff] %v2068_v63  ;;  %v2154_v42 = vld [vmem:[%s2735_s9 + $0xad8] sm:$0xff]  ;;  %v2156_v43 = vld [vmem:[%s2735_s9 + $0xae0] sm:$0xff] }
 0x219   : > { %2071 = vst [vmem:[%s3840_s14 + $0x1308] sm:$0xff] %v2070_v0  ;;  %2073 = vst [vmem:[%s3840_s14 + $0x1310] sm:$0xff] %v2072_v1  ;;  %v2158_v44 = vld [vmem:[%s2735_s9 + $0xae8] sm:$0xff]  ;;  %v2160_v45 = vld [vmem:[%s2735_s9 + $0xaf0] sm:$0xff] }
 0x21a   : > { %2075 = vst [vmem:[%s3840_s14 + $0x1318] sm:$0xff] %v2074_v2  ;;  %2077 = vst [vmem:[%s3840_s14 + $0x1320] sm:$0xff] %v2076_v3  ;;  %v2162_v46 = vld [vmem:[%s2735_s9 + $0xaf8] sm:$0xff]  ;;  %v2164_v47 = vld [vmem:[%s2735_s9 + $0xb00] sm:$0xff] }
 0x21b   : > { %2079 = vst [vmem:[%s3840_s14 + $0x1328] sm:$0xff] %v2078_v4  ;;  %2081 = vst [vmem:[%s3840_s14 + $0x1330] sm:$0xff] %v2080_v5  ;;  %v2166_v48 = vld [vmem:[%s2735_s9 + $0xb08] sm:$0xff]  ;;  %v2168_v49 = vld [vmem:[%s2735_s9 + $0xb10] sm:$0xff] }
 0x21c   : > { %2083 = vst [vmem:[%s3840_s14 + $0x1338] sm:$0xff] %v2082_v6  ;;  %2085 = vst [vmem:[%s3840_s14 + $0x1340] sm:$0xff] %v2084_v7  ;;  %v2170_v50 = vld [vmem:[%s2735_s9 + $0xb18] sm:$0xff]  ;;  %v2172_v51 = vld [vmem:[%s2735_s9 + $0xb20] sm:$0xff] }
 0x21d   : > { %2087 = vst [vmem:[%s3840_s14 + $0x1348] sm:$0xff] %v2086_v8  ;;  %2089 = vst [vmem:[%s3840_s14 + $0x1350] sm:$0xff] %v2088_v9  ;;  %v2174_v52 = vld [vmem:[%s2735_s9 + $0xb28] sm:$0xff]  ;;  %v2176_v53 = vld [vmem:[%s2735_s9 + $0xb30] sm:$0xff] }
 0x21e   : > { %2091 = vst [vmem:[%s3840_s14 + $0x1358] sm:$0xff] %v2090_v10  ;;  %2093 = vst [vmem:[%s3840_s14 + $0x1360] sm:$0xff] %v2092_v11  ;;  %v2178_v54 = vld [vmem:[%s2735_s9 + $0xb38] sm:$0xff]  ;;  %v2180_v55 = vld [vmem:[%s2735_s9 + $0xb40] sm:$0xff] }
 0x21f   : > { %2095 = vst [vmem:[%s3840_s14 + $0x1368] sm:$0xff] %v2094_v12  ;;  %2097 = vst [vmem:[%s3840_s14 + $0x1370] sm:$0xff] %v2096_v13  ;;  %v2182_v56 = vld [vmem:[%s2735_s9 + $0xb48] sm:$0xff]  ;;  %v2184_v57 = vld [vmem:[%s2735_s9 + $0xb50] sm:$0xff] }
 0x220   : > { %2099 = vst [vmem:[%s3840_s14 + $0x1378] sm:$0xff] %v2098_v14  ;;  %2101 = vst [vmem:[%s3840_s14 + $0x1400] sm:$0xff] %v2100_v15  ;;  %v2186_v58 = vld [vmem:[%s2735_s9 + $0xb58] sm:$0xff]  ;;  %v2188_v59 = vld [vmem:[%s2735_s9 + $0xb60] sm:$0xff] }
 0x221   : > { %2103 = vst [vmem:[%s3840_s14 + $0x1408] sm:$0xff] %v2102_v16  ;;  %2105 = vst [vmem:[%s3840_s14 + $0x1410] sm:$0xff] %v2104_v17  ;;  %v2190_v60 = vld [vmem:[%s2735_s9 + $0xb68] sm:$0xff]  ;;  %v2192_v61 = vld [vmem:[%s2735_s9 + $0xb70] sm:$0xff] }
 0x222   : > { %2107 = vst [vmem:[%s3840_s14 + $0x1418] sm:$0xff] %v2106_v18  ;;  %2109 = vst [vmem:[%s3840_s14 + $0x1420] sm:$0xff] %v2108_v19  ;;  %v2194_v62 = vld [vmem:[%s2735_s9 + $0xb78] sm:$0xff] }
 0x223   : > { %2111 = vst [vmem:[%s3840_s14 + $0x1428] sm:$0xff] %v2110_v20  ;;  %2113 = vst [vmem:[%s3840_s14 + $0x1430] sm:$0xff] %v2112_v21 }
 0x224   : > { %2115 = vst [vmem:[%s3840_s14 + $0x1438] sm:$0xff] %v2114_v22  ;;  %2117 = vst [vmem:[%s3840_s14 + $0x1440] sm:$0xff] %v2116_v23 }
 0x225   : > { %2119 = vst [vmem:[%s3840_s14 + $0x1448] sm:$0xff] %v2118_v24  ;;  %2121 = vst [vmem:[%s3840_s14 + $0x1450] sm:$0xff] %v2120_v25 }
 0x226   : > { %2123 = vst [vmem:[%s3840_s14 + $0x1458] sm:$0xff] %v2122_v26  ;;  %2125 = vst [vmem:[%s3840_s14 + $0x1460] sm:$0xff] %v2124_v27 }
 0x227   : > { %2127 = vst [vmem:[%s3840_s14 + $0x1468] sm:$0xff] %v2126_v28  ;;  %2129 = vst [vmem:[%s3840_s14 + $0x1470] sm:$0xff] %v2128_v29 }
 0x228   : > { %2131 = vst [vmem:[%s3840_s14 + $0x1478] sm:$0xff] %v2130_v30  ;;  %2133 = vst [vmem:[%s3840_s14 + $0x1500] sm:$0xff] %v2132_v31 }
 0x229   : > { %2135 = vst [vmem:[%s3840_s14 + $0x1508] sm:$0xff] %v2134_v32  ;;  %2137 = vst [vmem:[%s3840_s14 + $0x1510] sm:$0xff] %v2136_v33 }
 0x22a   : > { %2139 = vst [vmem:[%s3840_s14 + $0x1518] sm:$0xff] %v2138_v34  ;;  %2141 = vst [vmem:[%s3840_s14 + $0x1520] sm:$0xff] %v2140_v35 }
 0x22b   : > { %2143 = vst [vmem:[%s3840_s14 + $0x1528] sm:$0xff] %v2142_v36  ;;  %2145 = vst [vmem:[%s3840_s14 + $0x1530] sm:$0xff] %v2144_v37 }
 0x22c   : > { %2147 = vst [vmem:[%s3840_s14 + $0x1538] sm:$0xff] %v2146_v38  ;;  %2149 = vst [vmem:[%s3840_s14 + $0x1540] sm:$0xff] %v2148_v39 }
 0x22d   : > { %2151 = vst [vmem:[%s3840_s14 + $0x1548] sm:$0xff] %v2150_v40  ;;  %2153 = vst [vmem:[%s3840_s14 + $0x1550] sm:$0xff] %v2152_v41 }
 0x22e   : > { %2155 = vst [vmem:[%s3840_s14 + $0x1558] sm:$0xff] %v2154_v42  ;;  %2157 = vst [vmem:[%s3840_s14 + $0x1560] sm:$0xff] %v2156_v43 }
 0x22f   : > { %2159 = vst [vmem:[%s3840_s14 + $0x1568] sm:$0xff] %v2158_v44  ;;  %2161 = vst [vmem:[%s3840_s14 + $0x1570] sm:$0xff] %v2160_v45 }
 0x230   : > { %2163 = vst [vmem:[%s3840_s14 + $0x1578] sm:$0xff] %v2162_v46  ;;  %2165 = vst [vmem:[%s3840_s14 + $0x1600] sm:$0xff] %v2164_v47 }
 0x231   : > { %2167 = vst [vmem:[%s3840_s14 + $0x1608] sm:$0xff] %v2166_v48  ;;  %2169 = vst [vmem:[%s3840_s14 + $0x1610] sm:$0xff] %v2168_v49 }
 0x232   : > { %2171 = vst [vmem:[%s3840_s14 + $0x1618] sm:$0xff] %v2170_v50  ;;  %2173 = vst [vmem:[%s3840_s14 + $0x1620] sm:$0xff] %v2172_v51 }
 0x233   : > { %2175 = vst [vmem:[%s3840_s14 + $0x1628] sm:$0xff] %v2174_v52  ;;  %2177 = vst [vmem:[%s3840_s14 + $0x1630] sm:$0xff] %v2176_v53 }
 0x234   : > { %2179 = vst [vmem:[%s3840_s14 + $0x1638] sm:$0xff] %v2178_v54  ;;  %2181 = vst [vmem:[%s3840_s14 + $0x1640] sm:$0xff] %v2180_v55 }
 0x235   : > { %2183 = vst [vmem:[%s3840_s14 + $0x1648] sm:$0xff] %v2182_v56  ;;  %2185 = vst [vmem:[%s3840_s14 + $0x1650] sm:$0xff] %v2184_v57 }
 0x236   : > { %2187 = vst [vmem:[%s3840_s14 + $0x1658] sm:$0xff] %v2186_v58  ;;  %2189 = vst [vmem:[%s3840_s14 + $0x1660] sm:$0xff] %v2188_v59 }
 0x237   : > { %2191 = vst [vmem:[%s3840_s14 + $0x1668] sm:$0xff] %v2190_v60  ;;  %2193 = vst [vmem:[%s3840_s14 + $0x1670] sm:$0xff] %v2192_v61 }
 0x238   : > { %2195 = vst [vmem:[%s3840_s14 + $0x1678] sm:$0xff] %v2194_v62 }
 0x239 PF: > { %s15_s18 = sadd.s32 1, %s2510_s18   ;;  %s4604_s9 = smov %s2478_s10 }
 0x23a   : > { %p12_p0 = scmp.ge.s32.totalorder %s15_s18, 6   ;;  %s4605_s10 = smov %s2612_s30 }
 0x23b   : > { %s4606_s11 = smov %s2486_s12  ;;  %s4607_s12 = smov %s2490_s13 }
 0x23c   : > { %s4608_s13 = smov %s2609_s29  ;;  %s4609_s14 = smov %s2502_s16 }
 0x23d   : > { %s4610_s15 = smov %s2506_s17  ;;  %s4611_s16 = smov %s4614_s20 }
 0x23e   : > { %s4612_s17 = smov %s4618_s21  ;;  %14 = sbr.rel (!%p12_p0) target bundleno = 6 (0x6), region = 94 }
 0x245   :  { %2211 = vsyncpa [#allocation3], 1 }
 0x246   :  { %2213 = vsyncpa [#allocation3 + $0x1], 1 }

</bundles_post_ra>
